<compile_context>
chip_gen: v7x
topology: tpu7x:2x2x1
jax: 0.10.0
libtpu: 0.0.40
codegen_flags: <defaults>
</compile_context>

<pallas_src>
import functools

import numpy as np
import jax
import jax.numpy as jnp
from jax import lax
from jax.experimental import pallas as pl
from jax.experimental.pallas import tpu as pltpu

PAD = 0          # Constants.PAD
LN_EPS = 1e-5    # nn.LayerNorm default eps
NEG_INF = -1e9   # stand-in for masked_fill(-inf) (same softmax result, no NaN rows)


# ------------------------------- kernel --------------------------------------

def _layer_norm(x, g, b):
    mean = jnp.mean(x, axis=-1, keepdims=True)
    var = jnp.mean((x - mean) ** 2, axis=-1, keepdims=True)
    return (x - mean) * lax.rsqrt(var + LN_EPS) * g + b


def _softmax_rows(s):
    s = s - jnp.max(s, axis=-1, keepdims=True)
    p = jnp.exp(s)
    return p * pl.reciprocal(jnp.sum(p, axis=-1, keepdims=True), approx=True)


def decoder_layer_kernel(dec_ref, enc_ref, slf_pad_ref, enc_pad_ref, npm_ref,
                         wqkv_ref, bqkv_ref, wo_s_ref, bo_s_ref, ln1g_ref, ln1b_ref,
                         wq_c_ref, bq_c_ref, wkv_c_ref, bkv_c_ref, wo_c_ref, bo_c_ref,
                         ln2g_ref, ln2b_ref,
                         w1_ref, b1_ref, w2_ref, b2_ref, ln3g_ref, ln3b_ref,
                         o_ref,
                         slf_bias_ref, cross_bias_ref, ctx_ref,
                         *, n_head, d_k, d_v):
    f32 = jnp.float32
    bf16 = jnp.bfloat16
    len_q = dec_ref.shape[1]
    len_k = enc_ref.shape[1]
    Hdk = n_head * d_k
    inv_temp = 1.0 / (float(d_k) ** 0.5)
    li = pl.program_id(1)

    @pl.when(li == 0)
    def _init():
        # New batch example: seed the resident activation slab and build the
        # tiny per-example additive attention biases once; reuse for all layers.
        o_ref[0] = dec_ref[0]
        r = lax.broadcasted_iota(jnp.int32, (len_q, len_q), 0)
        c = lax.broadcasted_iota(jnp.int32, (len_q, len_q), 1)
        key_pad = slf_pad_ref[0] > 0.5                             # (1, Lq)
        slf_mask = jnp.logical_or(c > r, key_pad)                  # causal | key-pad
        slf_bias_ref[...] = jnp.where(slf_mask, NEG_INF, 0.0).astype(f32)
        enc_key_pad = enc_pad_ref[0] > 0.5                         # (1, Lk)
        cross_bias_ref[...] = jnp.where(
            jnp.broadcast_to(enc_key_pad, (len_q, len_k)), NEG_INF, 0.0).astype(f32)

    x = o_ref[0]                       # (Lq, D) f32 activation, resident across layers
    npm = npm_ref[0]                   # (Lq, 1)  non-pad mask
    slf_bias = slf_bias_ref[...]       # (Lq, Lq)
    cross_bias = cross_bias_ref[...]   # (Lq, Lk)

    # ---------------- masked multi-head self attention -----------------------
    xb = x.astype(bf16)
    qkv = jnp.dot(xb, wqkv_ref[0], preferred_element_type=f32) + bqkv_ref[0]
    for h in range(n_head):
        qh = qkv[:, h * d_k:(h + 1) * d_k]
        kh = qkv[:, Hdk + h * d_k: Hdk + (h + 1) * d_k]
        vh = qkv[:, 2 * Hdk + h * d_v: 2 * Hdk + (h + 1) * d_v]
        s = lax.dot_general(qh.astype(bf16), kh.astype(bf16),
                            (((1,), (1,)), ((), ())),
                            preferred_element_type=f32) * inv_temp + slf_bias
        p = _softmax_rows(s)
        ctx_ref[:, h * d_v:(h + 1) * d_v] = jnp.dot(
            p.astype(bf16), vh.astype(bf16), preferred_element_type=f32)
    # one big-K output projection instead of n_head tiny-K matmuls
    attn_out = jnp.dot(ctx_ref[...].astype(bf16), wo_s_ref[0],
                       preferred_element_type=f32) + bo_s_ref[0]
    y = _layer_norm(attn_out + x, ln1g_ref[0], ln1b_ref[0]) * npm

    # ---------------- multi-head encoder-decoder attention -------------------
    enc_b = enc_ref[0]                                              # (Lk, D) bf16
    yb = y.astype(bf16)
    qc = jnp.dot(yb, wq_c_ref[0], preferred_element_type=f32) + bq_c_ref[0]
    kvc = jnp.dot(enc_b, wkv_c_ref[0], preferred_element_type=f32) + bkv_c_ref[0]
    for h in range(n_head):
        qh = qc[:, h * d_k:(h + 1) * d_k]
        kh = kvc[:, h * d_k:(h + 1) * d_k]
        vh = kvc[:, Hdk + h * d_v: Hdk + (h + 1) * d_v]
        s = lax.dot_general(qh.astype(bf16), kh.astype(bf16),
                            (((1,), (1,)), ((), ())),
                            preferred_element_type=f32) * inv_temp + cross_bias
        p = _softmax_rows(s)
        ctx_ref[:, h * d_v:(h + 1) * d_v] = jnp.dot(
            p.astype(bf16), vh.astype(bf16), preferred_element_type=f32)
    cross_out = jnp.dot(ctx_ref[...].astype(bf16), wo_c_ref[0],
                        preferred_element_type=f32) + bo_c_ref[0]
    z = _layer_norm(cross_out + y, ln2g_ref[0], ln2b_ref[0]) * npm

    # ---------------- position-wise feed forward ------------------------------
    h1 = jnp.maximum(
        jnp.dot(z.astype(bf16), w1_ref[0], preferred_element_type=f32) + b1_ref[0], 0.0)
    ffn = jnp.dot(h1.astype(bf16), w2_ref[0], preferred_element_type=f32) + b2_ref[0]
    o_ref[0] = _layer_norm(ffn + z, ln3g_ref[0], ln3b_ref[0]) * npm


# ------------------------------ wrapper (glue) --------------------------------

_PACKED_ORDER = ("wqkv_s", "bqkv_s", "wo_s", "bo_s", "ln1_g", "ln1_b",
                 "wq_c", "bq_c", "wkv_c", "bkv_c", "wo_c", "bo_c", "ln2_g", "ln2_b",
                 "w1", "b1", "w2", "b2", "ln3_g", "ln3_b")


def decoder_stack_pallas(dec, enc, slf_pad, enc_pad, npm, packed, *,
                         n_layers, n_head, d_k, d_v):
    B, Lq, D = dec.shape
    Lk = enc.shape[1]
    Hdk = n_head * d_k
    Hdv = n_head * d_v
    d_inner = packed["w1"].shape[-1]

    def ex_spec(shape):   # per-example block, constant across the layer axis
        return pl.BlockSpec((1,) + tuple(shape[1:]), lambda b, li: (b, 0, 0))

    def ly_spec(shape):   # per-layer streamed weight block (auto double-buffered)
        return pl.BlockSpec((1,) + tuple(shape[1:]), lambda b, li: (li, 0, 0))

    data = [dec, enc, slf_pad, enc_pad, npm]
    weights = [packed[k] for k in _PACKED_ORDER]
    args = data + weights
    in_specs = [ex_spec(a.shape) for a in data] + [ly_spec(w.shape) for w in weights]
    # output block index depends only on batch -> resident accumulator across layers
    out_spec = pl.BlockSpec((1, Lq, D), lambda b, li: (b, 0, 0))

    kernel = functools.partial(decoder_layer_kernel, n_head=n_head, d_k=d_k, d_v=d_v)

    flops = 2 * B * n_layers * (
        Lq * D * 3 * Hdk + n_head * Lq * Lq * (d_k + d_v) + Lq * Hdv * D
        + Lq * D * Hdk + Lk * D * (Hdk + Hdv) + n_head * Lq * Lk * (d_k + d_v)
        + Lq * Hdv * D + 2 * Lq * D * d_inner)
    transc = B * n_layers * n_head * Lq * (Lq + Lk)
    bytes_accessed = int(sum(int(np.prod(a.shape)) * a.dtype.itemsize for a in args)
                         + B * Lq * D * 4)

    return pl.pallas_call(
        kernel,
        out_shape=jax.ShapeDtypeStruct((B, Lq, D), jnp.float32),
        grid=(B, n_layers),
        in_specs=in_specs,
        out_specs=out_spec,
        scratch_shapes=[pltpu.VMEM((Lq, Lq), jnp.float32),   # self-attn bias
                        pltpu.VMEM((Lq, Lk), jnp.float32),   # cross-attn bias
                        pltpu.VMEM((Lq, Hdv), jnp.float32)], # per-head ctx slab
        compiler_params=pltpu.CompilerParams(
            dimension_semantics=("parallel", "arbitrary"),
            vmem_limit_bytes=48 * 1024 * 1024),
        cost_estimate=pl.CostEstimate(flops=int(flops), transcendentals=int(transc),
                                      bytes_accessed=bytes_accessed),
    )(*args)


def get_sinusoid_encoding_table(n_position, d_hid, padding_idx=None):
    def cal_angle(position, hid_idx):
        return position / np.power(10000, 2 * (hid_idx // 2) / d_hid)

    table = np.array([[cal_angle(p, j) for j in range(d_hid)] for p in range(n_position)])
    table[:, 0::2] = np.sin(table[:, 0::2])
    table[:, 1::2] = np.cos(table[:, 1::2])
    if padding_idx is not None:
        table[padding_idx] = 0.0
    return jnp.asarray(table, dtype=jnp.float32)


def init_decoder_params(key, *, n_tgt_vocab, len_max_seq, d_word_vec, n_layers,
                        n_head, d_k, d_v, d_model, d_inner):
    keys = jax.random.split(key, 2 + n_layers)
    word_emb = 0.02 * jax.random.normal(keys[0], (n_tgt_vocab, d_word_vec), jnp.float32)
    word_emb = word_emb.at[PAD].set(0.0)                       # padding_idx=PAD row zero
    pos_table = get_sinusoid_encoding_table(len_max_seq + 1, d_word_vec, padding_idx=0)
    sen_pos_table = get_sinusoid_encoding_table(25, d_word_vec, padding_idx=0)

    # 2-layer LSTM(d_word_vec -> d_word_vec), PyTorch gate order [i, f, g, o]
    D = d_word_vec
    bound = 1.0 / np.sqrt(D)
    lk = jax.random.split(keys[1], 4)
    lstm = {
        "w_ih": jax.random.uniform(lk[0], (2, 4 * D, D), jnp.float32, -bound, bound),
        "w_hh": jax.random.uniform(lk[1], (2, 4 * D, D), jnp.float32, -bound, bound),
        "b_ih": jax.random.uniform(lk[2], (2, 4 * D), jnp.float32, -bound, bound),
        "b_hh": jax.random.uniform(lk[3], (2, 4 * D), jnp.float32, -bound, bound),
    }

    layers = []
    for li in range(n_layers):
        ks = jax.random.split(keys[2 + li], 10)

        def w(k, shape):
            return 0.02 * jax.random.normal(k, shape, jnp.float32)

        layers.append({
            "slf_wq": w(ks[0], (d_model, n_head * d_k)),
            "slf_wk": w(ks[1], (d_model, n_head * d_k)),
            "slf_wv": w(ks[2], (d_model, n_head * d_v)),
            "slf_bq": jnp.zeros((1, n_head * d_k), jnp.float32),
            "slf_bk": jnp.zeros((1, n_head * d_k), jnp.float32),
            "slf_bv": jnp.zeros((1, n_head * d_v), jnp.float32),
            "slf_wo": w(ks[3], (n_head * d_v, d_model)),
            "slf_bo": jnp.zeros((1, d_model), jnp.float32),
            "ln1_g": jnp.ones((1, d_model), jnp.float32),
            "ln1_b": jnp.zeros((1, d_model), jnp.float32),
            "enc_wq": w(ks[4], (d_model, n_head * d_k)),
            "enc_wk": w(ks[5], (d_model, n_head * d_k)),
            "enc_wv": w(ks[6], (d_model, n_head * d_v)),
            "enc_bq": jnp.zeros((1, n_head * d_k), jnp.float32),
            "enc_bk": jnp.zeros((1, n_head * d_k), jnp.float32),
            "enc_bv": jnp.zeros((1, n_head * d_v), jnp.float32),
            "enc_wo": w(ks[7], (n_head * d_v, d_model)),
            "enc_bo": jnp.zeros((1, d_model), jnp.float32),
            "ln2_g": jnp.ones((1, d_model), jnp.float32),
            "ln2_b": jnp.zeros((1, d_model), jnp.float32),
            "w1": w(ks[8], (d_model, d_inner)),
            "b1": jnp.zeros((1, d_inner), jnp.float32),
            "w2": w(ks[9], (d_inner, d_model)),
            "b2": jnp.zeros((1, d_model), jnp.float32),
            "ln3_g": jnp.ones((1, d_model), jnp.float32),
            "ln3_b": jnp.zeros((1, d_model), jnp.float32),
        })

    # pack per-layer weights into layer-stacked, QKV-fused, bf16 MXU operands
    bf16 = jnp.bfloat16
    packed = {
        "wqkv_s": jnp.stack([jnp.concatenate([l["slf_wq"], l["slf_wk"], l["slf_wv"]], 1)
                             for l in layers]).astype(bf16),
        "bqkv_s": jnp.stack([jnp.concatenate([l["slf_bq"], l["slf_bk"], l["slf_bv"]], 1)
                             for l in layers]),
        "wo_s": jnp.stack([l["slf_wo"] for l in layers]).astype(bf16),   # (L, Hdv, D)
        "bo_s": jnp.stack([l["slf_bo"] for l in layers]),
        "ln1_g": jnp.stack([l["ln1_g"] for l in layers]),
        "ln1_b": jnp.stack([l["ln1_b"] for l in layers]),
        "wq_c": jnp.stack([l["enc_wq"] for l in layers]).astype(bf16),
        "bq_c": jnp.stack([l["enc_bq"] for l in layers]),
        "wkv_c": jnp.stack([jnp.concatenate([l["enc_wk"], l["enc_wv"]], 1)
                            for l in layers]).astype(bf16),
        "bkv_c": jnp.stack([jnp.concatenate([l["enc_bk"], l["enc_bv"]], 1)
                            for l in layers]),
        "wo_c": jnp.stack([l["enc_wo"] for l in layers]).astype(bf16),   # (L, Hdv, D)
        "bo_c": jnp.stack([l["enc_bo"] for l in layers]),
        "ln2_g": jnp.stack([l["ln2_g"] for l in layers]),
        "ln2_b": jnp.stack([l["ln2_b"] for l in layers]),
        "w1": jnp.stack([l["w1"] for l in layers]).astype(bf16),
        "b1": jnp.stack([l["b1"] for l in layers]),
        "w2": jnp.stack([l["w2"] for l in layers]).astype(bf16),
        "b2": jnp.stack([l["b2"] for l in layers]),
        "ln3_g": jnp.stack([l["ln3_g"] for l in layers]),
        "ln3_b": jnp.stack([l["ln3_b"] for l in layers]),
    }
    return {"word_emb": word_emb, "pos_table": pos_table, "sen_pos_table": sen_pos_table,
            "lstm": lstm, "packed": packed, "n_layers": n_layers}


def lstm_forward(lstm, x_seq, state):
    """2-layer LSTM matching nn.LSTM semantics. x_seq: (T, B, D)."""
    w_ih, w_hh, b_ih, b_hh = lstm["w_ih"], lstm["w_hh"], lstm["b_ih"], lstm["b_hh"]
    num_layers = w_ih.shape[0]

    def step(carry, x_t):
        h, c = carry
        new_h, new_c = [], []
        inp = x_t
        for l in range(num_layers):
            gates = inp @ w_ih[l].T + b_ih[l] + h[l] @ w_hh[l].T + b_hh[l]
            i, f, g, o = jnp.split(gates, 4, axis=-1)
            i = jax.nn.sigmoid(i)
            f = jax.nn.sigmoid(f)
            g = jnp.tanh(g)
            o = jax.nn.sigmoid(o)
            c_l = f * c[l] + i * g
            h_l = o * jnp.tanh(c_l)
            new_h.append(h_l)
            new_c.append(c_l)
            inp = h_l
        return (jnp.stack(new_h), jnp.stack(new_c)), inp

    (h, c), outs = lax.scan(step, state, x_seq)
    return outs, (h, c)


def decoder_forward(params, tgt_seq, tgt_pos, tgt_sen_pos, src_seq, enc_output,
                    prev_sentences, story_len, *, n_head, d_k, d_v, len_max_seq):
    B, L_tgt = tgt_seq.shape
    D = params["word_emb"].shape[1]

    # --- LSTM over previous sentences (carrying hidden state across sentences) ---
    # TODO(synk): LSTM recurrence kept in plain JAX (sequential, tiny; no useful Pallas tiling here).
    num_lstm_layers = params["lstm"]["w_ih"].shape[0]
    state = (jnp.zeros((num_lstm_layers, B, D), jnp.float32),
             jnp.zeros((num_lstm_layers, B, D), jnp.float32))
    lstm_out = None
    for sentence in prev_sentences:
        embeds = params["word_emb"][sentence]                 # (B, len_max_seq, D)
        embeds = embeds.reshape(len_max_seq, -1, D)           # .view(...) as in reference
        lstm_out, state = lstm_forward(params["lstm"], embeds, state)
    lstm_last = jnp.transpose(lstm_out[-1:], (1, 0, 2))       # (B, 1, D)

    # --- build decoder input exactly as the reference ---
    ones_col = jnp.ones((B, 1), tgt_seq.dtype)
    zeros_col = jnp.zeros((B, 1), tgt_seq.dtype)
    sen_emb_tgt_seq = jnp.concatenate([ones_col, tgt_seq], axis=1)      # (B, L+1)
    tgt_pos_c = jnp.concatenate([zeros_col, tgt_pos], axis=1)
    tgt_sen_pos_c = jnp.concatenate([zeros_col, tgt_sen_pos], axis=1)

    dec = jnp.concatenate([lstm_last, params["word_emb"][tgt_seq]], axis=1)  # (B, L+1, D)
    dec = dec + params["pos_table"][tgt_pos_c]

    # sentence-position remap (==1 -> 1, (1, s_len) -> 2, ==s_len -> 3)
    s_len = story_len.astype(tgt_sen_pos_c.dtype)[:, None]
    tsp = tgt_sen_pos_c
    tsp = jnp.where(tsp == s_len, 3,
                    jnp.where((tsp > 1) & (tsp < s_len), 2, tsp)).astype(jnp.int32)
    dec = dec + params["sen_pos_table"][tsp]

    # O(L) pad rows only — the (Lq x Lq)/(Lq x Lk) biases are built inside the kernel
    npm = (sen_emb_tgt_seq != PAD).astype(jnp.float32)[:, :, None]      # (B, Lq, 1)
    slf_pad = (sen_emb_tgt_seq == PAD).astype(jnp.float32)[:, None, :]  # (B, 1, Lq)
    enc_pad = (src_seq == PAD).astype(jnp.float32)[:, None, :]          # (B, 1, Lk)

    out = decoder_stack_pallas(dec.astype(jnp.float32),
                               enc_output.astype(jnp.bfloat16),
                               slf_pad, enc_pad, npm, params["packed"],
                               n_layers=params["n_layers"],
                               n_head=n_head, d_k=d_k, d_v=d_v)
    return (out,)


# --------------------------------- main ---------------------------------------

if __name__ == "__main__":
    # small config consistent with the module
    n_tgt_vocab, len_max_seq = 50, 8
    d_word_vec = d_model = 32
    n_layers, n_head, d_k, d_v, d_inner = 2, 4, 8, 8, 64
    B, L_src, n_prev = 2, 8, 2

    key = jax.random.PRNGKey(0)
    pkey, k1, k2, k3, k4 = jax.random.split(key, 5)
    params = init_decoder_params(pkey, n_tgt_vocab=n_tgt_vocab, len_max_seq=len_max_seq,
                                 d_word_vec=d_word_vec, n_layers=n_layers, n_head=n_head,
                                 d_k=d_k, d_v=d_v, d_model=d_model, d_inner=d_inner)

    # deterministic token ids with trailing PAD(=0) to exercise the masks
    tgt_seq = jax.random.randint(k1, (B, len_max_seq), 1, n_tgt_vocab).astype(jnp.int32)
    tgt_seq = tgt_seq.at[0, 6:].set(PAD).at[1, 7:].set(PAD)
    tgt_pos = jnp.where(tgt_seq != PAD,
                        jnp.broadcast_to(jnp.arange(1, len_max_seq + 1, dtype=jnp.int32),
                                         (B, len_max_seq)), 0).astype(jnp.int32)
    tgt_sen_pos = jnp.where(tgt_seq != PAD,
                            jnp.broadcast_to(jnp.arange(len_max_seq, dtype=jnp.int32) // 4 + 1,
                                             (B, len_max_seq)), 0).astype(jnp.int32)
    src_seq = jax.random.randint(k2, (B, L_src), 1, n_tgt_vocab).astype(jnp.int32)
    src_seq = src_seq.at[0, 5:].set(PAD)
    enc_output = 0.1 * jax.random.normal(k3, (B, L_src, d_model), jnp.float32)
    prev_sentences = [
        jax.random.randint(jax.random.fold_in(k4, i), (B, len_max_seq), 1,
                           n_tgt_vocab).astype(jnp.int32)
        for i in range(n_prev)
    ]
    story_len = jnp.array([2, 3], dtype=jnp.int32)

    (out,) = decoder_forward(params, tgt_seq, tgt_pos, tgt_sen_pos, src_seq, enc_output,
                             prev_sentences, story_len,
                             n_head=n_head, d_k=d_k, d_v=d_v, len_max_seq=len_max_seq)
    out = jax.block_until_ready(out)
    assert out.shape == (B, len_max_seq + 1, d_model)
    assert bool(jnp.all(jnp.isfinite(out)))
    print("KERNEL_OK")
</pallas_src>

<mosaic_0001>
module attributes {stable_mosaic.version = 11 : i64} {
  func.func @decoder_layer_kernel(%arg0: i32, %arg1: i32, %arg2: memref<1x9x32xf32, #tpu.memory_space<vmem>>, %arg3: memref<1x8x32xbf16, #tpu.memory_space<vmem>>, %arg4: memref<1x1x9xf32, #tpu.memory_space<vmem>>, %arg5: memref<1x1x8xf32, #tpu.memory_space<vmem>>, %arg6: memref<1x9x1xf32, #tpu.memory_space<vmem>>, %arg7: memref<1x32x96xbf16, #tpu.memory_space<vmem>>, %arg8: memref<1x1x96xf32, #tpu.memory_space<vmem>>, %arg9: memref<1x32x32xbf16, #tpu.memory_space<vmem>>, %arg10: memref<1x1x32xf32, #tpu.memory_space<vmem>>, %arg11: memref<1x1x32xf32, #tpu.memory_space<vmem>>, %arg12: memref<1x1x32xf32, #tpu.memory_space<vmem>>, %arg13: memref<1x32x32xbf16, #tpu.memory_space<vmem>>, %arg14: memref<1x1x32xf32, #tpu.memory_space<vmem>>, %arg15: memref<1x32x64xbf16, #tpu.memory_space<vmem>>, %arg16: memref<1x1x64xf32, #tpu.memory_space<vmem>>, %arg17: memref<1x32x32xbf16, #tpu.memory_space<vmem>>, %arg18: memref<1x1x32xf32, #tpu.memory_space<vmem>>, %arg19: memref<1x1x32xf32, #tpu.memory_space<vmem>>, %arg20: memref<1x1x32xf32, #tpu.memory_space<vmem>>, %arg21: memref<1x32x64xbf16, #tpu.memory_space<vmem>>, %arg22: memref<1x1x64xf32, #tpu.memory_space<vmem>>, %arg23: memref<1x64x32xbf16, #tpu.memory_space<vmem>>, %arg24: memref<1x1x32xf32, #tpu.memory_space<vmem>>, %arg25: memref<1x1x32xf32, #tpu.memory_space<vmem>>, %arg26: memref<1x1x32xf32, #tpu.memory_space<vmem>>, %arg27: memref<1x9x32xf32, #tpu.memory_space<vmem>>, %arg28: memref<9x9xf32, #tpu.memory_space<vmem>>, %arg29: memref<9x8xf32, #tpu.memory_space<vmem>>, %arg30: memref<9x32xf32, #tpu.memory_space<vmem>>) attributes {dimension_semantics = [#tpu.dimension_semantics<parallel>, #tpu.dimension_semantics<arbitrary>], iteration_bounds = array<i64: 2, 2>, scalar_prefetch = 0 : i64, scratch_operands = 3 : i64, tpu.core_type = #tpu.core_type<tc>, window_params = [{transform_indices = @transform_0, window_bounds = array<i64: 1, 9, 32>}, {transform_indices = @transform_1, window_bounds = array<i64: 1, 8, 32>}, {transform_indices = @transform_2, window_bounds = array<i64: 1, 1, 9>}, {transform_indices = @transform_3, window_bounds = array<i64: 1, 1, 8>}, {transform_indices = @transform_4, window_bounds = array<i64: 1, 9, 1>}, {transform_indices = @transform_5, window_bounds = array<i64: 1, 32, 96>}, {transform_indices = @transform_6, window_bounds = array<i64: 1, 1, 96>}, {transform_indices = @transform_7, window_bounds = array<i64: 1, 32, 32>}, {transform_indices = @transform_8, window_bounds = array<i64: 1, 1, 32>}, {transform_indices = @transform_9, window_bounds = array<i64: 1, 1, 32>}, {transform_indices = @transform_10, window_bounds = array<i64: 1, 1, 32>}, {transform_indices = @transform_11, window_bounds = array<i64: 1, 32, 32>}, {transform_indices = @transform_12, window_bounds = array<i64: 1, 1, 32>}, {transform_indices = @transform_13, window_bounds = array<i64: 1, 32, 64>}, {transform_indices = @transform_14, window_bounds = array<i64: 1, 1, 64>}, {transform_indices = @transform_15, window_bounds = array<i64: 1, 32, 32>}, {transform_indices = @transform_16, window_bounds = array<i64: 1, 1, 32>}, {transform_indices = @transform_17, window_bounds = array<i64: 1, 1, 32>}, {transform_indices = @transform_18, window_bounds = array<i64: 1, 1, 32>}, {transform_indices = @transform_19, window_bounds = array<i64: 1, 32, 64>}, {transform_indices = @transform_20, window_bounds = array<i64: 1, 1, 64>}, {transform_indices = @transform_21, window_bounds = array<i64: 1, 64, 32>}, {transform_indices = @transform_22, window_bounds = array<i64: 1, 1, 32>}, {transform_indices = @transform_23, window_bounds = array<i64: 1, 1, 32>}, {transform_indices = @transform_24, window_bounds = array<i64: 1, 1, 32>}, {transform_indices = @transform_25, window_bounds = array<i64: 1, 9, 32>}]} {
    %c0_i32 = arith.constant 0 : i32
    %0 = arith.cmpi eq, %arg1, %c0_i32 : i32
    %1 = arith.extui %0 : i1 to i32
    %c0_i32_0 = arith.constant 0 : i32
    %2 = arith.cmpi ne, %1, %c0_i32_0 : i32
    scf.if %2 {
      %c0_155 = arith.constant 0 : index
      %c0_156 = arith.constant 0 : index
      %c0_157 = arith.constant 0 : index
      %344 = vector.load %arg2[%c0_155, %c0_156, %c0_157] : memref<1x9x32xf32, #tpu.memory_space<vmem>>, vector<1x9x32xf32>
      %345 = vector.shape_cast %344 : vector<1x9x32xf32> to vector<9x32xf32>
      %c0_158 = arith.constant 0 : index
      %c0_159 = arith.constant 0 : index
      %c0_160 = arith.constant 0 : index
      %346 = vector.load %arg27[%c0_158, %c0_159, %c0_160] : memref<1x9x32xf32, #tpu.memory_space<vmem>>, vector<1x9x32xf32>
      %347 = vector.shape_cast %346 : vector<1x9x32xf32> to vector<9x32xf32>
      %348 = vector.shape_cast %345 : vector<9x32xf32> to vector<1x9x32xf32>
      tpu.vector_store %arg27[%c0_158, %c0_159, %c0_160], %348 {strides = array<i32>} : memref<1x9x32xf32, #tpu.memory_space<vmem>>, vector<1x9x32xf32>,
      %349 = tpu.iota {dimensions = array<i32: 0>} : vector<9x9xi32>
      %350 = tpu.iota {dimensions = array<i32: 1>} : vector<9x9xi32>
      %c0_161 = arith.constant 0 : index
      %c0_162 = arith.constant 0 : index
      %c0_163 = arith.constant 0 : index
      %351 = vector.load %arg4[%c0_161, %c0_162, %c0_163] : memref<1x1x9xf32, #tpu.memory_space<vmem>>, vector<1x1x9xf32>
      %352 = vector.shape_cast %351 : vector<1x1x9xf32> to vector<1x9xf32>
      %cst_164 = arith.constant 5.000000e-01 : f32
      %353 = vector.broadcast %cst_164 : f32 to vector<1x9xf32>
      %354 = arith.cmpf ogt, %352, %353 : vector<1x9xf32>
      %355 = arith.cmpi sgt, %350, %349 : vector<9x9xi32>
      %356 = vector.broadcast %354 : vector<1x9xi1> to vector<9x9xi1>
      %357 = arith.ori %355, %356 : vector<9x9xi1>
      %cst_165 = arith.constant -1.000000e+09 : f32
      %cst_166 = arith.constant 0.000000e+00 : f32
      %358 = vector.broadcast %cst_165 : f32 to vector<9x9xf32>
      %359 = vector.broadcast %cst_166 : f32 to vector<9x9xf32>
      %360 = arith.select %357, %358, %359 : vector<9x9xi1>, vector<9x9xf32>
      %c0_167 = arith.constant 0 : index
      %c0_168 = arith.constant 0 : index
      %361 = vector.load %arg28[%c0_167, %c0_168] : memref<9x9xf32, #tpu.memory_space<vmem>>, vector<9x9xf32>
      tpu.vector_store %arg28[%c0_167, %c0_168], %360 {strides = array<i32>} : memref<9x9xf32, #tpu.memory_space<vmem>>, vector<9x9xf32>,
      %c0_169 = arith.constant 0 : index
      %c0_170 = arith.constant 0 : index
      %c0_171 = arith.constant 0 : index
      %362 = vector.load %arg5[%c0_169, %c0_170, %c0_171] : memref<1x1x8xf32, #tpu.memory_space<vmem>>, vector<1x1x8xf32>
      %363 = vector.shape_cast %362 : vector<1x1x8xf32> to vector<1x8xf32>
      %cst_172 = arith.constant 5.000000e-01 : f32
      %364 = vector.broadcast %cst_172 : f32 to vector<1x8xf32>
      %365 = arith.cmpf ogt, %363, %364 : vector<1x8xf32>
      %366 = vector.shape_cast %365 : vector<1x8xi1> to vector<1x8xi1>
      %367 = vector.broadcast %366 : vector<1x8xi1> to vector<9x8xi1>
      %cst_173 = arith.constant -1.000000e+09 : f32
      %cst_174 = arith.constant 0.000000e+00 : f32
      %368 = vector.broadcast %cst_173 : f32 to vector<9x8xf32>
      %369 = vector.broadcast %cst_174 : f32 to vector<9x8xf32>
      %370 = arith.select %367, %368, %369 : vector<9x8xi1>, vector<9x8xf32>
      %c0_175 = arith.constant 0 : index
      %c0_176 = arith.constant 0 : index
      %371 = vector.load %arg29[%c0_175, %c0_176] : memref<9x8xf32, #tpu.memory_space<vmem>>, vector<9x8xf32>
      tpu.vector_store %arg29[%c0_175, %c0_176], %370 {strides = array<i32>} : memref<9x8xf32, #tpu.memory_space<vmem>>, vector<9x8xf32>,
    } else {
    }
    %c0 = arith.constant 0 : index
    %c0_1 = arith.constant 0 : index
    %c0_2 = arith.constant 0 : index
    %3 = vector.load %arg27[%c0, %c0_1, %c0_2] : memref<1x9x32xf32, #tpu.memory_space<vmem>>, vector<1x9x32xf32>
    %4 = vector.shape_cast %3 : vector<1x9x32xf32> to vector<9x32xf32>
    %c0_3 = arith.constant 0 : index
    %c0_4 = arith.constant 0 : index
    %c0_5 = arith.constant 0 : index
    %5 = vector.load %arg6[%c0_3, %c0_4, %c0_5] : memref<1x9x1xf32, #tpu.memory_space<vmem>>, vector<1x9x1xf32>
    %6 = vector.shape_cast %5 : vector<1x9x1xf32> to vector<9x1xf32>
    %c0_6 = arith.constant 0 : index
    %c0_7 = arith.constant 0 : index
    %7 = vector.load %arg28[%c0_6, %c0_7] : memref<9x9xf32, #tpu.memory_space<vmem>>, vector<9x9xf32>
    %c0_8 = arith.constant 0 : index
    %c0_9 = arith.constant 0 : index
    %8 = vector.load %arg29[%c0_8, %c0_9] : memref<9x8xf32, #tpu.memory_space<vmem>>, vector<9x8xf32>
    %9 = arith.truncf %4 : vector<9x32xf32> to vector<9x32xbf16>
    %c0_10 = arith.constant 0 : index
    %c0_11 = arith.constant 0 : index
    %c0_12 = arith.constant 0 : index
    %10 = vector.load %arg7[%c0_10, %c0_11, %c0_12] : memref<1x32x96xbf16, #tpu.memory_space<vmem>>, vector<1x32x96xbf16>
    %11 = vector.shape_cast %10 : vector<1x32x96xbf16> to vector<32x96xbf16>
    %cst = arith.constant dense<0.000000e+00> : vector<9x96xf32>
    %12 = tpu.matmul %9, %11, %cst {dimension_numbers = #tpu.dot_dimension_numbers<[1], [0], [0], [1], [0, 0, 1, 1], [], []>} : vector<9x32xbf16>, vector<32x96xbf16>, vector<9x96xf32> -> vector<9x96xf32>
    %c0_13 = arith.constant 0 : index
    %c0_14 = arith.constant 0 : index
    %c0_15 = arith.constant 0 : index
    %13 = vector.load %arg8[%c0_13, %c0_14, %c0_15] : memref<1x1x96xf32, #tpu.memory_space<vmem>>, vector<1x1x96xf32>
    %14 = vector.shape_cast %13 : vector<1x1x96xf32> to vector<1x96xf32>
    %15 = vector.broadcast %14 : vector<1x96xf32> to vector<9x96xf32>
    %16 = arith.addf %12, %15 : vector<9x96xf32>
    %17 = vector.extract_strided_slice %16 {offsets = [0, 0], sizes = [9, 8], strides = [1, 1]} : vector<9x96xf32> to vector<9x8xf32>
    %18 = vector.extract_strided_slice %16 {offsets = [0, 32], sizes = [9, 8], strides = [1, 1]} : vector<9x96xf32> to vector<9x8xf32>
    %19 = vector.extract_strided_slice %16 {offsets = [0, 64], sizes = [9, 8], strides = [1, 1]} : vector<9x96xf32> to vector<9x8xf32>
    %20 = arith.truncf %17 : vector<9x8xf32> to vector<9x8xbf16>
    %21 = arith.truncf %18 : vector<9x8xf32> to vector<9x8xbf16>
    %cst_16 = arith.constant dense<0.000000e+00> : vector<9x9xf32>
    %22 = tpu.matmul %20, %21, %cst_16 {dimension_numbers = #tpu.dot_dimension_numbers<[1], [1], [0], [0], [0, 0, 1, 0], [], []>} : vector<9x8xbf16>, vector<9x8xbf16>, vector<9x9xf32> -> vector<9x9xf32>
    %cst_17 = arith.constant 0.353553385 : f32
    %23 = vector.broadcast %cst_17 : f32 to vector<9x9xf32>
    %24 = arith.mulf %22, %23 : vector<9x9xf32>
    %25 = arith.addf %24, %7 : vector<9x9xf32>
    %cst_18 = arith.constant dense<0xFF800000> : vector<9xf32>
    %26 = vector.multi_reduction <maximumf>, %25, %cst_18 [1] : vector<9x9xf32> to vector<9xf32>
    %27 = vector.shape_cast %26 : vector<9xf32> to vector<9x1xf32>
    %28 = vector.broadcast %27 : vector<9x1xf32> to vector<9x9xf32>
    %29 = arith.subf %25, %28 : vector<9x9xf32>
    %30 = math.exp %29 : vector<9x9xf32>
    %cst_19 = arith.constant dense<0.000000e+00> : vector<9xf32>
    %31 = vector.multi_reduction <add>, %30, %cst_19 [1] : vector<9x9xf32> to vector<9xf32>
    %32 = vector.shape_cast %31 : vector<9xf32> to vector<9x1xf32>
    %33 = tpu.reciprocal %32 {approx = true} : vector<9x1xf32> -> vector<9x1xf32>
    %34 = vector.broadcast %33 : vector<9x1xf32> to vector<9x9xf32>
    %35 = arith.mulf %30, %34 : vector<9x9xf32>
    %36 = arith.truncf %35 : vector<9x9xf32> to vector<9x9xbf16>
    %37 = arith.truncf %19 : vector<9x8xf32> to vector<9x8xbf16>
    %cst_20 = arith.constant dense<0.000000e+00> : vector<9x8xf32>
    %38 = tpu.matmul %36, %37, %cst_20 {dimension_numbers = #tpu.dot_dimension_numbers<[1], [0], [0], [1], [0, 0, 1, 1], [], []>} : vector<9x9xbf16>, vector<9x8xbf16>, vector<9x8xf32> -> vector<9x8xf32>
    %c0_21 = arith.constant 0 : index
    %c0_22 = arith.constant 0 : index
    %39 = vector.load %arg30[%c0_21, %c0_22] : memref<9x32xf32, #tpu.memory_space<vmem>>, vector<9x8xf32>
    tpu.vector_store %arg30[%c0_21, %c0_22], %38 {strides = array<i32>} : memref<9x32xf32, #tpu.memory_space<vmem>>, vector<9x8xf32>,
    %40 = vector.extract_strided_slice %16 {offsets = [0, 8], sizes = [9, 8], strides = [1, 1]} : vector<9x96xf32> to vector<9x8xf32>
    %41 = vector.extract_strided_slice %16 {offsets = [0, 40], sizes = [9, 8], strides = [1, 1]} : vector<9x96xf32> to vector<9x8xf32>
    %42 = vector.extract_strided_slice %16 {offsets = [0, 72], sizes = [9, 8], strides = [1, 1]} : vector<9x96xf32> to vector<9x8xf32>
    %43 = arith.truncf %40 : vector<9x8xf32> to vector<9x8xbf16>
    %44 = arith.truncf %41 : vector<9x8xf32> to vector<9x8xbf16>
    %cst_23 = arith.constant dense<0.000000e+00> : vector<9x9xf32>
    %45 = tpu.matmul %43, %44, %cst_23 {dimension_numbers = #tpu.dot_dimension_numbers<[1], [1], [0], [0], [0, 0, 1, 0], [], []>} : vector<9x8xbf16>, vector<9x8xbf16>, vector<9x9xf32> -> vector<9x9xf32>
    %cst_24 = arith.constant 0.353553385 : f32
    %46 = vector.broadcast %cst_24 : f32 to vector<9x9xf32>
    %47 = arith.mulf %45, %46 : vector<9x9xf32>
    %48 = arith.addf %47, %7 : vector<9x9xf32>
    %cst_25 = arith.constant dense<0xFF800000> : vector<9xf32>
    %49 = vector.multi_reduction <maximumf>, %48, %cst_25 [1] : vector<9x9xf32> to vector<9xf32>
    %50 = vector.shape_cast %49 : vector<9xf32> to vector<9x1xf32>
    %51 = vector.broadcast %50 : vector<9x1xf32> to vector<9x9xf32>
    %52 = arith.subf %48, %51 : vector<9x9xf32>
    %53 = math.exp %52 : vector<9x9xf32>
    %cst_26 = arith.constant dense<0.000000e+00> : vector<9xf32>
    %54 = vector.multi_reduction <add>, %53, %cst_26 [1] : vector<9x9xf32> to vector<9xf32>
    %55 = vector.shape_cast %54 : vector<9xf32> to vector<9x1xf32>
    %56 = tpu.reciprocal %55 {approx = true} : vector<9x1xf32> -> vector<9x1xf32>
    %57 = vector.broadcast %56 : vector<9x1xf32> to vector<9x9xf32>
    %58 = arith.mulf %53, %57 : vector<9x9xf32>
    %59 = arith.truncf %58 : vector<9x9xf32> to vector<9x9xbf16>
    %60 = arith.truncf %42 : vector<9x8xf32> to vector<9x8xbf16>
    %cst_27 = arith.constant dense<0.000000e+00> : vector<9x8xf32>
    %61 = tpu.matmul %59, %60, %cst_27 {dimension_numbers = #tpu.dot_dimension_numbers<[1], [0], [0], [1], [0, 0, 1, 1], [], []>} : vector<9x9xbf16>, vector<9x8xbf16>, vector<9x8xf32> -> vector<9x8xf32>
    %c0_28 = arith.constant 0 : index
    %c8 = arith.constant 8 : index
    %62 = vector.load %arg30[%c0_28, %c8] : memref<9x32xf32, #tpu.memory_space<vmem>>, vector<9x8xf32>
    tpu.vector_store %arg30[%c0_28, %c8], %61 {strides = array<i32>} : memref<9x32xf32, #tpu.memory_space<vmem>>, vector<9x8xf32>,
    %63 = vector.extract_strided_slice %16 {offsets = [0, 16], sizes = [9, 8], strides = [1, 1]} : vector<9x96xf32> to vector<9x8xf32>
    %64 = vector.extract_strided_slice %16 {offsets = [0, 48], sizes = [9, 8], strides = [1, 1]} : vector<9x96xf32> to vector<9x8xf32>
    %65 = vector.extract_strided_slice %16 {offsets = [0, 80], sizes = [9, 8], strides = [1, 1]} : vector<9x96xf32> to vector<9x8xf32>
    %66 = arith.truncf %63 : vector<9x8xf32> to vector<9x8xbf16>
    %67 = arith.truncf %64 : vector<9x8xf32> to vector<9x8xbf16>
    %cst_29 = arith.constant dense<0.000000e+00> : vector<9x9xf32>
    %68 = tpu.matmul %66, %67, %cst_29 {dimension_numbers = #tpu.dot_dimension_numbers<[1], [1], [0], [0], [0, 0, 1, 0], [], []>} : vector<9x8xbf16>, vector<9x8xbf16>, vector<9x9xf32> -> vector<9x9xf32>
    %cst_30 = arith.constant 0.353553385 : f32
    %69 = vector.broadcast %cst_30 : f32 to vector<9x9xf32>
    %70 = arith.mulf %68, %69 : vector<9x9xf32>
    %71 = arith.addf %70, %7 : vector<9x9xf32>
    %cst_31 = arith.constant dense<0xFF800000> : vector<9xf32>
    %72 = vector.multi_reduction <maximumf>, %71, %cst_31 [1] : vector<9x9xf32> to vector<9xf32>
    %73 = vector.shape_cast %72 : vector<9xf32> to vector<9x1xf32>
    %74 = vector.broadcast %73 : vector<9x1xf32> to vector<9x9xf32>
    %75 = arith.subf %71, %74 : vector<9x9xf32>
    %76 = math.exp %75 : vector<9x9xf32>
    %cst_32 = arith.constant dense<0.000000e+00> : vector<9xf32>
    %77 = vector.multi_reduction <add>, %76, %cst_32 [1] : vector<9x9xf32> to vector<9xf32>
    %78 = vector.shape_cast %77 : vector<9xf32> to vector<9x1xf32>
    %79 = tpu.reciprocal %78 {approx = true} : vector<9x1xf32> -> vector<9x1xf32>
    %80 = vector.broadcast %79 : vector<9x1xf32> to vector<9x9xf32>
    %81 = arith.mulf %76, %80 : vector<9x9xf32>
    %82 = arith.truncf %81 : vector<9x9xf32> to vector<9x9xbf16>
    %83 = arith.truncf %65 : vector<9x8xf32> to vector<9x8xbf16>
    %cst_33 = arith.constant dense<0.000000e+00> : vector<9x8xf32>
    %84 = tpu.matmul %82, %83, %cst_33 {dimension_numbers = #tpu.dot_dimension_numbers<[1], [0], [0], [1], [0, 0, 1, 1], [], []>} : vector<9x9xbf16>, vector<9x8xbf16>, vector<9x8xf32> -> vector<9x8xf32>
    %c0_34 = arith.constant 0 : index
    %c16 = arith.constant 16 : index
    %85 = vector.load %arg30[%c0_34, %c16] : memref<9x32xf32, #tpu.memory_space<vmem>>, vector<9x8xf32>
    tpu.vector_store %arg30[%c0_34, %c16], %84 {strides = array<i32>} : memref<9x32xf32, #tpu.memory_space<vmem>>, vector<9x8xf32>,
    %86 = vector.extract_strided_slice %16 {offsets = [0, 24], sizes = [9, 8], strides = [1, 1]} : vector<9x96xf32> to vector<9x8xf32>
    %87 = vector.extract_strided_slice %16 {offsets = [0, 56], sizes = [9, 8], strides = [1, 1]} : vector<9x96xf32> to vector<9x8xf32>
    %88 = vector.extract_strided_slice %16 {offsets = [0, 88], sizes = [9, 8], strides = [1, 1]} : vector<9x96xf32> to vector<9x8xf32>
    %89 = arith.truncf %86 : vector<9x8xf32> to vector<9x8xbf16>
    %90 = arith.truncf %87 : vector<9x8xf32> to vector<9x8xbf16>
    %cst_35 = arith.constant dense<0.000000e+00> : vector<9x9xf32>
    %91 = tpu.matmul %89, %90, %cst_35 {dimension_numbers = #tpu.dot_dimension_numbers<[1], [1], [0], [0], [0, 0, 1, 0], [], []>} : vector<9x8xbf16>, vector<9x8xbf16>, vector<9x9xf32> -> vector<9x9xf32>
    %cst_36 = arith.constant 0.353553385 : f32
    %92 = vector.broadcast %cst_36 : f32 to vector<9x9xf32>
    %93 = arith.mulf %91, %92 : vector<9x9xf32>
    %94 = arith.addf %93, %7 : vector<9x9xf32>
    %cst_37 = arith.constant dense<0xFF800000> : vector<9xf32>
    %95 = vector.multi_reduction <maximumf>, %94, %cst_37 [1] : vector<9x9xf32> to vector<9xf32>
    %96 = vector.shape_cast %95 : vector<9xf32> to vector<9x1xf32>
    %97 = vector.broadcast %96 : vector<9x1xf32> to vector<9x9xf32>
    %98 = arith.subf %94, %97 : vector<9x9xf32>
    %99 = math.exp %98 : vector<9x9xf32>
    %cst_38 = arith.constant dense<0.000000e+00> : vector<9xf32>
    %100 = vector.multi_reduction <add>, %99, %cst_38 [1] : vector<9x9xf32> to vector<9xf32>
    %101 = vector.shape_cast %100 : vector<9xf32> to vector<9x1xf32>
    %102 = tpu.reciprocal %101 {approx = true} : vector<9x1xf32> -> vector<9x1xf32>
    %103 = vector.broadcast %102 : vector<9x1xf32> to vector<9x9xf32>
    %104 = arith.mulf %99, %103 : vector<9x9xf32>
    %105 = arith.truncf %104 : vector<9x9xf32> to vector<9x9xbf16>
    %106 = arith.truncf %88 : vector<9x8xf32> to vector<9x8xbf16>
    %cst_39 = arith.constant dense<0.000000e+00> : vector<9x8xf32>
    %107 = tpu.matmul %105, %106, %cst_39 {dimension_numbers = #tpu.dot_dimension_numbers<[1], [0], [0], [1], [0, 0, 1, 1], [], []>} : vector<9x9xbf16>, vector<9x8xbf16>, vector<9x8xf32> -> vector<9x8xf32>
    %c0_40 = arith.constant 0 : index
    %c24 = arith.constant 24 : index
    %108 = vector.load %arg30[%c0_40, %c24] : memref<9x32xf32, #tpu.memory_space<vmem>>, vector<9x8xf32>
    tpu.vector_store %arg30[%c0_40, %c24], %107 {strides = array<i32>} : memref<9x32xf32, #tpu.memory_space<vmem>>, vector<9x8xf32>,
    %c0_41 = arith.constant 0 : index
    %c0_42 = arith.constant 0 : index
    %109 = vector.load %arg30[%c0_41, %c0_42] : memref<9x32xf32, #tpu.memory_space<vmem>>, vector<9x32xf32>
    %110 = arith.truncf %109 : vector<9x32xf32> to vector<9x32xbf16>
    %c0_43 = arith.constant 0 : index
    %c0_44 = arith.constant 0 : index
    %c0_45 = arith.constant 0 : index
    %111 = vector.load %arg9[%c0_43, %c0_44, %c0_45] : memref<1x32x32xbf16, #tpu.memory_space<vmem>>, vector<1x32x32xbf16>
    %112 = vector.shape_cast %111 : vector<1x32x32xbf16> to vector<32x32xbf16>
    %cst_46 = arith.constant dense<0.000000e+00> : vector<9x32xf32>
    %113 = tpu.matmul %110, %112, %cst_46 {dimension_numbers = #tpu.dot_dimension_numbers<[1], [0], [0], [1], [0, 0, 1, 1], [], []>} : vector<9x32xbf16>, vector<32x32xbf16>, vector<9x32xf32> -> vector<9x32xf32>
    %c0_47 = arith.constant 0 : index
    %c0_48 = arith.constant 0 : index
    %c0_49 = arith.constant 0 : index
    %114 = vector.load %arg10[%c0_47, %c0_48, %c0_49] : memref<1x1x32xf32, #tpu.memory_space<vmem>>, vector<1x1x32xf32>
    %115 = vector.shape_cast %114 : vector<1x1x32xf32> to vector<1x32xf32>
    %116 = vector.broadcast %115 : vector<1x32xf32> to vector<9x32xf32>
    %117 = arith.addf %113, %116 : vector<9x32xf32>
    %118 = arith.addf %117, %4 : vector<9x32xf32>
    %c0_50 = arith.constant 0 : index
    %c0_51 = arith.constant 0 : index
    %c0_52 = arith.constant 0 : index
    %119 = vector.load %arg11[%c0_50, %c0_51, %c0_52] : memref<1x1x32xf32, #tpu.memory_space<vmem>>, vector<1x1x32xf32>
    %120 = vector.shape_cast %119 : vector<1x1x32xf32> to vector<1x32xf32>
    %c0_53 = arith.constant 0 : index
    %c0_54 = arith.constant 0 : index
    %c0_55 = arith.constant 0 : index
    %121 = vector.load %arg12[%c0_53, %c0_54, %c0_55] : memref<1x1x32xf32, #tpu.memory_space<vmem>>, vector<1x1x32xf32>
    %122 = vector.shape_cast %121 : vector<1x1x32xf32> to vector<1x32xf32>
    %cst_56 = arith.constant dense<0.000000e+00> : vector<9xf32>
    %123 = vector.multi_reduction <add>, %118, %cst_56 [1] : vector<9x32xf32> to vector<9xf32>
    %124 = vector.shape_cast %123 : vector<9xf32> to vector<9x1xf32>
    %cst_57 = arith.constant 3.200000e+01 : f32
    %125 = vector.broadcast %cst_57 : f32 to vector<9x1xf32>
    %126 = arith.divf %124, %125 : vector<9x1xf32>
    %127 = vector.broadcast %126 : vector<9x1xf32> to vector<9x32xf32>
    %128 = arith.subf %118, %127 : vector<9x32xf32>
    %129 = arith.mulf %128, %128 : vector<9x32xf32>
    %cst_58 = arith.constant dense<0.000000e+00> : vector<9xf32>
    %130 = vector.multi_reduction <add>, %129, %cst_58 [1] : vector<9x32xf32> to vector<9xf32>
    %131 = vector.shape_cast %130 : vector<9xf32> to vector<9x1xf32>
    %cst_59 = arith.constant 3.200000e+01 : f32
    %132 = vector.broadcast %cst_59 : f32 to vector<9x1xf32>
    %133 = arith.divf %131, %132 : vector<9x1xf32>
    %134 = vector.broadcast %126 : vector<9x1xf32> to vector<9x32xf32>
    %135 = arith.subf %118, %134 : vector<9x32xf32>
    %cst_60 = arith.constant 9.99999974E-6 : f32
    %136 = vector.broadcast %cst_60 : f32 to vector<9x1xf32>
    %137 = arith.addf %133, %136 : vector<9x1xf32>
    %138 = math.rsqrt %137 : vector<9x1xf32>
    %139 = vector.broadcast %138 : vector<9x1xf32> to vector<9x32xf32>
    %140 = arith.mulf %135, %139 : vector<9x32xf32>
    %141 = vector.broadcast %120 : vector<1x32xf32> to vector<9x32xf32>
    %142 = arith.mulf %140, %141 : vector<9x32xf32>
    %143 = vector.broadcast %122 : vector<1x32xf32> to vector<9x32xf32>
    %144 = arith.addf %142, %143 : vector<9x32xf32>
    %145 = vector.broadcast %6 : vector<9x1xf32> to vector<9x32xf32>
    %146 = arith.mulf %144, %145 : vector<9x32xf32>
    %c0_61 = arith.constant 0 : index
    %c0_62 = arith.constant 0 : index
    %c0_63 = arith.constant 0 : index
    %147 = vector.load %arg3[%c0_61, %c0_62, %c0_63] : memref<1x8x32xbf16, #tpu.memory_space<vmem>>, vector<1x8x32xbf16>
    %148 = vector.shape_cast %147 : vector<1x8x32xbf16> to vector<8x32xbf16>
    %149 = arith.truncf %146 : vector<9x32xf32> to vector<9x32xbf16>
    %c0_64 = arith.constant 0 : index
    %c0_65 = arith.constant 0 : index
    %c0_66 = arith.constant 0 : index
    %150 = vector.load %arg13[%c0_64, %c0_65, %c0_66] : memref<1x32x32xbf16, #tpu.memory_space<vmem>>, vector<1x32x32xbf16>
    %151 = vector.shape_cast %150 : vector<1x32x32xbf16> to vector<32x32xbf16>
    %cst_67 = arith.constant dense<0.000000e+00> : vector<9x32xf32>
    %152 = tpu.matmul %149, %151, %cst_67 {dimension_numbers = #tpu.dot_dimension_numbers<[1], [0], [0], [1], [0, 0, 1, 1], [], []>} : vector<9x32xbf16>, vector<32x32xbf16>, vector<9x32xf32> -> vector<9x32xf32>
    %c0_68 = arith.constant 0 : index
    %c0_69 = arith.constant 0 : index
    %c0_70 = arith.constant 0 : index
    %153 = vector.load %arg14[%c0_68, %c0_69, %c0_70] : memref<1x1x32xf32, #tpu.memory_space<vmem>>, vector<1x1x32xf32>
    %154 = vector.shape_cast %153 : vector<1x1x32xf32> to vector<1x32xf32>
    %155 = vector.broadcast %154 : vector<1x32xf32> to vector<9x32xf32>
    %156 = arith.addf %152, %155 : vector<9x32xf32>
    %c0_71 = arith.constant 0 : index
    %c0_72 = arith.constant 0 : index
    %c0_73 = arith.constant 0 : index
    %157 = vector.load %arg15[%c0_71, %c0_72, %c0_73] : memref<1x32x64xbf16, #tpu.memory_space<vmem>>, vector<1x32x64xbf16>
    %158 = vector.shape_cast %157 : vector<1x32x64xbf16> to vector<32x64xbf16>
    %cst_74 = arith.constant dense<0.000000e+00> : vector<8x64xf32>
    %159 = tpu.matmul %148, %158, %cst_74 {dimension_numbers = #tpu.dot_dimension_numbers<[1], [0], [0], [1], [0, 0, 1, 1], [], []>} : vector<8x32xbf16>, vector<32x64xbf16>, vector<8x64xf32> -> vector<8x64xf32>
    %c0_75 = arith.constant 0 : index
    %c0_76 = arith.constant 0 : index
    %c0_77 = arith.constant 0 : index
    %160 = vector.load %arg16[%c0_75, %c0_76, %c0_77] : memref<1x1x64xf32, #tpu.memory_space<vmem>>, vector<1x1x64xf32>
    %161 = vector.shape_cast %160 : vector<1x1x64xf32> to vector<1x64xf32>
    %162 = vector.broadcast %161 : vector<1x64xf32> to vector<8x64xf32>
    %163 = arith.addf %159, %162 : vector<8x64xf32>
    %164 = vector.extract_strided_slice %156 {offsets = [0, 0], sizes = [9, 8], strides = [1, 1]} : vector<9x32xf32> to vector<9x8xf32>
    %165 = vector.extract_strided_slice %163 {offsets = [0, 0], sizes = [8, 8], strides = [1, 1]} : vector<8x64xf32> to vector<8x8xf32>
    %166 = vector.extract_strided_slice %163 {offsets = [0, 32], sizes = [8, 8], strides = [1, 1]} : vector<8x64xf32> to vector<8x8xf32>
    %167 = arith.truncf %164 : vector<9x8xf32> to vector<9x8xbf16>
    %168 = arith.truncf %165 : vector<8x8xf32> to vector<8x8xbf16>
    %cst_78 = arith.constant dense<0.000000e+00> : vector<9x8xf32>
    %169 = tpu.matmul %167, %168, %cst_78 {dimension_numbers = #tpu.dot_dimension_numbers<[1], [1], [0], [0], [0, 0, 1, 0], [], []>} : vector<9x8xbf16>, vector<8x8xbf16>, vector<9x8xf32> -> vector<9x8xf32>
    %cst_79 = arith.constant 0.353553385 : f32
    %170 = vector.broadcast %cst_79 : f32 to vector<9x8xf32>
    %171 = arith.mulf %169, %170 : vector<9x8xf32>
    %172 = arith.addf %171, %8 : vector<9x8xf32>
    %cst_80 = arith.constant dense<0xFF800000> : vector<9xf32>
    %173 = vector.multi_reduction <maximumf>, %172, %cst_80 [1] : vector<9x8xf32> to vector<9xf32>
    %174 = vector.shape_cast %173 : vector<9xf32> to vector<9x1xf32>
    %175 = vector.broadcast %174 : vector<9x1xf32> to vector<9x8xf32>
    %176 = arith.subf %172, %175 : vector<9x8xf32>
    %177 = math.exp %176 : vector<9x8xf32>
    %cst_81 = arith.constant dense<0.000000e+00> : vector<9xf32>
    %178 = vector.multi_reduction <add>, %177, %cst_81 [1] : vector<9x8xf32> to vector<9xf32>
    %179 = vector.shape_cast %178 : vector<9xf32> to vector<9x1xf32>
    %180 = tpu.reciprocal %179 {approx = true} : vector<9x1xf32> -> vector<9x1xf32>
    %181 = vector.broadcast %180 : vector<9x1xf32> to vector<9x8xf32>
    %182 = arith.mulf %177, %181 : vector<9x8xf32>
    %183 = arith.truncf %182 : vector<9x8xf32> to vector<9x8xbf16>
    %184 = arith.truncf %166 : vector<8x8xf32> to vector<8x8xbf16>
    %cst_82 = arith.constant dense<0.000000e+00> : vector<9x8xf32>
    %185 = tpu.matmul %183, %184, %cst_82 {dimension_numbers = #tpu.dot_dimension_numbers<[1], [0], [0], [1], [0, 0, 1, 1], [], []>} : vector<9x8xbf16>, vector<8x8xbf16>, vector<9x8xf32> -> vector<9x8xf32>
    %c0_83 = arith.constant 0 : index
    %c0_84 = arith.constant 0 : index
    %186 = vector.load %arg30[%c0_83, %c0_84] : memref<9x32xf32, #tpu.memory_space<vmem>>, vector<9x8xf32>
    tpu.vector_store %arg30[%c0_83, %c0_84], %185 {strides = array<i32>} : memref<9x32xf32, #tpu.memory_space<vmem>>, vector<9x8xf32>,
    %187 = vector.extract_strided_slice %156 {offsets = [0, 8], sizes = [9, 8], strides = [1, 1]} : vector<9x32xf32> to vector<9x8xf32>
    %188 = vector.extract_strided_slice %163 {offsets = [0, 8], sizes = [8, 8], strides = [1, 1]} : vector<8x64xf32> to vector<8x8xf32>
    %189 = vector.extract_strided_slice %163 {offsets = [0, 40], sizes = [8, 8], strides = [1, 1]} : vector<8x64xf32> to vector<8x8xf32>
    %190 = arith.truncf %187 : vector<9x8xf32> to vector<9x8xbf16>
    %191 = arith.truncf %188 : vector<8x8xf32> to vector<8x8xbf16>
    %cst_85 = arith.constant dense<0.000000e+00> : vector<9x8xf32>
    %192 = tpu.matmul %190, %191, %cst_85 {dimension_numbers = #tpu.dot_dimension_numbers<[1], [1], [0], [0], [0, 0, 1, 0], [], []>} : vector<9x8xbf16>, vector<8x8xbf16>, vector<9x8xf32> -> vector<9x8xf32>
    %cst_86 = arith.constant 0.353553385 : f32
    %193 = vector.broadcast %cst_86 : f32 to vector<9x8xf32>
    %194 = arith.mulf %192, %193 : vector<9x8xf32>
    %195 = arith.addf %194, %8 : vector<9x8xf32>
    %cst_87 = arith.constant dense<0xFF800000> : vector<9xf32>
    %196 = vector.multi_reduction <maximumf>, %195, %cst_87 [1] : vector<9x8xf32> to vector<9xf32>
    %197 = vector.shape_cast %196 : vector<9xf32> to vector<9x1xf32>
    %198 = vector.broadcast %197 : vector<9x1xf32> to vector<9x8xf32>
    %199 = arith.subf %195, %198 : vector<9x8xf32>
    %200 = math.exp %199 : vector<9x8xf32>
    %cst_88 = arith.constant dense<0.000000e+00> : vector<9xf32>
    %201 = vector.multi_reduction <add>, %200, %cst_88 [1] : vector<9x8xf32> to vector<9xf32>
    %202 = vector.shape_cast %201 : vector<9xf32> to vector<9x1xf32>
    %203 = tpu.reciprocal %202 {approx = true} : vector<9x1xf32> -> vector<9x1xf32>
    %204 = vector.broadcast %203 : vector<9x1xf32> to vector<9x8xf32>
    %205 = arith.mulf %200, %204 : vector<9x8xf32>
    %206 = arith.truncf %205 : vector<9x8xf32> to vector<9x8xbf16>
    %207 = arith.truncf %189 : vector<8x8xf32> to vector<8x8xbf16>
    %cst_89 = arith.constant dense<0.000000e+00> : vector<9x8xf32>
    %208 = tpu.matmul %206, %207, %cst_89 {dimension_numbers = #tpu.dot_dimension_numbers<[1], [0], [0], [1], [0, 0, 1, 1], [], []>} : vector<9x8xbf16>, vector<8x8xbf16>, vector<9x8xf32> -> vector<9x8xf32>
    %c0_90 = arith.constant 0 : index
    %c8_91 = arith.constant 8 : index
    %209 = vector.load %arg30[%c0_90, %c8_91] : memref<9x32xf32, #tpu.memory_space<vmem>>, vector<9x8xf32>
    tpu.vector_store %arg30[%c0_90, %c8_91], %208 {strides = array<i32>} : memref<9x32xf32, #tpu.memory_space<vmem>>, vector<9x8xf32>,
    %210 = vector.extract_strided_slice %156 {offsets = [0, 16], sizes = [9, 8], strides = [1, 1]} : vector<9x32xf32> to vector<9x8xf32>
    %211 = vector.extract_strided_slice %163 {offsets = [0, 16], sizes = [8, 8], strides = [1, 1]} : vector<8x64xf32> to vector<8x8xf32>
    %212 = vector.extract_strided_slice %163 {offsets = [0, 48], sizes = [8, 8], strides = [1, 1]} : vector<8x64xf32> to vector<8x8xf32>
    %213 = arith.truncf %210 : vector<9x8xf32> to vector<9x8xbf16>
    %214 = arith.truncf %211 : vector<8x8xf32> to vector<8x8xbf16>
    %cst_92 = arith.constant dense<0.000000e+00> : vector<9x8xf32>
    %215 = tpu.matmul %213, %214, %cst_92 {dimension_numbers = #tpu.dot_dimension_numbers<[1], [1], [0], [0], [0, 0, 1, 0], [], []>} : vector<9x8xbf16>, vector<8x8xbf16>, vector<9x8xf32> -> vector<9x8xf32>
    %cst_93 = arith.constant 0.353553385 : f32
    %216 = vector.broadcast %cst_93 : f32 to vector<9x8xf32>
    %217 = arith.mulf %215, %216 : vector<9x8xf32>
    %218 = arith.addf %217, %8 : vector<9x8xf32>
    %cst_94 = arith.constant dense<0xFF800000> : vector<9xf32>
    %219 = vector.multi_reduction <maximumf>, %218, %cst_94 [1] : vector<9x8xf32> to vector<9xf32>
    %220 = vector.shape_cast %219 : vector<9xf32> to vector<9x1xf32>
    %221 = vector.broadcast %220 : vector<9x1xf32> to vector<9x8xf32>
    %222 = arith.subf %218, %221 : vector<9x8xf32>
    %223 = math.exp %222 : vector<9x8xf32>
    %cst_95 = arith.constant dense<0.000000e+00> : vector<9xf32>
    %224 = vector.multi_reduction <add>, %223, %cst_95 [1] : vector<9x8xf32> to vector<9xf32>
    %225 = vector.shape_cast %224 : vector<9xf32> to vector<9x1xf32>
    %226 = tpu.reciprocal %225 {approx = true} : vector<9x1xf32> -> vector<9x1xf32>
    %227 = vector.broadcast %226 : vector<9x1xf32> to vector<9x8xf32>
    %228 = arith.mulf %223, %227 : vector<9x8xf32>
    %229 = arith.truncf %228 : vector<9x8xf32> to vector<9x8xbf16>
    %230 = arith.truncf %212 : vector<8x8xf32> to vector<8x8xbf16>
    %cst_96 = arith.constant dense<0.000000e+00> : vector<9x8xf32>
    %231 = tpu.matmul %229, %230, %cst_96 {dimension_numbers = #tpu.dot_dimension_numbers<[1], [0], [0], [1], [0, 0, 1, 1], [], []>} : vector<9x8xbf16>, vector<8x8xbf16>, vector<9x8xf32> -> vector<9x8xf32>
    %c0_97 = arith.constant 0 : index
    %c16_98 = arith.constant 16 : index
    %232 = vector.load %arg30[%c0_97, %c16_98] : memref<9x32xf32, #tpu.memory_space<vmem>>, vector<9x8xf32>
    tpu.vector_store %arg30[%c0_97, %c16_98], %231 {strides = array<i32>} : memref<9x32xf32, #tpu.memory_space<vmem>>, vector<9x8xf32>,
    %233 = vector.extract_strided_slice %156 {offsets = [0, 24], sizes = [9, 8], strides = [1, 1]} : vector<9x32xf32> to vector<9x8xf32>
    %234 = vector.extract_strided_slice %163 {offsets = [0, 24], sizes = [8, 8], strides = [1, 1]} : vector<8x64xf32> to vector<8x8xf32>
    %235 = vector.extract_strided_slice %163 {offsets = [0, 56], sizes = [8, 8], strides = [1, 1]} : vector<8x64xf32> to vector<8x8xf32>
    %236 = arith.truncf %233 : vector<9x8xf32> to vector<9x8xbf16>
    %237 = arith.truncf %234 : vector<8x8xf32> to vector<8x8xbf16>
    %cst_99 = arith.constant dense<0.000000e+00> : vector<9x8xf32>
    %238 = tpu.matmul %236, %237, %cst_99 {dimension_numbers = #tpu.dot_dimension_numbers<[1], [1], [0], [0], [0, 0, 1, 0], [], []>} : vector<9x8xbf16>, vector<8x8xbf16>, vector<9x8xf32> -> vector<9x8xf32>
    %cst_100 = arith.constant 0.353553385 : f32
    %239 = vector.broadcast %cst_100 : f32 to vector<9x8xf32>
    %240 = arith.mulf %238, %239 : vector<9x8xf32>
    %241 = arith.addf %240, %8 : vector<9x8xf32>
    %cst_101 = arith.constant dense<0xFF800000> : vector<9xf32>
    %242 = vector.multi_reduction <maximumf>, %241, %cst_101 [1] : vector<9x8xf32> to vector<9xf32>
    %243 = vector.shape_cast %242 : vector<9xf32> to vector<9x1xf32>
    %244 = vector.broadcast %243 : vector<9x1xf32> to vector<9x8xf32>
    %245 = arith.subf %241, %244 : vector<9x8xf32>
    %246 = math.exp %245 : vector<9x8xf32>
    %cst_102 = arith.constant dense<0.000000e+00> : vector<9xf32>
    %247 = vector.multi_reduction <add>, %246, %cst_102 [1] : vector<9x8xf32> to vector<9xf32>
    %248 = vector.shape_cast %247 : vector<9xf32> to vector<9x1xf32>
    %249 = tpu.reciprocal %248 {approx = true} : vector<9x1xf32> -> vector<9x1xf32>
    %250 = vector.broadcast %249 : vector<9x1xf32> to vector<9x8xf32>
    %251 = arith.mulf %246, %250 : vector<9x8xf32>
    %252 = arith.truncf %251 : vector<9x8xf32> to vector<9x8xbf16>
    %253 = arith.truncf %235 : vector<8x8xf32> to vector<8x8xbf16>
    %cst_103 = arith.constant dense<0.000000e+00> : vector<9x8xf32>
    %254 = tpu.matmul %252, %253, %cst_103 {dimension_numbers = #tpu.dot_dimension_numbers<[1], [0], [0], [1], [0, 0, 1, 1], [], []>} : vector<9x8xbf16>, vector<8x8xbf16>, vector<9x8xf32> -> vector<9x8xf32>
    %c0_104 = arith.constant 0 : index
    %c24_105 = arith.constant 24 : index
    %255 = vector.load %arg30[%c0_104, %c24_105] : memref<9x32xf32, #tpu.memory_space<vmem>>, vector<9x8xf32>
    tpu.vector_store %arg30[%c0_104, %c24_105], %254 {strides = array<i32>} : memref<9x32xf32, #tpu.memory_space<vmem>>, vector<9x8xf32>,
    %c0_106 = arith.constant 0 : index
    %c0_107 = arith.constant 0 : index
    %256 = vector.load %arg30[%c0_106, %c0_107] : memref<9x32xf32, #tpu.memory_space<vmem>>, vector<9x32xf32>
    %257 = arith.truncf %256 : vector<9x32xf32> to vector<9x32xbf16>
    %c0_108 = arith.constant 0 : index
    %c0_109 = arith.constant 0 : index
    %c0_110 = arith.constant 0 : index
    %258 = vector.load %arg17[%c0_108, %c0_109, %c0_110] : memref<1x32x32xbf16, #tpu.memory_space<vmem>>, vector<1x32x32xbf16>
    %259 = vector.shape_cast %258 : vector<1x32x32xbf16> to vector<32x32xbf16>
    %cst_111 = arith.constant dense<0.000000e+00> : vector<9x32xf32>
    %260 = tpu.matmul %257, %259, %cst_111 {dimension_numbers = #tpu.dot_dimension_numbers<[1], [0], [0], [1], [0, 0, 1, 1], [], []>} : vector<9x32xbf16>, vector<32x32xbf16>, vector<9x32xf32> -> vector<9x32xf32>
    %c0_112 = arith.constant 0 : index
    %c0_113 = arith.constant 0 : index
    %c0_114 = arith.constant 0 : index
    %261 = vector.load %arg18[%c0_112, %c0_113, %c0_114] : memref<1x1x32xf32, #tpu.memory_space<vmem>>, vector<1x1x32xf32>
    %262 = vector.shape_cast %261 : vector<1x1x32xf32> to vector<1x32xf32>
    %263 = vector.broadcast %262 : vector<1x32xf32> to vector<9x32xf32>
    %264 = arith.addf %260, %263 : vector<9x32xf32>
    %265 = arith.addf %264, %146 : vector<9x32xf32>
    %c0_115 = arith.constant 0 : index
    %c0_116 = arith.constant 0 : index
    %c0_117 = arith.constant 0 : index
    %266 = vector.load %arg19[%c0_115, %c0_116, %c0_117] : memref<1x1x32xf32, #tpu.memory_space<vmem>>, vector<1x1x32xf32>
    %267 = vector.shape_cast %266 : vector<1x1x32xf32> to vector<1x32xf32>
    %c0_118 = arith.constant 0 : index
    %c0_119 = arith.constant 0 : index
    %c0_120 = arith.constant 0 : index
    %268 = vector.load %arg20[%c0_118, %c0_119, %c0_120] : memref<1x1x32xf32, #tpu.memory_space<vmem>>, vector<1x1x32xf32>
    %269 = vector.shape_cast %268 : vector<1x1x32xf32> to vector<1x32xf32>
    %cst_121 = arith.constant dense<0.000000e+00> : vector<9xf32>
    %270 = vector.multi_reduction <add>, %265, %cst_121 [1] : vector<9x32xf32> to vector<9xf32>
    %271 = vector.shape_cast %270 : vector<9xf32> to vector<9x1xf32>
    %cst_122 = arith.constant 3.200000e+01 : f32
    %272 = vector.broadcast %cst_122 : f32 to vector<9x1xf32>
    %273 = arith.divf %271, %272 : vector<9x1xf32>
    %274 = vector.broadcast %273 : vector<9x1xf32> to vector<9x32xf32>
    %275 = arith.subf %265, %274 : vector<9x32xf32>
    %276 = arith.mulf %275, %275 : vector<9x32xf32>
    %cst_123 = arith.constant dense<0.000000e+00> : vector<9xf32>
    %277 = vector.multi_reduction <add>, %276, %cst_123 [1] : vector<9x32xf32> to vector<9xf32>
    %278 = vector.shape_cast %277 : vector<9xf32> to vector<9x1xf32>
    %cst_124 = arith.constant 3.200000e+01 : f32
    %279 = vector.broadcast %cst_124 : f32 to vector<9x1xf32>
    %280 = arith.divf %278, %279 : vector<9x1xf32>
    %281 = vector.broadcast %273 : vector<9x1xf32> to vector<9x32xf32>
    %282 = arith.subf %265, %281 : vector<9x32xf32>
    %cst_125 = arith.constant 9.99999974E-6 : f32
    %283 = vector.broadcast %cst_125 : f32 to vector<9x1xf32>
    %284 = arith.addf %280, %283 : vector<9x1xf32>
    %285 = math.rsqrt %284 : vector<9x1xf32>
    %286 = vector.broadcast %285 : vector<9x1xf32> to vector<9x32xf32>
    %287 = arith.mulf %282, %286 : vector<9x32xf32>
    %288 = vector.broadcast %267 : vector<1x32xf32> to vector<9x32xf32>
    %289 = arith.mulf %287, %288 : vector<9x32xf32>
    %290 = vector.broadcast %269 : vector<1x32xf32> to vector<9x32xf32>
    %291 = arith.addf %289, %290 : vector<9x32xf32>
    %292 = vector.broadcast %6 : vector<9x1xf32> to vector<9x32xf32>
    %293 = arith.mulf %291, %292 : vector<9x32xf32>
    %294 = arith.truncf %293 : vector<9x32xf32> to vector<9x32xbf16>
    %c0_126 = arith.constant 0 : index
    %c0_127 = arith.constant 0 : index
    %c0_128 = arith.constant 0 : index
    %295 = vector.load %arg21[%c0_126, %c0_127, %c0_128] : memref<1x32x64xbf16, #tpu.memory_space<vmem>>, vector<1x32x64xbf16>
    %296 = vector.shape_cast %295 : vector<1x32x64xbf16> to vector<32x64xbf16>
    %cst_129 = arith.constant dense<0.000000e+00> : vector<9x64xf32>
    %297 = tpu.matmul %294, %296, %cst_129 {dimension_numbers = #tpu.dot_dimension_numbers<[1], [0], [0], [1], [0, 0, 1, 1], [], []>} : vector<9x32xbf16>, vector<32x64xbf16>, vector<9x64xf32> -> vector<9x64xf32>
    %c0_130 = arith.constant 0 : index
    %c0_131 = arith.constant 0 : index
    %c0_132 = arith.constant 0 : index
    %298 = vector.load %arg22[%c0_130, %c0_131, %c0_132] : memref<1x1x64xf32, #tpu.memory_space<vmem>>, vector<1x1x64xf32>
    %299 = vector.shape_cast %298 : vector<1x1x64xf32> to vector<1x64xf32>
    %300 = vector.broadcast %299 : vector<1x64xf32> to vector<9x64xf32>
    %301 = arith.addf %297, %300 : vector<9x64xf32>
    %cst_133 = arith.constant 0.000000e+00 : f32
    %302 = vector.broadcast %cst_133 : f32 to vector<9x64xf32>
    %303 = arith.maximumf %301, %302 : vector<9x64xf32>
    %304 = arith.truncf %303 : vector<9x64xf32> to vector<9x64xbf16>
    %c0_134 = arith.constant 0 : index
    %c0_135 = arith.constant 0 : index
    %c0_136 = arith.constant 0 : index
    %305 = vector.load %arg23[%c0_134, %c0_135, %c0_136] : memref<1x64x32xbf16, #tpu.memory_space<vmem>>, vector<1x64x32xbf16>
    %306 = vector.shape_cast %305 : vector<1x64x32xbf16> to vector<64x32xbf16>
    %cst_137 = arith.constant dense<0.000000e+00> : vector<9x32xf32>
    %307 = tpu.matmul %304, %306, %cst_137 {dimension_numbers = #tpu.dot_dimension_numbers<[1], [0], [0], [1], [0, 0, 1, 1], [], []>} : vector<9x64xbf16>, vector<64x32xbf16>, vector<9x32xf32> -> vector<9x32xf32>
    %c0_138 = arith.constant 0 : index
    %c0_139 = arith.constant 0 : index
    %c0_140 = arith.constant 0 : index
    %308 = vector.load %arg24[%c0_138, %c0_139, %c0_140] : memref<1x1x32xf32, #tpu.memory_space<vmem>>, vector<1x1x32xf32>
    %309 = vector.shape_cast %308 : vector<1x1x32xf32> to vector<1x32xf32>
    %310 = vector.broadcast %309 : vector<1x32xf32> to vector<9x32xf32>
    %311 = arith.addf %307, %310 : vector<9x32xf32>
    %312 = arith.addf %311, %293 : vector<9x32xf32>
    %c0_141 = arith.constant 0 : index
    %c0_142 = arith.constant 0 : index
    %c0_143 = arith.constant 0 : index
    %313 = vector.load %arg25[%c0_141, %c0_142, %c0_143] : memref<1x1x32xf32, #tpu.memory_space<vmem>>, vector<1x1x32xf32>
    %314 = vector.shape_cast %313 : vector<1x1x32xf32> to vector<1x32xf32>
    %c0_144 = arith.constant 0 : index
    %c0_145 = arith.constant 0 : index
    %c0_146 = arith.constant 0 : index
    %315 = vector.load %arg26[%c0_144, %c0_145, %c0_146] : memref<1x1x32xf32, #tpu.memory_space<vmem>>, vector<1x1x32xf32>
    %316 = vector.shape_cast %315 : vector<1x1x32xf32> to vector<1x32xf32>
    %cst_147 = arith.constant dense<0.000000e+00> : vector<9xf32>
    %317 = vector.multi_reduction <add>, %312, %cst_147 [1] : vector<9x32xf32> to vector<9xf32>
    %318 = vector.shape_cast %317 : vector<9xf32> to vector<9x1xf32>
    %cst_148 = arith.constant 3.200000e+01 : f32
    %319 = vector.broadcast %cst_148 : f32 to vector<9x1xf32>
    %320 = arith.divf %318, %319 : vector<9x1xf32>
    %321 = vector.broadcast %320 : vector<9x1xf32> to vector<9x32xf32>
    %322 = arith.subf %312, %321 : vector<9x32xf32>
    %323 = arith.mulf %322, %322 : vector<9x32xf32>
    %cst_149 = arith.constant dense<0.000000e+00> : vector<9xf32>
    %324 = vector.multi_reduction <add>, %323, %cst_149 [1] : vector<9x32xf32> to vector<9xf32>
    %325 = vector.shape_cast %324 : vector<9xf32> to vector<9x1xf32>
    %cst_150 = arith.constant 3.200000e+01 : f32
    %326 = vector.broadcast %cst_150 : f32 to vector<9x1xf32>
    %327 = arith.divf %325, %326 : vector<9x1xf32>
    %328 = vector.broadcast %320 : vector<9x1xf32> to vector<9x32xf32>
    %329 = arith.subf %312, %328 : vector<9x32xf32>
    %cst_151 = arith.constant 9.99999974E-6 : f32
    %330 = vector.broadcast %cst_151 : f32 to vector<9x1xf32>
    %331 = arith.addf %327, %330 : vector<9x1xf32>
    %332 = math.rsqrt %331 : vector<9x1xf32>
    %333 = vector.broadcast %332 : vector<9x1xf32> to vector<9x32xf32>
    %334 = arith.mulf %329, %333 : vector<9x32xf32>
    %335 = vector.broadcast %314 : vector<1x32xf32> to vector<9x32xf32>
    %336 = arith.mulf %334, %335 : vector<9x32xf32>
    %337 = vector.broadcast %316 : vector<1x32xf32> to vector<9x32xf32>
    %338 = arith.addf %336, %337 : vector<9x32xf32>
    %339 = vector.broadcast %6 : vector<9x1xf32> to vector<9x32xf32>
    %340 = arith.mulf %338, %339 : vector<9x32xf32>
    %c0_152 = arith.constant 0 : index
    %c0_153 = arith.constant 0 : index
    %c0_154 = arith.constant 0 : index
    %341 = vector.load %arg27[%c0_152, %c0_153, %c0_154] : memref<1x9x32xf32, #tpu.memory_space<vmem>>, vector<1x9x32xf32>
    %342 = vector.shape_cast %341 : vector<1x9x32xf32> to vector<9x32xf32>
    %343 = vector.shape_cast %340 : vector<9x32xf32> to vector<1x9x32xf32>
    tpu.vector_store %arg27[%c0_152, %c0_153, %c0_154], %343 {strides = array<i32>} : memref<1x9x32xf32, #tpu.memory_space<vmem>>, vector<1x9x32xf32>,
    return
  }
  func.func @transform_0(%arg0: i32, %arg1: i32) -> (i32, i32, i32) {
    %c0_i32 = arith.constant 0 : i32
    %c0_i32_0 = arith.constant 0 : i32
    %c0_i32_1 = arith.constant 0 : i32
    return %arg0, %c0_i32, %c0_i32_0 : i32, i32, i32
  }
  func.func @transform_1(%arg0: i32, %arg1: i32) -> (i32, i32, i32) {
    %c0_i32 = arith.constant 0 : i32
    %c0_i32_0 = arith.constant 0 : i32
    %c0_i32_1 = arith.constant 0 : i32
    return %arg0, %c0_i32, %c0_i32_0 : i32, i32, i32
  }
  func.func @transform_2(%arg0: i32, %arg1: i32) -> (i32, i32, i32) {
    %c0_i32 = arith.constant 0 : i32
    %c0_i32_0 = arith.constant 0 : i32
    %c0_i32_1 = arith.constant 0 : i32
    return %arg0, %c0_i32, %c0_i32_0 : i32, i32, i32
  }
  func.func @transform_3(%arg0: i32, %arg1: i32) -> (i32, i32, i32) {
    %c0_i32 = arith.constant 0 : i32
    %c0_i32_0 = arith.constant 0 : i32
    %c0_i32_1 = arith.constant 0 : i32
    return %arg0, %c0_i32, %c0_i32_0 : i32, i32, i32
  }
  func.func @transform_4(%arg0: i32, %arg1: i32) -> (i32, i32, i32) {
    %c0_i32 = arith.constant 0 : i32
    %c0_i32_0 = arith.constant 0 : i32
    %c0_i32_1 = arith.constant 0 : i32
    return %arg0, %c0_i32, %c0_i32_0 : i32, i32, i32
  }
  func.func @transform_5(%arg0: i32, %arg1: i32) -> (i32, i32, i32) {
    %c0_i32 = arith.constant 0 : i32
    %c0_i32_0 = arith.constant 0 : i32
    %c0_i32_1 = arith.constant 0 : i32
    return %arg1, %c0_i32, %c0_i32_0 : i32, i32, i32
  }
  func.func @transform_6(%arg0: i32, %arg1: i32) -> (i32, i32, i32) {
    %c0_i32 = arith.constant 0 : i32
    %c0_i32_0 = arith.constant 0 : i32
    %c0_i32_1 = arith.constant 0 : i32
    return %arg1, %c0_i32, %c0_i32_0 : i32, i32, i32
  }
  func.func @transform_7(%arg0: i32, %arg1: i32) -> (i32, i32, i32) {
    %c0_i32 = arith.constant 0 : i32
    %c0_i32_0 = arith.constant 0 : i32
    %c0_i32_1 = arith.constant 0 : i32
    return %arg1, %c0_i32, %c0_i32_0 : i32, i32, i32
  }
  func.func @transform_8(%arg0: i32, %arg1: i32) -> (i32, i32, i32) {
    %c0_i32 = arith.constant 0 : i32
    %c0_i32_0 = arith.constant 0 : i32
    %c0_i32_1 = arith.constant 0 : i32
    return %arg1, %c0_i32, %c0_i32_0 : i32, i32, i32
  }
  func.func @transform_9(%arg0: i32, %arg1: i32) -> (i32, i32, i32) {
    %c0_i32 = arith.constant 0 : i32
    %c0_i32_0 = arith.constant 0 : i32
    %c0_i32_1 = arith.constant 0 : i32
    return %arg1, %c0_i32, %c0_i32_0 : i32, i32, i32
  }
  func.func @transform_10(%arg0: i32, %arg1: i32) -> (i32, i32, i32) {
    %c0_i32 = arith.constant 0 : i32
    %c0_i32_0 = arith.constant 0 : i32
    %c0_i32_1 = arith.constant 0 : i32
    return %arg1, %c0_i32, %c0_i32_0 : i32, i32, i32
  }
  func.func @transform_11(%arg0: i32, %arg1: i32) -> (i32, i32, i32) {
    %c0_i32 = arith.constant 0 : i32
    %c0_i32_0 = arith.constant 0 : i32
    %c0_i32_1 = arith.constant 0 : i32
    return %arg1, %c0_i32, %c0_i32_0 : i32, i32, i32
  }
  func.func @transform_12(%arg0: i32, %arg1: i32) -> (i32, i32, i32) {
    %c0_i32 = arith.constant 0 : i32
    %c0_i32_0 = arith.constant 0 : i32
    %c0_i32_1 = arith.constant 0 : i32
    return %arg1, %c0_i32, %c0_i32_0 : i32, i32, i32
  }
  func.func @transform_13(%arg0: i32, %arg1: i32) -> (i32, i32, i32) {
    %c0_i32 = arith.constant 0 : i32
    %c0_i32_0 = arith.constant 0 : i32
    %c0_i32_1 = arith.constant 0 : i32
    return %arg1, %c0_i32, %c0_i32_0 : i32, i32, i32
  }
  func.func @transform_14(%arg0: i32, %arg1: i32) -> (i32, i32, i32) {
    %c0_i32 = arith.constant 0 : i32
    %c0_i32_0 = arith.constant 0 : i32
    %c0_i32_1 = arith.constant 0 : i32
    return %arg1, %c0_i32, %c0_i32_0 : i32, i32, i32
  }
  func.func @transform_15(%arg0: i32, %arg1: i32) -> (i32, i32, i32) {
    %c0_i32 = arith.constant 0 : i32
    %c0_i32_0 = arith.constant 0 : i32
    %c0_i32_1 = arith.constant 0 : i32
    return %arg1, %c0_i32, %c0_i32_0 : i32, i32, i32
  }
  func.func @transform_16(%arg0: i32, %arg1: i32) -> (i32, i32, i32) {
    %c0_i32 = arith.constant 0 : i32
    %c0_i32_0 = arith.constant 0 : i32
    %c0_i32_1 = arith.constant 0 : i32
    return %arg1, %c0_i32, %c0_i32_0 : i32, i32, i32
  }
  func.func @transform_17(%arg0: i32, %arg1: i32) -> (i32, i32, i32) {
    %c0_i32 = arith.constant 0 : i32
    %c0_i32_0 = arith.constant 0 : i32
    %c0_i32_1 = arith.constant 0 : i32
    return %arg1, %c0_i32, %c0_i32_0 : i32, i32, i32
  }
  func.func @transform_18(%arg0: i32, %arg1: i32) -> (i32, i32, i32) {
    %c0_i32 = arith.constant 0 : i32
    %c0_i32_0 = arith.constant 0 : i32
    %c0_i32_1 = arith.constant 0 : i32
    return %arg1, %c0_i32, %c0_i32_0 : i32, i32, i32
  }
  func.func @transform_19(%arg0: i32, %arg1: i32) -> (i32, i32, i32) {
    %c0_i32 = arith.constant 0 : i32
    %c0_i32_0 = arith.constant 0 : i32
    %c0_i32_1 = arith.constant 0 : i32
    return %arg1, %c0_i32, %c0_i32_0 : i32, i32, i32
  }
  func.func @transform_20(%arg0: i32, %arg1: i32) -> (i32, i32, i32) {
    %c0_i32 = arith.constant 0 : i32
    %c0_i32_0 = arith.constant 0 : i32
    %c0_i32_1 = arith.constant 0 : i32
    return %arg1, %c0_i32, %c0_i32_0 : i32, i32, i32
  }
  func.func @transform_21(%arg0: i32, %arg1: i32) -> (i32, i32, i32) {
    %c0_i32 = arith.constant 0 : i32
    %c0_i32_0 = arith.constant 0 : i32
    %c0_i32_1 = arith.constant 0 : i32
    return %arg1, %c0_i32, %c0_i32_0 : i32, i32, i32
  }
  func.func @transform_22(%arg0: i32, %arg1: i32) -> (i32, i32, i32) {
    %c0_i32 = arith.constant 0 : i32
    %c0_i32_0 = arith.constant 0 : i32
    %c0_i32_1 = arith.constant 0 : i32
    return %arg1, %c0_i32, %c0_i32_0 : i32, i32, i32
  }
  func.func @transform_23(%arg0: i32, %arg1: i32) -> (i32, i32, i32) {
    %c0_i32 = arith.constant 0 : i32
    %c0_i32_0 = arith.constant 0 : i32
    %c0_i32_1 = arith.constant 0 : i32
    return %arg1, %c0_i32, %c0_i32_0 : i32, i32, i32
  }
  func.func @transform_24(%arg0: i32, %arg1: i32) -> (i32, i32, i32) {
    %c0_i32 = arith.constant 0 : i32
    %c0_i32_0 = arith.constant 0 : i32
    %c0_i32_1 = arith.constant 0 : i32
    return %arg1, %c0_i32, %c0_i32_0 : i32, i32, i32
  }
  func.func @transform_25(%arg0: i32, %arg1: i32) -> (i32, i32, i32) {
    %c0_i32 = arith.constant 0 : i32
    %c0_i32_0 = arith.constant 0 : i32
    %c0_i32_1 = arith.constant 0 : i32
    return %arg0, %c0_i32, %c0_i32_0 : i32, i32, i32
  }
}

</mosaic_0001>

<bundles_post_ra>
// kernel: tpu_custom_call.1
= control target key start
LH: loop header
LB: loop body
LE: loop exit
PB: predicated region body
PF: predicated region fallthrough
CT: control target
= control target key end

     0   :  { %s5492_s0 = inlined_call_operand.vmem [shape: f32[2,9,32], index: 0, kind: input, shape index: {}]   ;;  %s5493_s1 = inlined_call_operand.hbm [shape: bf16[2,8,32], index: 1, kind: input, shape index: {}]   ;;  %s5494_s2 = inlined_call_operand.hbm [shape: f32[2,1,9], index: 2, kind: input, shape index: {}]   ;;  %s5495_s3 = inlined_call_operand.hbm [shape: f32[2,1,8], index: 3, kind: input, shape index: {}]   ;;  %s5496_s4 = inlined_call_operand.vmem [shape: f32[2,9,1], index: 4, kind: input, shape index: {}]   ;;  %s5497_s5 = inlined_call_operand.vmem [shape: bf16[2,32,96], index: 5, kind: input, shape index: {}]   ;;  %s5498_s6 = inlined_call_operand.hbm [shape: f32[2,1,96], index: 6, kind: input, shape index: {}]   ;;  %s5499_s7 = inlined_call_operand.vmem [shape: bf16[2,32,32], index: 7, kind: input, shape index: {}]   ;;  %s5500_s8 = inlined_call_operand.hbm [shape: f32[2,1,32], index: 8, kind: input, shape index: {}]   ;;  %s5501_s9 = inlined_call_operand.hbm [shape: f32[2,1,32], index: 9, kind: input, shape index: {}]   ;;  %s5502_s10 = inlined_call_operand.hbm [shape: f32[2,1,32], index: 10, kind: input, shape index: {}]   ;;  %s5503_s11 = inlined_call_operand.vmem [shape: bf16[2,32,32], index: 11, kind: input, shape index: {}]   ;;  %s5504_s12 = inlined_call_operand.hbm [shape: f32[2,1,32], index: 12, kind: input, shape index: {}]   ;;  %s5505_s13 = inlined_call_operand.vmem [shape: bf16[2,32,64], index: 13, kind: input, shape index: {}]   ;;  %s5506_s14 = inlined_call_operand.vmem [shape: f32[2,1,64], index: 14, kind: input, shape index: {}]   ;;  %s5507_s15 = inlined_call_operand.vmem [shape: bf16[2,32,32], index: 15, kind: input, shape index: {}]   ;;  %s5508_s16 = inlined_call_operand.vmem [shape: f32[2,1,32], index: 16, kind: input, shape index: {}]   ;;  %s5509_s17 = inlined_call_operand.vmem [shape: f32[2,1,32], index: 17, kind: input, shape index: {}]   ;;  %s5510_s18 = inlined_call_operand.vmem [shape: f32[2,1,32], index: 18, kind: input, shape index: {}]   ;;  %s5511_s19 = inlined_call_operand.vmem [shape: bf16[2,32,64], index: 19, kind: input, shape index: {}]   ;;  %s5512_s20 = inlined_call_operand.vmem [shape: f32[2,1,64], index: 20, kind: input, shape index: {}]   ;;  %s5513_s21 = inlined_call_operand.vmem [shape: bf16[2,64,32], index: 21, kind: input, shape index: {}]   ;;  %s5514_s22 = inlined_call_operand.vmem [shape: f32[2,1,32], index: 22, kind: input, shape index: {}]   ;;  %s5515_s23 = inlined_call_operand.vmem [shape: f32[2,1,32], index: 23, kind: input, shape index: {}]   ;;  %s5516_s24 = inlined_call_operand.vmem [shape: f32[2,1,32], index: 24, kind: input, shape index: {}]   ;;  %s5517_s25 = inlined_call_operand.vmem [shape: f32[2,9,32], index: 25, kind: output, shape index: {}]  }
   0x1   :  { %5562 = sst [smem:[#allocation42_spill]] %s5492_s0 }
   0x2   :  { %5563 = sst [smem:[#allocation43_spill]] %s5493_s1 }
   0x3   :  { %5564 = sst [smem:[#allocation44_spill]] %s5494_s2 }
   0x4   :  { %5565 = sst [smem:[#allocation45_spill]] %s5495_s3 }
   0x5   :  { %5566 = sst [smem:[#allocation46_spill]] %s5496_s4 }
   0x6   :  { %5567 = sst [smem:[#allocation47_spill]] %s5497_s5 }
   0x7   :  { %5568 = sst [smem:[#allocation48_spill]] %s5498_s6 }
   0x8   :  { %5569 = sst [smem:[#allocation49_spill]] %s5499_s7 }
   0x9   :  { %5570 = sst [smem:[#allocation50_spill]] %s5500_s8 }
   0xa   :  { %5571 = sst [smem:[#allocation51_spill]] %s5501_s9 }
   0xb   :  { %5572 = sst [smem:[#allocation52_spill]] %s5502_s10 }
   0xc   :  { %5573 = sst [smem:[#allocation53_spill]] %s5503_s11 }
   0xd   :  { %5574 = sst [smem:[#allocation54_spill]] %s5504_s12 }
   0xe   :  { %5575 = sst [smem:[#allocation55_spill]] %s5505_s13 }
   0xf   :  { %5576 = sst [smem:[#allocation56_spill]] %s5506_s14 }
  0x10   :  { %5577 = sst [smem:[#allocation57_spill]] %s5507_s15 }
  0x11   :  { %5578 = sst [smem:[#allocation58_spill]] %s5508_s16 }
  0x12   :  { %5579 = sst [smem:[#allocation59_spill]] %s5509_s17 }
  0x13   :  { %5580 = sst [smem:[#allocation60_spill]] %s5510_s18 }
  0x14   :  { %5581 = sst [smem:[#allocation61_spill]] %s5511_s19 }
  0x15   :  { %5582 = sst [smem:[#allocation62_spill]] %s5512_s20 }
  0x16   :  { %5583 = sst [smem:[#allocation63_spill]] %s5513_s21 }
  0x17   :  { %5584 = sst [smem:[#allocation64_spill]] %s5514_s22 }
  0x18   :  { %5585 = sst [smem:[#allocation65_spill]] %s5515_s23 }
  0x19   :  { %5586 = sst [smem:[#allocation66_spill]] %s5516_s24 }
  0x1a   :  { %5587 = sst [smem:[#allocation67_spill]] %s5517_s25 }
  0x1b   :  { %30 = vsyncpa [#allocation6], 0 }
  0x1c   :  { %32 = vsyncpa [#allocation6 + $0x1], 0 }
  0x1d   :  { %33 = vsyncpa [#allocation8], 0 }
  0x1e   :  { %35 = vsyncpa [#allocation8 + $0x1], 0 }
  0x1f   :  { %36 = vsyncpa [#allocation11], 0 }
  0x20   :  { %38 = vsyncpa [#allocation11 + $0x1], 0 }
  0x21   :  { %39 = vsyncpa [#allocation14], 0 }
  0x22   :  { %41 = vsyncpa [#allocation14 + $0x1], 0 }
  0x23   :  { %42 = vsyncpa [#allocation17], 0 }
  0x24   :  { %44 = vsyncpa [#allocation17 + $0x1], 0  ;;  %s4571_s29 = smov 0   ;;  %s4573_s2 = smov 0  }
  0x25   :  { %s4575_s6 = smov 0   ;;  %s4577_s30 = smov 0  }
  0x26   :  { %s4579_s7 = smov 0   ;;  %s4581_s3 = smov 0  }
  0x27   :  { %s4583_s26 = smov 0   ;;  %s4585_s1 = smov 0  }
  0x28   :  { %s4587_s8 = smov 0   ;;  %s4589_s27 = smov 0  }
  0x29   :  { %s4591_s4 = smov 0  }
  0x2a LB: > { %5588 = sst [smem:[#allocation23_spill]] %s4375_s2  ;;  %s5524_s28 = sadd.s32 4294967295, %s4411_s4   ;;  %s4411_s4 = sphi %s4591_s4, %s50_s4   ;;  %s4407_s27 = sphi %s4589_s27, %s5705_s27   ;;  %s4403_s8 = sphi %s4587_s8, %s5704_s8   ;;  %s4399_s1 = sphi %s4585_s1, %s5703_s1   ;;  %s4395_s26 = sphi %s4583_s26, %s5702_s26   ;;  %s4391_s3 = sphi %s4581_s3, %s5701_s3   ;;  %s4387_s7 = sphi %s4579_s7, %s5700_s7   ;;  %s4383_s30 = sphi %s4577_s30, %s5699_s30   ;;  %s4379_s6 = sphi %s4575_s6, %s5698_s6   ;;  %s4375_s2 = sphi %s4573_s2, %s5697_s2   ;;  %s4371_s29 = sphi %s4571_s29, %s5696_s29  }
  0x2b   : > { %5589 = sst [smem:[#allocation24_spill]] %s4379_s6  ;;  %p102_p0 = scmp.ne.s32.totalorder %s4391_s3, %s4387_s7 }
  0x2c   : > { %5590 = sst [smem:[#allocation25_spill]] %s4387_s7  ;;  %p103_p1 = scmp.eq.s32.totalorder %s4411_s4, 0 }
  0x2d   : > { %5591 = sst [smem:[#allocation26_spill]] %s4391_s3  ;;  %p108_p2 = scmp.ne.s32.totalorder %s4387_s7, %s4383_s30 }
  0x2e   : > { %5592 = sst [smem:[#allocation27_spill]] %s4395_s26  ;;  %p109_p3 = scmp.eq.s32.totalorder %s5524_s28, 0 }
  0x2f   : > { %5593 = sst [smem:[#allocation28_spill]] %s4399_s1  ;;  %p232_p4 = scmp.ne.s32.totalorder %s4379_s6, %s4375_s2 }
  0x30   : > { %5594 = sst [smem:[#allocation29_spill]] %s4403_s8  ;;  %p104_p5 = por %p103_p1, %p102_p0 }
  0x31   : > { %5595 = sst [smem:[#allocation30_spill]] %s4407_s27  ;;  %p238_p6 = scmp.ne.s32.totalorder %s4375_s2, %s4371_s29 }
  0x32   : > { %5596 = sst [smem:[#allocation31_spill]] %s4411_s4  ;;  %p4634_p7 = por %p109_p3, %p108_p2 }
  0x33   : > { %p4638_p8 = por %p232_p4, %p103_p1  ;;  %p4642_p9 = por %p238_p6, %p109_p3 }
  0x34   : > { %s5597_s0 = scalar_select %p4634_p7, 1, 0 }
  0x35   : > { %s5599_s25 = scalar_select %p4638_p8, 1, 0 }
  0x36   : > { %5598 = sst [smem:[#allocation32_spill]] %s5597_s0  ;;  %p5526_p10 = scmp.lt.s32.totalorder %s4411_s4, 4 }
  0x37   : > { %s5600_s9 = scalar_select %p4642_p9, 1, 0 }
  0x38   : > { %s4648_s5 = sand.u32 1, %s4391_s3   ;;  %s4651_s30 = sand.u32 1, %s4411_s4  }
  0x39   : > { %5601 = sst [smem:[#allocation33_spill]] %s5600_s9  ;;  %p4655_p11 = pnand %p5526_p10, %p104_p5 }
  0x3a   : > { %s3516_s28 = sshll.u32 %s4407_s27, 4  ;;  %s785_s24 = scalar_lea.vmem [#allocation7], %s4648_s5 }
  0x3b   : > { %s5602_s29 = scalar_select %p4655_p11, 1, 0 }
  0x3c   : > { %s792_s23 = sshll.u32 %s785_s24, 4  ;;  %s5603_s20 = sld [smem:[#allocation44_spill]]  ;;  %s4666_s23 = int_to_ptr.vmem [resolvable:$true] %s792_s23 }
  0x3d   : > { %s5604_s16 = sld [smem:[#allocation45_spill]]  ;;  %s5529_s13 = scalar_lea.sflag [#allocation8], %s4651_s30 }
  0x3e   : > { %p4678_p13 = pneg %p4655_p11 }
  0x40   : > { %s5605_s24 = scalar_select %p4678_p13, 1, 0 }
  0x42   : > { %s4664_s19 = scalar_lea.hbm %s5603_s20, %s3516_s28  ;;  %s4070_s14 = scalar_lea.hbm %s5603_s20, 32 }
  0x43   : > { %s4671_s15 = scalar_lea.hbm %s5604_s16, %s3516_s28  ;;  %s4065_s11 = scalar_lea.hbm %s4664_s19, 16 }
  0x44   : > { %p4066_p12 = scmp.ne.s32.totalorder %s4664_s19, %s4065_s11  ;;  %p4071_p2 = scmp.lt.u32.totalorder %s4664_s19, %s5603_s20 }
  0x45   : > { %p4072_p3 = scmp.lt.u32.totalorder %s4070_s14, %s4065_s11  ;;  %p4074_p5 = scmp.lt.u32.totalorder %s4065_s11, %s4664_s19 }
  0x46   : > { %p4068_p0 = pnand %p4678_p13, %p4066_p12 }
  0x47   : > { %p4073_p4 = por %p4072_p3, %p4071_p2 }
  0x48   : > { %p4069_p1 = pneg %p4068_p0 }
  0x49   : > { %p4075_p6 = por %p4074_p5, %p4073_p4 }
  0x4b   : > { %p4076_p10 = pnand %p4075_p6, %p4069_p1 }
  0x4d   : > { %4079 = shalt.err (!%p4076_p10)
}
  0x4e   : > { %s4080_s18 = scalar_lea.vmem %s4666_s23, 16  ;;  %s4413_s28 = smov [#allocation7]  }
  0x4f   : > { %p4081_p12 = scmp.ne.s32.totalorder %s4666_s23, %s4080_s18  ;;  %s4085_s21 = sshll.u32 %s4413_s28, 4  ;;  %s4086_s21 = int_to_ptr.vmem [resolvable:$false] %s4085_s21 }
  0x50   : > { %s4087_s26 = scalar_lea.vmem %s4086_s21, 32  ;;  %p4088_p7 = scmp.lt.s32.totalorder %s4666_s23, %s4086_s21 }
  0x51   : > { %p4083_p0 = pnand %p4081_p12, %p4678_p13  ;;  %p4089_p8 = scmp.lt.s32.totalorder %s4087_s26, %s4080_s18 }
  0x53   : > { %p4084_p9 = pneg %p4083_p0  ;;  %p4090_p2 = por %p4089_p8, %p4088_p7 }
  0x55   : > { %p4091_p3 = pnand %p4090_p2, %p4084_p9 }
  0x57   : > { %4094 = shalt.err (!%p4091_p3)
}
  0x58   : > { %3843 = dma.hbm_to_vmem [thread:$0]  (!%p4655_p11), %s4664_s19, 16, %s4666_s23, %s5529_s13  }
  0x59   : > { %p5606_p7 = scmp.ne.s32.totalorder %s5599_s25, 0  ;;  %p5607_p8 = scmp.lt.s32.totalorder %s4411_s4, 4 }
  0x5a   : > { %p3523_p10 = scmp.ge.s32.totalorder %s4411_s4, 1  ;;  %p1011_p1 = scmp.lt.s32.totalorder %s4411_s4, 5 }
  0x5b   : > { %p4707_p9 = pnand %p5607_p8, %p5606_p7  ;;  %s59_s22 = sadd.s32 1, %s4403_s8 }
  0x5c   : > { %p4713_p4 = pnand %p3523_p10, %p1011_p1  ;;  %p60_p5 = scmp.ge.s32.totalorder %s59_s22, 2 }
  0x5d   : > { %s5608_s11 = scalar_select %p4707_p9, 1, 0 }
  0x5e   : > { %s5609_s14 = scalar_select %p4713_p4, 1, 0 }
  0x5f   : > { %s225_s17 = sadd.s32 1, %s4379_s6  ;;  %s4720_s18 = sand.u32 1, %s4379_s6  }
  0x60   : > { %s5707_s22 = smov (%p60_p5, %s59_s22), 0  ;;  %s5611_s19 = sadd.s32 1, %s4407_s27 }
  0x61   : > { %5610 = sst [smem:[#allocation34_spill]] %s5707_s22  ;;  %s5709_s19 = smov (!%p60_p5, %s5611_s19), %s4407_s27 }
  0x62   : > { %s222_s23 = ssub.s32 %s4403_s8, %s5707_s22  ;;  %p64_p6 = scmp.ge.s32.totalorder %s5709_s19, 2 }
  0x63   : > { %p223_p12 = scmp.eq.s32.totalorder %s222_s23, 0  ;;  %s4730_s25 = sshll.u32 %s4403_s8, 4 }
  0x64   : > { %s835_s28 = scalar_lea.vmem [#allocation10], %s4720_s18  ;;  %s5711_s19 = smov (%p64_p6, %s5709_s19), 0 }
  0x65   : > { %s842_s21 = sshll.u32 %s835_s28, 4  ;;  %5612 = sst [smem:[#allocation35_spill]] %s5711_s19  ;;  %s4750_s21 = int_to_ptr.vmem [resolvable:$true] %s842_s21 }
  0x66   : > { %s4736_s26 = scalar_select %p223_p12, %s4379_s6, %s225_s17  }
  0x67   : > { %s92_s13 = ssub.s32 %s4407_s27, %s5711_s19  ;;  %s5614_s9 = sld [smem:[#allocation48_spill]] }
  0x68   : > { %5613 = sst [smem:[#allocation36_spill]] %s4736_s26  ;;  %p4746_p0 = scmp.eq.s32.totalorder %s92_s13, 0 }
  0x69   : > { %p4757_p3 = pneg %p4707_p9 }
  0x6a   : > { %s5615_s23 = scalar_select %p4746_p0, 1, 0 }
  0x6b   : > { %s5616_s17 = scalar_select %p4757_p3, 1, 0 }
  0x6d   : > { %s4744_s2 = scalar_lea.hbm %s5614_s9, %s4730_s25  ;;  %s4100_s13 = scalar_lea.hbm %s5614_s9, 32 }
  0x6e   : > { %s4095_s22 = scalar_lea.hbm %s4744_s2, 16  ;;  %p4101_p10 = scmp.lt.u32.totalorder %s4744_s2, %s5614_s9 }
  0x6f   : > { %p4096_p2 = scmp.ne.s32.totalorder %s4744_s2, %s4095_s22  ;;  %p4102_p1 = scmp.lt.u32.totalorder %s4100_s13, %s4095_s22 }
  0x70   : > { %p4104_p6 = scmp.lt.u32.totalorder %s4095_s22, %s4744_s2 }
  0x71   : > { %p4098_p7 = pnand %p4757_p3, %p4096_p2  ;;  %p4103_p5 = por %p4102_p1, %p4101_p10 }
  0x73   : > { %p4099_p8 = pneg %p4098_p7  ;;  %p4105_p12 = por %p4104_p6, %p4103_p5 }
  0x75   : > { %p4106_p4 = pnand %p4105_p12, %p4099_p8 }
  0x77   : > { %4109 = shalt.err (!%p4106_p4)
}
  0x78   : > { %s4110_s28 = scalar_lea.vmem %s4750_s21, 16  ;;  %s4414_s20 = smov [#allocation10]  }
  0x79   : > { %p4111_p2 = scmp.ne.s32.totalorder %s4750_s21, %s4110_s28  ;;  %s4115_s1 = sshll.u32 %s4414_s20, 4  ;;  %s4116_s1 = int_to_ptr.vmem [resolvable:$false] %s4115_s1 }
  0x7a   : > { %s4117_s8 = scalar_lea.vmem %s4116_s1, 32  ;;  %p4118_p13 = scmp.lt.s32.totalorder %s4750_s21, %s4116_s1 }
  0x7b   : > { %p4113_p7 = pnand %p4111_p2, %p4757_p3  ;;  %p4119_p0 = scmp.lt.s32.totalorder %s4117_s8, %s4110_s28 }
  0x7d   : > { %p4114_p11 = pneg %p4113_p7  ;;  %p4120_p10 = por %p4119_p0, %p4118_p13 }
  0x7f   : > { %p4121_p1 = pnand %p4120_p10, %p4114_p11 }
  0x81   : > { %4124 = shalt.err (!%p4121_p1)
}
  0x82   : > { %s5617_s22 = scalar_lea.sflag [#allocation11], %s4651_s30  ;;  %s5618_s19 = sadd.s32 1, %s4391_s3 }
  0x83   : > { %3849 = dma.hbm_to_vmem [thread:$0]  (!%p4707_p9), %s4744_s2, 16, %s4750_s21, %s5617_s22  }
  0x84   : > { %p5619_p4 = scmp.ne.s32.totalorder %s5615_s23, 0  ;;  %s5621_s1 = sld [smem:[#allocation51_spill]] }
  0x85   : > { %s877_s26 = scalar_lea.vmem [#allocation13], %s4720_s18  ;;  %s5550_s4 = scalar_lea.sflag [#allocation14], %s4651_s30 }
  0x86   : > { %s4787_s28 = scalar_select %p5619_p4, %s4391_s3, %s5618_s19  }
  0x87   : > { %s884_s6 = sshll.u32 %s877_s26, 4  ;;  %s885_s6 = int_to_ptr.vmem [resolvable:$true] %s884_s6 }
  0x88   : > { %5620 = sst [smem:[#allocation37_spill]] %s4787_s28 }
  0x8a   : > { %s5622_s9 = smov %s5621_s1  ;;  %s4793_s8 = scalar_lea.hbm %s5621_s1, %s4730_s25 }
  0x8b   : > { %s4125_s0 = scalar_lea.hbm %s4793_s8, 16  ;;  %s4130_s23 = scalar_lea.hbm %s5622_s9, 32 }
  0x8c   : > { %p4126_p11 = scmp.ne.s32.totalorder %s4793_s8, %s4125_s0  ;;  %p4131_p8 = scmp.lt.u32.totalorder %s4793_s8, %s5622_s9 }
  0x8d   : > { %p4132_p5 = scmp.lt.u32.totalorder %s4130_s23, %s4125_s0  ;;  %p4134_p12 = scmp.lt.u32.totalorder %s4125_s0, %s4793_s8 }
  0x8e   : > { %p4128_p13 = pnand %p4126_p11, %p4757_p3 }
  0x8f   : > { %p4133_p6 = por %p4132_p5, %p4131_p8 }
  0x90   : > { %p4129_p0 = pneg %p4128_p13 }
  0x91   : > { %p4135_p2 = por %p4134_p12, %p4133_p6 }
  0x93   : > { %p4136_p7 = pnand %p4135_p2, %p4129_p0 }
  0x95   : > { %4139 = shalt.err (!%p4136_p7)
}
  0x96   : > { %s4140_s26 = scalar_lea.vmem %s885_s6, 16  ;;  %s4415_s13 = smov [#allocation13]  }
  0x97   : > { %p4141_p10 = scmp.ne.s32.totalorder %s885_s6, %s4140_s26  ;;  %s4145_s20 = sshll.u32 %s4415_s13, 4  ;;  %s4146_s20 = int_to_ptr.vmem [resolvable:$false] %s4145_s20 }
  0x98   : > { %s4147_s1 = scalar_lea.vmem %s4146_s20, 32  ;;  %p4148_p11 = scmp.lt.s32.totalorder %s885_s6, %s4146_s20 }
  0x99   : > { %p4143_p1 = pnand %p4141_p10, %p4757_p3  ;;  %p4149_p13 = scmp.lt.s32.totalorder %s4147_s1, %s4140_s26 }
  0x9b   : > { %p4144_p4 = pneg %p4143_p1  ;;  %p4150_p9 = por %p4149_p13, %p4148_p11 }
  0x9d   : > { %p4151_p5 = pnand %p4150_p9, %p4144_p4 }
  0x9f   : > { %4154 = shalt.err (!%p4151_p5)
}
  0xa0   : > { %p5623_p8 = scmp.ne.s32.totalorder %s5608_s11, 0  ;;  %s3514_s0 = sshll.u32 %s4648_s5, 2 }
  0xa1   : > { %s3515_s2 = sshll.u32 %s4407_s27, 6  ;;  %s5624_s22 = sld [smem:[#allocation43_spill]] }
  0xa2   : > { %3855 = dma.hbm_to_vmem [thread:$0]  (!%p5623_p8), %s4793_s8, 16, %s885_s6, %s5550_s4  }
  0xa3   : > { %s768_s26 = scalar_lea.vmem [#allocation5], %s3514_s0  ;;  %s802_s20 = scalar_lea.vmem [#allocation9], %s4648_s5 }
  0xa4   : > { %s775_s13 = sshll.u32 %s768_s26, 4  ;;  %s4826_s1 = sshll.u32 %s802_s20, 4  ;;  %s4823_s13 = int_to_ptr.vmem [resolvable:$true] %s775_s13  ;;  %s810_s1 = int_to_ptr.vmem [resolvable:$true] %s4826_s1 }
  0xa5   : > { %s765_s9 = scalar_lea.sflag [#allocation6], %s4648_s5  ;;  %p5625_p0 = scmp.ne.s32.totalorder %s5605_s24, 0 }
  0xa7   : > { %s4821_s19 = scalar_lea.hbm %s5624_s22, %s3515_s2  ;;  %s4160_s21 = scalar_lea.hbm %s5624_s22, 128 }
  0xa8   : > { %s4155_s6 = scalar_lea.hbm %s4821_s19, 64  ;;  %p4161_p2 = scmp.lt.u32.totalorder %s4821_s19, %s5624_s22 }
  0xa9   : > { %p4156_p9 = scmp.ne.s32.totalorder %s4821_s19, %s4155_s6  ;;  %p4162_p7 = scmp.lt.u32.totalorder %s4160_s21, %s4155_s6 }
  0xaa   : > { %p4164_p1 = scmp.lt.u32.totalorder %s4155_s6, %s4821_s19 }
  0xab   : > { %p4158_p6 = pnand %p4156_p9, %p5625_p0  ;;  %p4163_p10 = por %p4162_p7, %p4161_p2 }
  0xad   : > { %p4159_p12 = pneg %p4158_p6  ;;  %p4165_p4 = por %p4164_p1, %p4163_p10 }
  0xaf   : > { %p4166_p11 = pnand %p4165_p4, %p4159_p12 }
  0xb1   : > { %4169 = shalt.err (!%p4166_p11)
}
  0xb2   : > { %s4170_s5 = scalar_lea.vmem %s4823_s13, 64  ;;  %s4416_s0 = smov [#allocation5]  }
  0xb3   : > { %p4171_p13 = scmp.ne.s32.totalorder %s4823_s13, %s4170_s5  ;;  %s4175_s26 = sshll.u32 %s4416_s0, 4  ;;  %s4176_s26 = int_to_ptr.vmem [resolvable:$false] %s4175_s26 }
  0xb4   : > { %s4177_s4 = scalar_lea.vmem %s4176_s26, 128  ;;  %p4178_p6 = scmp.lt.s32.totalorder %s4823_s13, %s4176_s26 }
  0xb5   : > { %p4173_p5 = pnand %p4171_p13, %p5625_p0  ;;  %p4179_p8 = scmp.lt.s32.totalorder %s4177_s4, %s4170_s5 }
  0xb7   : > { %p4174_p9 = pneg %p4173_p5  ;;  %p4180_p2 = por %p4179_p8, %p4178_p6 }
  0xb9   : > { %p4181_p7 = pnand %p4180_p2, %p4174_p9 }
  0xbb   : > { %4184 = shalt.err (!%p4181_p7)
}
  0xbc   : > { %p5626_p12 = scmp.ne.s32.totalorder %s5602_s29, 0  ;;  %s4185_s20 = scalar_lea.hbm %s4671_s15, 16 }
  0xbd   : > { %p4186_p10 = scmp.ne.s32.totalorder %s4671_s15, %s4185_s20  ;;  %s4190_s2 = scalar_lea.hbm %s5604_s16, 32 }
  0xbe   : > { %3840 = dma.hbm_to_vmem [thread:$0]  (!%p5626_p12), %s4821_s19, 64, %s4823_s13, %s765_s9  }
  0xbf   : > { %p4188_p1 = pnand %p4186_p10, %p5625_p0  ;;  %p4191_p8 = scmp.lt.u32.totalorder %s4671_s15, %s5604_s16 }
  0xc0   : > { %p4192_p11 = scmp.lt.u32.totalorder %s4190_s2, %s4185_s20  ;;  %p4194_p5 = scmp.lt.u32.totalorder %s4185_s20, %s4671_s15 }
  0xc1   : > { %p4189_p4 = pneg %p4188_p1 }
  0xc2   : > { %p4193_p13 = por %p4192_p11, %p4191_p8 }
  0xc4   : > { %p4195_p9 = por %p4194_p5, %p4193_p13 }
  0xc6   : > { %p4196_p6 = pnand %p4195_p9, %p4189_p4 }
  0xc8   : > { %4199 = shalt.err (!%p4196_p6)
}
  0xc9   : > { %s4200_s9 = scalar_lea.vmem %s810_s1, 16  ;;  %s4417_s19 = smov [#allocation9]  }
  0xca   : > { %p4201_p2 = scmp.ne.s32.totalorder %s810_s1, %s4200_s9  ;;  %s4205_s13 = sshll.u32 %s4417_s19, 4  ;;  %s4206_s13 = int_to_ptr.vmem [resolvable:$false] %s4205_s13 }
  0xcb   : > { %s4207_s5 = scalar_lea.vmem %s4206_s13, 32  ;;  %p4208_p1 = scmp.lt.s32.totalorder %s810_s1, %s4206_s13 }
  0xcc   : > { %p4203_p7 = pnand %p4201_p2, %p5625_p0  ;;  %p4209_p3 = scmp.lt.s32.totalorder %s4207_s5, %s4200_s9 }
  0xce   : > { %p4204_p10 = pneg %p4203_p7  ;;  %p4210_p12 = por %p4209_p3, %p4208_p1 }
  0xd0   : > { %p4211_p8 = pnand %p4210_p12, %p4204_p10 }
  0xd2   : > { %4214 = shalt.err (!%p4211_p8)
}
  0xd3   : > { %p5627_p11 = scmp.ne.s32.totalorder %s5602_s29, 0  ;;  %s5628_s0 = scalar_lea.sflag [#allocation8], %s4651_s30 }
  0xd4   : > { %s5629_s4 = sld [smem:[#allocation50_spill]]  ;;  %s860_s8 = scalar_lea.vmem [#allocation12], %s4720_s18 }
  0xd5   : > { %3846 = dma.hbm_to_vmem [thread:$0]  (!%p5627_p11), %s4671_s15, 16, %s810_s1, %s5628_s0  }
  0xd6   : > { %s867_s2 = sshll.u32 %s860_s8, 4  ;;  %p5631_p0 = scmp.ne.s32.totalorder %s5616_s17, 0  ;;  %s868_s2 = int_to_ptr.vmem [resolvable:$true] %s867_s2 }
  0xda   : > { %s5630_s20 = smov %s5629_s4  ;;  %s4874_s6 = scalar_lea.hbm %s5629_s4, %s4730_s25 }
  0xdb   : > { %s4215_s29 = scalar_lea.hbm %s4874_s6, 16  ;;  %s4220_s15 = scalar_lea.hbm %s5630_s20, 32 }
  0xdc   : > { %p4216_p3 = scmp.ne.s32.totalorder %s4874_s6, %s4215_s29  ;;  %p4221_p13 = scmp.lt.u32.totalorder %s4874_s6, %s5630_s20 }
  0xdd   : > { %p4222_p5 = scmp.lt.u32.totalorder %s4220_s15, %s4215_s29  ;;  %p4224_p6 = scmp.lt.u32.totalorder %s4215_s29, %s4874_s6 }
  0xde   : > { %p4218_p12 = pnand %p4216_p3, %p5631_p0 }
  0xdf   : > { %p4223_p9 = por %p4222_p5, %p4221_p13 }
  0xe0   : > { %p4219_p4 = pneg %p4218_p12 }
  0xe1   : > { %p4225_p2 = por %p4224_p6, %p4223_p9 }
  0xe3   : > { %p4226_p7 = pnand %p4225_p2, %p4219_p4 }
  0xe5   : > { %4229 = shalt.err (!%p4226_p7)
}
  0xe6   : > { %s4230_s19 = scalar_lea.vmem %s868_s2, 16  ;;  %s4418_s13 = smov [#allocation12]  }
  0xe7   : > { %p4231_p10 = scmp.ne.s32.totalorder %s868_s2, %s4230_s19  ;;  %s4235_s5 = sshll.u32 %s4418_s13, 4  ;;  %s4236_s5 = int_to_ptr.vmem [resolvable:$false] %s4235_s5 }
  0xe8   : > { %s4237_s0 = scalar_lea.vmem %s4236_s5, 32  ;;  %p4238_p11 = scmp.lt.s32.totalorder %s868_s2, %s4236_s5 }
  0xe9   : > { %p4233_p1 = pnand %p4231_p10, %p5631_p0  ;;  %p4239_p3 = scmp.lt.s32.totalorder %s4237_s0, %s4230_s19 }
  0xeb   : > { %p4234_p8 = pneg %p4233_p1  ;;  %p4240_p12 = por %p4239_p3, %p4238_p11 }
  0xed   : > { %p4241_p5 = pnand %p4240_p12, %p4234_p8 }
  0xef   : > { %4244 = shalt.err (!%p4241_p5)
}
  0xf0   : > { %p5632_p13 = scmp.ne.s32.totalorder %s5608_s11, 0  ;;  %s5633_s24 = scalar_lea.sflag [#allocation11], %s4651_s30 }
  0xf1   : > { %s5634_s10 = sld [smem:[#allocation52_spill]]  ;;  %s894_s29 = scalar_lea.vmem [#allocation15], %s4720_s18 }
  0xf2   : > { %3852 = dma.hbm_to_vmem [thread:$0]  (!%p5632_p13), %s4874_s6, 16, %s868_s2, %s5633_s24  }
  0xf3   : > { %s901_s21 = sshll.u32 %s894_s29, 4  ;;  %s902_s21 = int_to_ptr.vmem [resolvable:$true] %s901_s21 }
  0xf7   : > { %s4900_s8 = scalar_lea.hbm %s5634_s10, %s4730_s25  ;;  %s4250_s6 = scalar_lea.hbm %s5634_s10, 32 }
  0xf8   : > { %s4245_s23 = scalar_lea.hbm %s4900_s8, 16  ;;  %p4251_p2 = scmp.lt.u32.totalorder %s4900_s8, %s5634_s10 }
  0xf9   : > { %p4246_p4 = scmp.ne.s32.totalorder %s4900_s8, %s4245_s23  ;;  %p4252_p7 = scmp.lt.u32.totalorder %s4250_s6, %s4245_s23 }
  0xfa   : > { %p4254_p1 = scmp.lt.u32.totalorder %s4245_s23, %s4900_s8 }
  0xfb   : > { %p4248_p9 = pnand %p4246_p4, %p5631_p0  ;;  %p4253_p10 = por %p4252_p7, %p4251_p2 }
  0xfd   : > { %p4249_p6 = pneg %p4248_p9  ;;  %p4255_p8 = por %p4254_p1, %p4253_p10 }
  0xff   : > { %p4256_p11 = pnand %p4255_p8, %p4249_p6 }
 0x101   : > { %4259 = shalt.err (!%p4256_p11)
}
 0x102   : > { %s4260_s19 = scalar_lea.vmem %s902_s21, 16  ;;  %s4419_s13 = smov [#allocation15]  }
 0x103   : > { %p4261_p3 = scmp.ne.s32.totalorder %s902_s21, %s4260_s19  ;;  %s4265_s5 = sshll.u32 %s4419_s13, 4  ;;  %s4266_s5 = int_to_ptr.vmem [resolvable:$false] %s4265_s5 }
 0x104   : > { %s4267_s0 = scalar_lea.vmem %s4266_s5, 32  ;;  %p4268_p4 = scmp.lt.s32.totalorder %s902_s21, %s4266_s5 }
 0x105   : > { %p4263_p12 = pnand %p4261_p3, %p5631_p0  ;;  %p4269_p9 = scmp.lt.s32.totalorder %s4267_s0, %s4260_s19 }
 0x107   : > { %p4264_p5 = pneg %p4263_p12  ;;  %p4270_p13 = por %p4269_p9, %p4268_p4 }
 0x109   : > { %p4271_p2 = pnand %p4270_p13, %p4264_p5 }
 0x10b   : > { %4274 = shalt.err (!%p4271_p2)
}
 0x10c   : > { %p5635_p7 = scmp.ne.s32.totalorder %s5608_s11, 0  ;;  %s5636_s24 = scalar_lea.sflag [#allocation14], %s4651_s30 }
 0x10d   : > { %s5637_s12 = sld [smem:[#allocation54_spill]]  ;;  %s919_s23 = scalar_lea.vmem [#allocation16], %s4720_s18 }
 0x10e   : > { %3858 = dma.hbm_to_vmem [thread:$0]  (!%p5635_p7), %s4900_s8, 16, %s902_s21, %s5636_s24  }
 0x10f   : > { %s926_s15 = sshll.u32 %s919_s23, 4  ;;  %s917_s1 = scalar_lea.sflag [#allocation17], %s4720_s18  ;;  %s927_s15 = int_to_ptr.vmem [resolvable:$true] %s926_s15 }
 0x113   : > { %s4926_s29 = scalar_lea.hbm %s5637_s12, %s4730_s25  ;;  %s4280_s21 = scalar_lea.hbm %s5637_s12, 32 }
 0x114   : > { %s4275_s30 = scalar_lea.hbm %s4926_s29, 16  ;;  %p4281_p1 = scmp.lt.u32.totalorder %s4926_s29, %s5637_s12 }
 0x115   : > { %p4276_p13 = scmp.ne.s32.totalorder %s4926_s29, %s4275_s30  ;;  %p4282_p8 = scmp.lt.u32.totalorder %s4280_s21, %s4275_s30 }
 0x116   : > { %p4284_p3 = scmp.lt.u32.totalorder %s4275_s30, %s4926_s29 }
 0x117   : > { %p4278_p6 = pnand %p4276_p13, %p5631_p0  ;;  %p4283_p11 = por %p4282_p8, %p4281_p1 }
 0x119   : > { %p4279_p10 = pneg %p4278_p6  ;;  %p4285_p12 = por %p4284_p3, %p4283_p11 }
 0x11b   : > { %p4286_p5 = pnand %p4285_p12, %p4279_p10 }
 0x11d   : > { %4289 = shalt.err (!%p4286_p5)
}
 0x11e   : > { %s4290_s18 = scalar_lea.vmem %s927_s15, 16  ;;  %s4420_s9 = smov [#allocation16]  }
 0x11f   : > { %p4291_p4 = scmp.ne.s32.totalorder %s927_s15, %s4290_s18  ;;  %s4295_s19 = sshll.u32 %s4420_s9, 4  ;;  %s4296_s19 = int_to_ptr.vmem [resolvable:$false] %s4295_s19 }
 0x120   : > { %s4297_s13 = scalar_lea.vmem %s4296_s19, 32  ;;  %p4298_p13 = scmp.lt.s32.totalorder %s927_s15, %s4296_s19 }
 0x121   : > { %p4293_p9 = pnand %p4291_p4, %p5631_p0  ;;  %p4299_p6 = scmp.lt.s32.totalorder %s4297_s13, %s4290_s18 }
 0x123   : > { %p4294_p2 = pneg %p4293_p9  ;;  %p4300_p7 = por %p4299_p6, %p4298_p13 }
 0x125   : > { %p4301_p1 = pnand %p4300_p7, %p4294_p2 }
 0x127   : > { %4304 = shalt.err (!%p4301_p1)
}
 0x128   : > { %p5638_p8 = scmp.ne.s32.totalorder %s5608_s11, 0  ;;  %p5639_p10 = scmp.ne.s32.totalorder %s5609_s14, 0 }
 0x12a   : > { %3861 = dma.hbm_to_vmem [thread:$0]  (!%p5638_p8), %s4926_s29, 16, %s927_s15, %s917_s1  }
 0x12b   : > { %1015 = sbr.rel (%p5639_p10) target bundleno = 4752 (0x1290), region = 120 }
 0x132   : > { %s5640_s17 = sld [smem:[#allocation32_spill]]  ;;  %s4950_s5 = sand.u32 1, %s4387_s7  }
 0x133   : > { %s3524_s0 = sshll.u32 %s4950_s5, 2  ;;  %s1018_s24 = scalar_lea.sflag [#allocation6], %s4950_s5 }
 0x134   : > { %s4954_s26 = scalar_lea.vmem [#allocation5], %s3524_s0 }
 0x135   : > { %5641 = sst [smem:[#allocation38_spill]] %s4954_s26 }
 0x138   : > { %p5642_p0 = scmp.ne.s32.totalorder %s5640_s17, 0 }
 0x13a   : > { %4350 = dma.done.wait (%p5642_p0), %s1018_s24, 64  }
 0x13b   : > { %4352 = vsyncadd (%p5642_p0), %s1018_s24, 4294967232  ;;  %s5643_s11 = sld [smem:[#allocation31_spill]] }
 0x141   : > { %s5644_s4 = sadd.s32 4294967295, %s5643_s11  }
 0x142   : > { %s1026_s14 = sand.u32 1, %s5644_s4  }
 0x143   : > { %s1027_s29 = scalar_lea.sflag [#allocation8], %s1026_s14 }
 0x144   : > { %4354 = dma.done.wait (%p5642_p0), %s1027_s29, 32  }
 0x145   : > { %4356 = vsyncadd (%p5642_p0), %s1027_s29, 4294967264  ;;  %s5645_s15 = sld [smem:[#allocation23_spill]]  ;;  %s5646_s1 = sld [smem:[#allocation33_spill]] }
 0x146   : > { %s1043_s8 = scalar_lea.sflag [#allocation11], %s1026_s14 }
 0x14b   : > { %s4968_s30 = sand.u32 1, %s5645_s15   ;;  %p5647_p7 = scmp.ne.s32.totalorder %s5646_s1, 0 }
 0x14d   : > { %4358 = dma.done.wait (%p5647_p7), %s1043_s8, 32  }
 0x14e   : > { %4360 = vsyncadd (%p5647_p7), %s1043_s8, 4294967264  ;;  %s1059_s25 = scalar_lea.sflag [#allocation14], %s1026_s14 }
 0x14f   : > { %4362 = dma.done.wait (%p5647_p7), %s1059_s25, 32  }
 0x150   : > { %4364 = vsyncadd (%p5647_p7), %s1059_s25, 4294967264  ;;  %s1075_s19 = scalar_lea.sflag [#allocation17], %s4968_s30 }
 0x151   : > { %4366 = dma.done.wait (%p5647_p7), %s1075_s19, 16  }
 0x152   : > { %4368 = vsyncadd (%p5647_p7), %s1075_s19, 4294967280  ;;  %s5648_s17 = sld [smem:[#allocation28_spill]]  ;;  %s5649_s0 = sld [smem:[#allocation27_spill]] }
 0x153   : > { %s5650_s29 = sld [smem:[#allocation42_spill]]  ;;  %s5651_s25 = sld [smem:[#allocation46_spill]] }
 0x154   : > { %s5657_s18 = sld [smem:[#allocation55_spill]]  ;;  %s5659_s23 = sld [smem:[#allocation57_spill]] }
 0x155   : > { %s5666_s4 = sld [smem:[#allocation64_spill]] }
 0x158   : > { %p1241_p11 = scmp.lt.s32.totalorder %s5648_s17, 1  ;;  %p1251_p3 = scmp.lt.s32.totalorder %s5649_s0, 1 }
 0x159   : > { %p3545_p12 = scmp.ne.s32.totalorder %s5649_s0, 0 }
 0x15a   : > { %s5713_s17 = smov (!%p1241_p11, %s5648_s17), 1  ;;  %vm1322_vm0 = vcmask (!%p3545_p12), 261120   ;;  %vm1324_vm1 = vcmask (!%p3545_p12), 253952   ;;  %v1326_v2 = vlaneseq (!%p3545_p12)  ;;  %v4421_v7 = vmov (!%p3545_p12), 0  }
 0x15b   : > { %s4993_s24 = scalar_select %p1251_p3, %s5649_s0, 1 }
 0x15c   : > { %s3600_s11 = sshll.u32 %s5713_s17, 4  ;;  %s5653_s17 = sld [smem:[#allocation47_spill]]  ;;  %v1327_v4 = vshrl.u32 (!%p3545_p12), %v1326_v2, 7  ;;  %v1330_v5 = vand.u32 (!%p3545_p12), 127, %v1326_v2  ;;  %vm1358_vm6 = vcmask (!%p3545_p12), 64512   ;;  %vm1360_vm7 = vcmask (!%p3545_p12), 57344  }
 0x15d   : > { %s1245_s15 = scalar_lea.vmem %s5650_s29, %s3600_s11  ;;  %s5001_s19 = scalar_lea.vmem %s5651_s25, %s3600_s11  ;;  %vm1345_vm9 = vcmask (!%p3545_p12), 72704   ;;  %vm1347_vm12 = vcmask (!%p3545_p12), 65536   ;;  %v4422_v14 = vmov (!%p3545_p12), 0.0  }
 0x15e   : > { %s3602_s13 = sshll.u32 %s4993_s24, 4  ;;  %s5654_s29 = sld [smem:[#allocation49_spill]]  ;;  %v1320_v0 = vld [vmem:[%s1245_s15] sm:$0xff] (!%p3545_p12)  ;;  %v1321_v1 = vld [vmem:[%s1245_s15 + $0x8] sm:$0x1] (!%p3545_p12)  ;;  %v1338_v9 = vsub.s32 (!%p3545_p12), 0, %v1327_v4  ;;  %vm1333_vm4 = vcmp.gt.s32.totalorder (!%p3545_p12), %v1330_v5, %v1327_v4 }
 0x15f   : > { %s5655_s25 = sld [smem:[#allocation53_spill]]  ;;  %s5026_s9 = scalar_lea.vmem %s5657_s18, %s3602_s13  ;;  %v1328_v10 = vadd.s32 (!%p3545_p12), 8, %v1327_v4 }
 0x160   : > { %5658 = sst [smem:[#allocation40_spill]] %s5026_s9  ;;  %s5031_s6 = scalar_lea.vmem %s5659_s23, %s3602_s13 }
 0x161   : > { %5660 = sst [smem:[#allocation41_spill]] %s5031_s6  ;;  %s5664_s18 = sld [smem:[#allocation61_spill]]  ;;  %vm1334_vm5 = vcmp.gt.s32.totalorder (!%p3545_p12), %v1330_v5, %v1328_v10 }
 0x162   : > { %s5011_s10 = scalar_lea.vmem %s5653_s17, %s3602_s13  ;;  %s3608_s9 = sshll.u32 %s4993_s24, 5 }
 0x163   : > { %s1303_s14 = scalar_lea.vmem %s5666_s4, %s4993_s24  ;;  %s5670_s23 = sld [smem:[#allocation67_spill]] }
 0x164   : > { %s5016_s12 = scalar_lea.vmem %s5654_s29, %s3602_s13  ;;  %s5667_s29 = sld [smem:[#allocation63_spill]] }
 0x165   : > { %s5021_s16 = scalar_lea.vmem %s5655_s25, %s3602_s13  ;;  %s5668_s25 = sld [smem:[#allocation65_spill]] }
 0x166   : > { %5656 = sst [smem:[#allocation39_spill]] %s5021_s16 }
 0x167   : > { %s5048_s16 = scalar_lea.vmem %s5664_s18, %s3602_s13  ;;  %s5669_s18 = sld [smem:[#allocation66_spill]] }
 0x168   : > { %1319 = sbr.rel (%p3545_p12) target bundleno = 373 (0x175), region = 156 }
 0x169   : > { %s5075_s6 = scalar_lea.vmem %s5670_s23, %s3600_s11  ;;  %s5672_s11 = scalar_lea.vmem (!%p3545_p12), [#allocation9], %s4950_s5 }
 0x16a   : > { %s5062_s1 = scalar_lea.vmem %s5667_s29, %s3608_s9  ;;  %1323 = vst.msk [vmem:[%s5075_s6] sm:$0xff] (!%p3545_p12), %vm1322_vm0, %v1320_v0  ;;  %s5671_s9 = scalar_lea.vmem (!%p3545_p12), [#allocation7], %s4950_s5  ;;  %v1349_v6 = vld [vmem:[%s5672_s11] sm:$0x1] (!%p3545_p12) }
 0x16b   : > { %s1306_s22 = scalar_lea.vmem %s5668_s25, %s4993_s24  ;;  %1325 = vst.msk [vmem:[%s5075_s6 + $0x8] sm:$0x1] (!%p3545_p12), %vm1324_vm1, %v1321_v1  ;;  %v1331_v3 = vld [vmem:[%s5671_s9] sm:$0x1] (!%p3545_p12)  ;;  %vm1350_vm3 = vcmp.gt.f32.partialorder (!%p3545_p12), %v1349_v6, 0.5 }
 0x16c   : > { %vm1332_vm2 = vcmp.gt.f32.partialorder (!%p3545_p12), %v1331_v3, 0.5  ;;  %v1351_v11 = vsel (!%p3545_p12), %vm1350_vm3, 1, %v4421_v7 }
 0x16d   : > { %s1309_s26 = scalar_lea.vmem %s5669_s18, %s4993_s24  ;;  %v1335_v8 = vsel (!%p3545_p12), %vm1332_vm2, 1, %v4421_v7  ;;  %v1355_v13 = vrot.slane (!%p3545_p12), %v1351_v11, %v1338_v9 }
 0x16e   : > { %v1339_v12 = vrot.slane (!%p3545_p12), %v1335_v8, %v1338_v9 }
 0x16f   : > { %vm1356_vm10 = vcmp.eq.s32.totalorder %v1355_v13, 1 }
 0x170   : > { %vm1340_vm8 = vcmp.eq.s32.totalorder %v1339_v12, 1  ;;  %v1357_v15 = vsel %vm1356_vm10, -1e+09, %v4422_v14 }
 0x171   : > { %vm1341_vm11 = vmor %vm1333_vm4, %vm1340_vm8  ;;  %1359 = vst.msk [vmem:[#allocation3] sm:$0xff] %vm1358_vm6, %v1357_v15 }
 0x172   : > { %v1343_v16 = vsel %vm1341_vm11, -1e+09, %v4422_v14  ;;  %vm1342_vm13 = vmor %vm1334_vm5, %vm1340_vm8  ;;  %1361 = vst.msk [vmem:[#allocation3 + $0x8] sm:$0x1] %vm1360_vm7, %v1357_v15 }
 0x173   : > { %1346 = vst.msk [vmem:[#allocation2] sm:$0xff] %vm1345_vm9, %v1343_v16  ;;  %v1344_v17 = vsel %vm1342_vm13, -1e+09, %v4422_v14 }
 0x174   : > { %1348 = vst.msk [vmem:[#allocation2 + $0x8] sm:$0x1] %vm1347_vm12, %v1344_v17 }
 0x175 PF: > { %v3973_v18 = vld [vmem:[%s5011_s10] sm:$0xff]   ;;  %v4423_v19 = vmov 0.0   ;;  %v3974_v20 = vld [vmem:[%s5011_s10 + $0x8] sm:$0xff]   ;;  %vm4424_vm14 = vmmov 0   ;;  %vm1394_vm15 = vcmask 261120   ;;  %s5673_s10 = scalar_lea.vmem [#allocation10], %s4968_s30 }
 0x176   : > { %3665 = vmatprep.subr.bf16.mxu1 %v4423_v19  ;;  %3679 = vmatprep.subr.bf16.mxu0 %v4423_v19  ;;  %v3546_v24 = vld [vmem:[%s5673_s10] ss:$0 sm:$0xff]  ;;  %s4425_s5 = smov 120   ;;  %s4426_s0 = smov 96   ;;  %vm1443_vm0 = vcmask 64512   ;;  %vm1495_vm1 = vcmask 72704  }
 0x177   : > { %3666 = vmatpush3.bf16.msra.mxu1 %v3973_v18  ;;  %3669 = vmatprep.mubr.msk.bf16.mxu1 %vm4424_vm14, %v4423_v19  ;;  %v5091_v21 = vld [vmem:[%s5075_s6] sm:$0xff]  ;;  %s4427_s15 = smov 80   ;;  %s4428_s27 = smov 88   ;;  %vm1499_vm2 = vcmask 65536   ;;  %vm1525_vm3 = vcmask 1043456   ;;  %vm1526_vm4 = vcmask 1044480  }
 0x178   : > { %v5094_v22 = vld [vmem:[%s5075_s6 + $0x8] sm:$0x1]  ;;  %3667 = vmatprep.subr.bf16.mxu1 %v4423_v19  ;;  %3681 = vmatprep.mubr.msk.bf16.mxu0 %vm4424_vm14, %v4423_v19  ;;  %s4429_s17 = smov 72   ;;  %s4430_s4 = smov 112   ;;  %vm1574_vm5 = vcmask 57344   ;;  %vm1711_vm6 = vcmask 130112  }
 0x179   : > { %v1370_v23 = vpack.c.bf16 %v5094_v22, %v5091_v21  ;;  %s4431_s28 = smov 104   ;;  %s4432_s3 = smov 64   ;;  %vm1713_vm7 = vcmask 122944   ;;  %vm1850_vm8 = vcmask 195712   ;;  %vm1852_vm9 = vcmask 188544  }
 0x17a   : > { %v1366_v44 = vld [vmem:[#allocation2] sm:$0xff]  ;;  %s4433_s29 = smov 56   ;;  %s4434_s7 = smov 48   ;;  %vm1989_vm10 = vcmask 261312   ;;  %vm1991_vm11 = vcmask 254144   ;;  %vm2070_vm12 = vcmask 253952  }
 0x17b   : > { %3668 = vmatpush3.bf16.msra.mxu1 %v3974_v20  ;;  %v1367_v48 = vld [vmem:[#allocation2 + $0x8] sm:$0x1]  ;;  %s4435_s8 = smov 40   ;;  %s4437_s25 = smov 8   ;;  %vm3026_vm13 = vcmask 523264  }
 0x17c   : > { %3673 = vmatprep.subr.bf16.mxu1 %v4423_v19  ;;  %s4438_s13 = smov 16   ;;  %s4439_s20 = smov 24  }
 0x17d   : > { %s5675_s18 = sld [smem:[#allocation40_spill]]  ;;  %s5676_s21 = sld [smem:[#allocation39_spill]] }
 0x17e   : > { %3670 = vmatmul.mubr.msk.bf16.vlgmr.msra.gmra.mrb[0].mxu1 %vm1394_vm15, %v1370_v23  ;;  %s5677_s2 = sld [smem:[#allocation38_spill]]  ;;  %s5679_s23 = scalar_lea.vmem [#allocation15], %s4968_s30 }
 0x17f   : > { %3675 = vmatprep.mubr.msk.bf16.mxu1 %vm4424_vm14, %v4423_v19  ;;  %s5680_s10 = sld [smem:[#allocation56_spill]] }
 0x251   : > { %v1432_v25 = vpop.f32.mrb[0].mxu1 }
 0x252   : > { %v3671_v26 = vpop.f32.mrb[1].mxu1  ;;  %v1433_v28 = vadd.f32 %v3546_v24, %v1432_v25 }
 0x253   : > { %v1435_v27 = vpop.f32.mrb[2].mxu1 }
 0x254   : > { %v1436_v29 = vadd.f32 %v3546_v24, %v1435_v27  ;;  %v3672_v30 = vpop.f32.mrb[3].mxu1 }
 0x256   : > { %v5107_v31 = vpack.c.bf16 %v1436_v29, %v1433_v28 }
 0x258   : > { %1576 = vrot.lane.b32.xlu1 %v5107_v31, %s4425_s5  ;;  %1441 = vrot.lane.b32.xlu0 %v5107_v31, %s4426_s0 }
 0x25c   : > { %1717 = vrot.lane.b32.xlu1 %v5107_v31, %s4427_s15  ;;  %1578 = vrot.lane.b32.xlu0 %v5107_v31, %s4428_s27 }
 0x260   : > { %1856 = vrot.lane.b32.xlu1 %v5107_v31, %s4429_s17  ;;  %1715 = vrot.lane.b32.xlu0 %v5107_v31, %s4430_s4 }
 0x264   : > { %1854 = vrot.lane.b32.xlu0 %v5107_v31, %s4431_s28 }
 0x2ca   : > { %v1442_v32 = vpop.permute.xlu0 %1441  ;;  %v1577_v35 = vpop.permute.xlu1 %1576 }
 0x2cb   : > { %v1448_v33 = vsel %vm1443_vm0, %v1442_v32, 0 }
 0x2cc   : > { %3674 = vmatpush3.bf16.xpose.msra.mxu1 %v1448_v33 }
 0x2cd   : > { %3685 = vmatprep.subr.bf16.mxu1 %v4423_v19 }
 0x2ce   : > { %v1579_v34 = vpop.permute.xlu0 %1578  ;;  %v1718_v37 = vpop.permute.xlu1 %1717 }
 0x2cf   : > { %v1584_v36 = vsel %vm1443_vm0, %v1579_v34, 0  ;;  %v1723_v38 = vsel %vm1443_vm0, %v1718_v37, 0 }
 0x2d2   : > { %v1857_v39 = vpop.permute.xlu1 %1856  ;;  %v1716_v40 = vpop.permute.xlu0 %1715 }
 0x2d3   : > { %3676 = vmatmul.mubr.msk.bf16.vlgmr.msra.gmra.mrb[4].mxu1 %vm1443_vm0, %v5107_v31  ;;  %v1862_v41 = vsel %vm1443_vm0, %v1857_v39, 0 }
 0x2d4   : > { %3686 = vmatpush3.bf16.xpose.msra.mxu1 %v1584_v36  ;;  %3687 = vmatprep.mubr.msk.bf16.mxu1 %vm4424_vm14, %v4423_v19 }
 0x2d5   : > { %3697 = vmatprep.subr.bf16.mxu1 %v4423_v19 }
 0x2d6   : > { %v1855_v42 = vpop.permute.xlu0 %1854 }
 0x2db   : > { %3688 = vmatmul.mubr.msk.bf16.vlgmr.msra.gmra.mrb[8].mxu1 %vm1443_vm0, %v1577_v35 }
 0x2dc   : > { %3698 = vmatpush3.bf16.xpose.msra.mxu1 %v1723_v38  ;;  %3699 = vmatprep.mubr.msk.bf16.mxu1 %vm4424_vm14, %v4423_v19 }
 0x2dd   : > { %3709 = vmatprep.subr.bf16.mxu1 %v4423_v19 }
 0x2e3   : > { %3700 = vmatmul.mubr.msk.bf16.vlgmr.msra.gmra.mrb[12].mxu1 %vm1443_vm0, %v1716_v40 }
 0x2e4   : > { %3710 = vmatpush3.bf16.xpose.msra.mxu1 %v1862_v41  ;;  %3711 = vmatprep.mubr.msk.bf16.mxu1 %vm4424_vm14, %v4423_v19 }
 0x2e5   : > { %3721 = vmatprep.subr.bf16.mxu1 %v4423_v19 }
 0x2eb   : > { %3712 = vmatmul.mubr.msk.bf16.vlgmr.msra.gmra.mrb[16].mxu1 %vm1443_vm0, %v1855_v42 }
 0x2ec   : > { %3725 = vmatprep.mubr.msk.bf16.mxu1 %vm4424_vm14, %v4423_v19 }
 0x3a6   : > { %v1484_v43 = vpop.f32.mrb[4].mxu1 }
 0x3a7   : > { %v1491_v45 = vmul.f32 0.35355338, %v1484_v43  ;;  %v3677_v46 = vpop.f32.mrb[5].mxu1 }
 0x3a8   : > { %v1487_v47 = vpop.f32.mrb[6].mxu1 }
 0x3a9   : > { %v1492_v49 = vmul.f32 0.35355338, %v1487_v47  ;;  %v3678_v50 = vpop.f32.mrb[7].mxu1  ;;  %v1493_v51 = vadd.f32 %v1491_v45, %v1366_v44 }
 0x3ab   : > { %v1496_v52 = vsel %vm1495_vm1, %v1493_v51, -inf  ;;  %v1494_v53 = vadd.f32 %v1492_v49, %v1367_v48 }
 0x3ac   : > { %1497 = vmax.xlane.f32.xlu1 %v1496_v52 }
 0x3ad   : > { %v1500_v54 = vsel %vm1499_vm2, %v1494_v53, -inf }
 0x3ae   : > { %1501 = vmax.xlane.f32.xlu0 %v1500_v54  ;;  %v1620_v55 = vpop.f32.mrb[8].mxu1 }
 0x3af   : > { %v1627_v56 = vmul.f32 0.35355338, %v1620_v55  ;;  %v3689_v57 = vpop.f32.mrb[9].mxu1 }
 0x3b0   : > { %v1623_v58 = vpop.f32.mrb[10].mxu1 }
 0x3b1   : > { %v1628_v59 = vmul.f32 0.35355338, %v1623_v58  ;;  %v3690_v60 = vpop.f32.mrb[11].mxu1  ;;  %v5146_v61 = vadd.f32 %v1627_v56, %v1366_v44 }
 0x3b3   : > { %v1631_v62 = vsel %vm1495_vm1, %v5146_v61, -inf  ;;  %v1630_v63 = vadd.f32 %v1628_v59, %v1367_v48 }
 0x3b4   : > { %1632 = vmax.xlane.f32.xlu0 %v1631_v62 }
 0x3b5   : > { %v1634_v0 = vsel %vm1499_vm2, %v1630_v63, -inf }
 0x3b6   : > { %1635 = vmax.xlane.f32.xlu1 %v1634_v0  ;;  %v1759_v1 = vpop.f32.mrb[12].mxu1 }
 0x3b7   : > { %v1766_v2 = vmul.f32 0.35355338, %v1759_v1  ;;  %v3701_v3 = vpop.f32.mrb[13].mxu1 }
 0x3b8   : > { %v1762_v4 = vpop.f32.mrb[14].mxu1 }
 0x3b9   : > { %v1767_v5 = vmul.f32 0.35355338, %v1762_v4  ;;  %v3702_v6 = vpop.f32.mrb[15].mxu1  ;;  %v5151_v7 = vadd.f32 %v1766_v2, %v1366_v44 }
 0x3bb   : > { %v1770_v8 = vsel %vm1495_vm1, %v5151_v7, -inf  ;;  %v1769_v9 = vadd.f32 %v1767_v5, %v1367_v48 }
 0x3bc   : > { %1771 = vmax.xlane.f32.xlu0 %v1770_v8 }
 0x3bd   : > { %v1773_v10 = vsel %vm1499_vm2, %v1769_v9, -inf }
 0x3be   : > { %1774 = vmax.xlane.f32.xlu1 %v1773_v10  ;;  %v1898_v11 = vpop.f32.mrb[16].mxu1 }
 0x3bf   : > { %v1905_v12 = vmul.f32 0.35355338, %v1898_v11  ;;  %v3713_v13 = vpop.f32.mrb[17].mxu1 }
 0x3c0   : > { %v1901_v14 = vpop.f32.mrb[18].mxu1 }
 0x3c1   : > { %v1906_v15 = vmul.f32 0.35355338, %v1901_v14  ;;  %v3714_v16 = vpop.f32.mrb[19].mxu1  ;;  %v1907_v17 = vadd.f32 %v1905_v12, %v1366_v44 }
 0x3c3   : > { %v1909_v18 = vsel %vm1495_vm1, %v1907_v17, -inf  ;;  %v1908_v20 = vadd.f32 %v1906_v15, %v1367_v48 }
 0x3c4   : > { %1910 = vmax.xlane.f32.xlu0 %v1909_v18 }
 0x3c5   : > { %v1912_v23 = vsel %vm1499_vm2, %v1908_v20, -inf }
 0x3c6   : > { %1913 = vmax.xlane.f32.xlu1 %v1912_v23 }
 0x439   : > { %v1498_v24 = vpop.xlane.xlu1 %1497 }
 0x43a   : > { %v1503_v25 = vsub.f32 %v1493_v51, %v1498_v24 }
 0x43b   : > { %v1502_v26 = vpop.xlane.xlu0 %1501 }
 0x43c   : > { %v1505_v27 = vmul.f32 1.442695, %v1503_v25  ;;  %v1504_v28 = vsub.f32 %v1494_v53, %v1502_v26 }
 0x43e   : > { %3989 = vpow2.f32 %v1505_v27  ;;  %v1507_v29 = vmul.f32 1.442695, %v1504_v28 }
 0x440   : > { %3991 = vpow2.f32 %v1507_v29 }
 0x441   : > { %v1633_v35 = vpop.xlane.xlu0 %1632 }
 0x442   : > { %v1637_v57 = vsub.f32 %v5146_v61, %v1633_v35  ;;  %v4436_v61 = vmov 65535  }
 0x443   : > { %v1636_v30 = vpop.xlane.xlu1 %1635  ;;  %v1527_v2 = vsel %vm1525_vm3, 4294967295, %v4436_v61 }
 0x444   : > { %v1638_v32 = vsub.f32 %v1630_v63, %v1636_v30  ;;  %v1639_v58 = vmul.f32 1.442695, %v1637_v57  ;;  %v1528_v5 = vsel %vm1526_vm4, %v1527_v2, 0 }
 0x446   : > { %v1641_v33 = vmul.f32 1.442695, %v1638_v32 }
 0x448   : > { %v5158_v34 = vpop.eup %3989  ;;  %3993 = vpow2.f32 %v1641_v33 }
 0x449   : > { %v1509_v36 = vsel %vm1495_vm1, %v5158_v34, 0.0  ;;  %v1772_v41 = vpop.xlane.xlu0 %1771 }
 0x44a   : > { %v5162_v37 = vpop.eup %3991  ;;  %1510 = vadd.xlane.f32.xlu0 %v1509_v36  ;;  %v1776_v59 = vsub.f32 %v5151_v7, %v1772_v41 }
 0x44b   : > { %v1775_v38 = vpop.xlane.xlu1 %1774  ;;  %v1512_v39 = vsel %vm1499_vm2, %v5162_v37, 0.0 }
 0x44c   : > { %v1777_v40 = vsub.f32 %v1769_v9, %v1775_v38  ;;  %1513 = vadd.xlane.f32.xlu1 %v1512_v39  ;;  %v1778_v60 = vmul.f32 1.442695, %v1776_v59 }
 0x44e   : > { %v1780_v42 = vmul.f32 1.442695, %v1777_v40 }
 0x450   : > { %3995 = vpow2.f32 %v1780_v42 }
 0x451   : > { %v1911_v43 = vpop.xlane.xlu0 %1910 }
 0x452   : > { %v5166_v44 = vpop.eup %3993  ;;  %v1915_v45 = vsub.f32 %v1907_v17, %v1911_v43 }
 0x453   : > { %v1914_v46 = vpop.xlane.xlu1 %1913  ;;  %v1646_v47 = vsel %vm1499_vm2, %v5166_v44, 0.0 }
 0x454   : > { %v1917_v48 = vmul.f32 1.442695, %v1915_v45  ;;  %v1916_v49 = vsub.f32 %v1908_v20, %v1914_v46  ;;  %1647 = vadd.xlane.f32.xlu1 %v1646_v47 }
 0x456   : > { %3997 = vpow2.f32 %v1917_v48  ;;  %v1919_v50 = vmul.f32 1.442695, %v1916_v49 }
 0x458   : > { %3999 = vpow2.f32 %v1919_v50 }
 0x459   : > { %4001 = vpow2.f32 %v1639_v58 }
 0x45a   : > { %v5170_v51 = vpop.eup %3995  ;;  %4003 = vpow2.f32 %v1778_v60 }
 0x45b   : > { %v1785_v52 = vsel %vm1499_vm2, %v5170_v51, 0.0 }
 0x45c   : > { %1786 = vadd.xlane.f32.xlu1 %v1785_v52 }
 0x460   : > { %v5174_v53 = vpop.eup %3997  ;;  %1520 = vrot.lane.b32.xlu0 %v5107_v31, %s4432_s3  ;;  %s5681_s3 = scalar_lea.vmem %s5680_s10, %s4993_s24 }
 0x461   : > { %v1921_v54 = vsel %vm1495_vm1, %v5174_v53, 0.0 }
 0x462   : > { %v5179_v55 = vpop.eup %3999  ;;  %1922 = vadd.xlane.f32.xlu1 %v1921_v54 }
 0x463   : > { %v1924_v56 = vsel %vm1499_vm2, %v5179_v55, 0.0  ;;  %v4002_v62 = vpop.eup %4001 }
 0x464   : > { %v1643_v63 = vsel %vm1495_vm1, %v4002_v62, 0.0  ;;  %v4004_v0 = vpop.eup %4003 }
 0x465   : > { %v1782_v1 = vsel %vm1495_vm1, %v4004_v0, 0.0 }
 0x466   : > { %1925 = vadd.xlane.f32.xlu1 %v1924_v56 }
 0x477   : > { %1654 = vrot.lane.b32.xlu1 %v5107_v31, %s4433_s29  ;;  %s5682_s29 = scalar_lea.vmem [#allocation16], %s4968_s30 }
 0x47f   : > { %1644 = vadd.xlane.f32.xlu0 %v1643_v63 }
 0x483   : > { %1783 = vadd.xlane.f32.xlu0 %v1782_v1 }
 0x499   : > { %1793 = vrot.lane.b32.xlu0 %v5107_v31, %s4434_s7 }
 0x49d   : > { %1932 = vrot.lane.b32.xlu0 %v5107_v31, %s4435_s8 }
 0x4d7   : > { %v1511_v3 = vpop.xlane.xlu0 %1510 }
 0x4d8   : > { %4005 = vrcp.f32 %v1511_v3 }
 0x4d9   : > { %v1514_v4 = vpop.xlane.xlu1 %1513 }
 0x4da   : > { %4007 = vrcp.f32 %v1514_v4 }
 0x4db   : > { %v1521_v6 = vpop.permute.xlu0 %1520 }
 0x4dc   : > { %v1530_v7 = vand.u32 %v1528_v5, %v1521_v6 }
 0x4de   : > { %3680 = vmatpush3.bf16.msra.mxu0 %v1530_v7 }
 0x4df   : > { %3691 = vmatprep.subr.bf16.mxu0 %v4423_v19 }
 0x4e1   : > { %v1648_v11 = vpop.xlane.xlu1 %1647 }
 0x4e2   : > { %v4006_v8 = vpop.eup %4005  ;;  %4009 = vrcp.f32 %v1648_v11 }
 0x4e3   : > { %v1517_v10 = vmul.f32 %v4006_v8, %v5158_v34 }
 0x4e4   : > { %v4008_v9 = vpop.eup %4007 }
 0x4e5   : > { %v1518_v31 = vmul.f32 %v4008_v9, %v5162_v37 }
 0x4e7   : > { %v1519_v12 = vpack.c.bf16 %v1518_v31, %v1517_v10 }
 0x4e9   : > { %3682 = vmatmul.mubr.msk.bf16.vlgmr.msra.gmra.mrb[0].mxu0 %vm1495_vm1, %v1519_v12  ;;  %v1787_v13 = vpop.xlane.xlu1 %1786 }
 0x4ea   : > { %3693 = vmatprep.mubr.msk.bf16.mxu0 %vm4424_vm14, %v4423_v19 }
 0x4ec   : > { %v4010_v23 = vpop.eup %4009 }
 0x4ed   : > { %v1652_v25 = vmul.f32 %v4010_v23, %v5166_v44 }
 0x4ef   : > { %v1923_v14 = vpop.xlane.xlu1 %1922 }
 0x4f3   : > { %v1926_v15 = vpop.xlane.xlu1 %1925 }
 0x4f7   : > { %v1655_v16 = vpop.permute.xlu1 %1654 }
 0x4f8   : > { %v1660_v17 = vand.u32 %v1655_v16, %v1528_v5  ;;  %v4440_v16 = vmov 0  }
 0x4f9   : > { %3971 = vset.pattern.permute.xlu0 %v4440_v16  ;;  %3972 = vset.pattern.permute.xlu1 %v4440_v16 }
 0x4fa   : > { %3692 = vmatpush3.bf16.msra.mxu0 %v1660_v17 }
 0x4fb   : > { %3703 = vmatprep.subr.bf16.mxu0 %v4423_v19 }
 0x50c   : > { %v1645_v18 = vpop.xlane.xlu0 %1644 }
 0x50d   : > { %4011 = vrcp.f32 %v1645_v18 }
 0x510   : > { %v1784_v20 = vpop.xlane.xlu0 %1783 }
 0x511   : > { %4013 = vrcp.f32 %v1784_v20 }
 0x512   : > { %4015 = vrcp.f32 %v1787_v13 }
 0x513   : > { %4017 = vrcp.f32 %v1926_v15 }
 0x514   : > { %v1794_v27 = vpop.permute.xlu0 %1793  ;;  %4019 = vrcp.f32 %v1923_v14 }
 0x515   : > { %v1799_v30 = vand.u32 %v1794_v27, %v1528_v5 }
 0x517   : > { %v4012_v24 = vpop.eup %4011 }
 0x518   : > { %v1651_v26 = vmul.f32 %v4012_v24, %v4002_v62  ;;  %v1933_v35 = vpop.permute.xlu0 %1932 }
 0x519   : > { %v1938_v38 = vand.u32 %v1933_v35, %v1528_v5  ;;  %v3980_v35 = vld [vmem:[%s5676_s21 + $0x8] sm:$0xff]  }
 0x51a   : > { %v1653_v28 = vpack.c.bf16 %v1652_v25, %v1651_v26 }
 0x51b   : > { %v4014_v29 = vpop.eup %4013 }
 0x51c   : > { %3694 = vmatmul.mubr.msk.bf16.vlgmr.msra.gmra.mrb[4].mxu0 %vm1495_vm1, %v1653_v28  ;;  %v4016_v32 = vpop.eup %4015  ;;  %v1790_v33 = vmul.f32 %v4014_v29, %v4004_v0  ;;  %v1365_v28 = vld [vmem:[%s5001_s19 + $0x8] sm:$0x1]  ;;  %v1364_v29 = vld [vmem:[%s5001_s19] sm:$0xff]  ;;  %s5678_s19 = scalar_lea.vmem [#allocation13], %s4968_s30 }
 0x51d   : > { %3704 = vmatpush3.bf16.msra.mxu0 %v1799_v30  ;;  %3705 = vmatprep.mubr.msk.bf16.mxu0 %vm4424_vm14, %v4423_v19  ;;  %v1791_v34 = vmul.f32 %v4016_v32, %v5170_v51  ;;  %v4018_v37 = vpop.eup %4017  ;;  %v3975_v51 = vld [vmem:[%s5016_s12] sm:$0xff]  }
 0x51e   : > { %3715 = vmatprep.subr.bf16.mxu0 %v4423_v19  ;;  %v4020_v39 = vpop.eup %4019  ;;  %v1930_v40 = vmul.f32 %v4018_v37, %v5179_v55  ;;  %3722 = vmatpush3.bf16.msra.mxu1 %v3975_v51  ;;  %v3977_v30 = vld [vmem:[%s5675_s18] sm:$0xff]  }
 0x51f   : > { %v1792_v36 = vpack.c.bf16 %v1791_v34, %v1790_v33  ;;  %v1929_v41 = vmul.f32 %v4020_v39, %v5174_v53  ;;  %v3976_v53 = vld [vmem:[%s5016_s12 + $0x8] sm:$0xff]   ;;  %3723 = vmatprep.subr.bf16.mxu1 %v4423_v19  ;;  %s5674_s12 = scalar_lea.vmem [#allocation12], %s4968_s30  ;;  %v3979_v32 = vld [vmem:[%s5676_s21] sm:$0xff]   ;;  %s5683_s30 = sld [smem:[#allocation41_spill]] }
 0x520   : > { %v3558_v6 = vld [vmem:[%s5674_s12] ss:$0 sm:$0xff]  ;;  %v3978_v33 = vld [vmem:[%s5675_s18 + $0x8] sm:$0xff]   ;;  %s5690_s18 = sld [smem:[#allocation62_spill]] }
 0x521   : > { %v1931_v42 = vpack.c.bf16 %v1930_v40, %v1929_v41  ;;  %v2123_v34 = vld [vmem:[%s5677_s2] sm:$0xf] }
 0x522   : > { %3724 = vmatpush3.bf16.msra.mxu1 %v3976_v53 }
 0x523   : > { %3737 = vmatprep.subr.bf16.mxu1 %v4423_v19 }
 0x524   : > { %3706 = vmatmul.mubr.msk.bf16.vlgmr.msra.gmra.mrb[8].mxu0 %vm1495_vm1, %v1792_v36 }
 0x525   : > { %3716 = vmatpush3.bf16.msra.mxu0 %v1938_v38  ;;  %3717 = vmatprep.mubr.msk.bf16.mxu0 %vm4424_vm14, %v4423_v19 }
 0x526   : > { %3729 = vmatprep.subr.bf16.mxu0 %v4423_v19  ;;  %s5691_s21 = scalar_lea.vmem %s5690_s18, %s4993_s24 }
 0x52c   : > { %3718 = vmatmul.mubr.msk.bf16.vlgmr.msra.gmra.mrb[12].mxu0 %vm1495_vm1, %v1931_v42 }
 0x52d   : > { %3733 = vmatprep.mubr.msk.bf16.mxu0 %vm4424_vm14, %v4423_v19  ;;  %3730 = vmatpush3.bf16.msra.mxu0 %v3979_v32 }
 0x52e   : > { %3731 = vmatprep.subr.bf16.mxu0 %v4423_v19 }
 0x531   : > { %3732 = vmatpush3.bf16.msra.mxu0 %v3980_v35 }
 0x532   : > { %3745 = vmatprep.subr.bf16.mxu0 %v4423_v19 }
 0x5bc   : > { %v1566_v43 = vpop.f32.mrb[0].mxu0 }
 0x5bd   : > { %1573 = vst.msk [vmem:[#allocation4] sm:$0xff] %vm1443_vm0, %v1566_v43  ;;  %v3683_v44 = vpop.f32.mrb[1].mxu0  ;;  %v3562_v43 = vld [vmem:[%s5678_s19] ss:$0 sm:$0xff] }
 0x5be   : > { %v1569_v45 = vpop.f32.mrb[2].mxu0 }
 0x5bf   : > { %1575 = vst.msk [vmem:[#allocation4 + $0x8] sm:$0x1] %vm1574_vm5, %v1569_v45  ;;  %v3684_v46 = vpop.f32.mrb[3].mxu0 }
 0x5c0   : > { %v3563_v46 = vld [vmem:[%s5679_s23] ss:$0 sm:$0xff] }
 0x5ef   : > { %v1696_v47 = vpop.f32.mrb[4].mxu0 }
 0x5f0   : > { %1705 = vrot.lane.b32.xlu1 %v1696_v47, %s4437_s25  ;;  %v3695_v48 = vpop.f32.mrb[5].mxu0 }
 0x5f1   : > { %v1699_v49 = vpop.f32.mrb[6].mxu0 }
 0x5f2   : > { %1707 = vrot.lane.b32.xlu0 %v1699_v49, %s4437_s25  ;;  %v3696_v50 = vpop.f32.mrb[7].mxu0 }
 0x5f7   : > { %v1835_v52 = vpop.f32.mrb[8].mxu0 }
 0x5f8   : > { %1844 = vrot.lane.b32.xlu1 %v1835_v52, %s4438_s13  ;;  %v3707_v54 = vpop.f32.mrb[9].mxu0 }
 0x5f9   : > { %v1838_v55 = vpop.f32.mrb[10].mxu0 }
 0x5fa   : > { %1846 = vrot.lane.b32.xlu0 %v1838_v55, %s4438_s13  ;;  %v3708_v56 = vpop.f32.mrb[11].mxu0 }
 0x5ff   : > { %v1974_v57 = vpop.f32.mrb[12].mxu0 }
 0x600   : > { %1983 = vrot.lane.b32.xlu1 %v1974_v57, %s4439_s20  ;;  %v3719_v58 = vpop.f32.mrb[13].mxu0  ;;  %v3568_v57 = vld [vmem:[%s5681_s3] ss:$0 sm:$0xff] }
 0x601   : > { %v1977_v59 = vpop.f32.mrb[14].mxu0 }
 0x602   : > { %1985 = vrot.lane.b32.xlu0 %v1977_v59, %s4439_s20  ;;  %v3720_v60 = vpop.f32.mrb[15].mxu0 }
 0x662   : > { %v1706_v62 = vpop.permute.xlu1 %1705 }
 0x663   : > { %1712 = vst.msk [vmem:[#allocation4] sm:$0xff] %vm1711_vm6, %v1706_v62 }
 0x664   : > { %v1708_v63 = vpop.permute.xlu0 %1707 }
 0x665   : > { %1714 = vst.msk [vmem:[#allocation4 + $0x8] sm:$0x1] %vm1713_vm7, %v1708_v63 }
 0x66a   : > { %v1845_v0 = vpop.permute.xlu1 %1844 }
 0x66b   : > { %1851 = vst.msk [vmem:[#allocation4] sm:$0xff] %vm1850_vm8, %v1845_v0 }
 0x66c   : > { %v1847_v1 = vpop.permute.xlu0 %1846 }
 0x66d   : > { %1853 = vst.msk [vmem:[#allocation4 + $0x8] sm:$0x1] %vm1852_vm9, %v1847_v1 }
 0x672   : > { %v1984_v61 = vpop.permute.xlu1 %1983 }
 0x673   : > { %1990 = vst.msk [vmem:[#allocation4] sm:$0xff] %vm1989_vm10, %v1984_v61  ;;  %v3564_v61 = vld [vmem:[%s5682_s29] ss:$0 sm:$0xff] }
 0x674   : > { %v1986_v2 = vpop.permute.xlu0 %1985 }
 0x675   : > { %1992 = vst.msk [vmem:[#allocation4 + $0x8] sm:$0x1] %vm1991_vm11, %v1986_v2 }
 0x67a   : > { %v1993_v3 = vld [vmem:[#allocation4] sm:$0xff] }
 0x67c   : > { %v1994_v4 = vld [vmem:[#allocation4 + $0x8] sm:$0x1] }
 0x67d   : > { %v1995_v5 = vpack.c.bf16 %v1994_v4, %v1993_v3 }
 0x67f   : > { %3726 = vmatmul.mubr.msk.bf16.vlgmr.msra.gmra.mrb[20].mxu1 %vm1394_vm15, %v1995_v5 }
 0x680   : > { %3741 = vmatprep.mubr.msk.bf16.mxu1 %vm4424_vm14, %v4423_v19  ;;  %3738 = vmatpush3.bf16.msra.mxu1 %v3977_v30 }
 0x681   : > { %3739 = vmatprep.subr.bf16.mxu1 %v4423_v19 }
 0x684   : > { %3740 = vmatpush3.bf16.msra.mxu1 %v3978_v33 }
 0x685   : > { %3751 = vmatprep.subr.bf16.mxu1 %v4423_v19 }
 0x687   : > { %3742 = vmatmul.mubr.msk.bf16.vlgmr.msra.gmra.mrb[24].mxu1 %vm1394_vm15, %v2123_v34 }
 0x688   : > { %3753 = vmatprep.mubr.msk.bf16.mxu1 %vm4424_vm14, %v4423_v19 }
 0x752   : > { %v2056_v7 = vpop.f32.mrb[20].mxu1 }
 0x753   : > { %v2057_v8 = vadd.f32 %v3558_v6, %v2056_v7  ;;  %v3727_v9 = vpop.f32.mrb[21].mxu1 }
 0x754   : > { %v2059_v10 = vpop.f32.mrb[22].mxu1 }
 0x755   : > { %v2060_v31 = vadd.f32 %v3558_v6, %v2059_v10  ;;  %v3728_v11 = vpop.f32.mrb[23].mxu1  ;;  %v2063_v12 = vadd.f32 %v2057_v8, %v5091_v21 }
 0x757   : > { %v2067_v13 = vsel %vm1394_vm15, %v2063_v12, 0.0  ;;  %v2064_v14 = vadd.f32 %v2060_v31, %v5094_v22 }
 0x758   : > { %2068 = vadd.xlane.f32.xlu1 %v2067_v13 }
 0x759   : > { %v2071_v15 = vsel %vm2070_vm12, %v2064_v14, 0.0 }
 0x75a   : > { %2072 = vadd.xlane.f32.xlu0 %v2071_v15  ;;  %v2252_v58 = vpop.f32.mrb[24].mxu1 }
 0x75b   : > { %v2253_v59 = vadd.f32 %v3568_v57, %v2252_v58  ;;  %v3743_v60 = vpop.f32.mrb[25].mxu1 }
 0x75c   : > { %v2255_v62 = vpop.f32.mrb[26].mxu1 }
 0x75d   : > { %v5280_v63 = vpack.c.bf16 %v2253_v59, %v2253_v59  ;;  %v3744_v0 = vpop.f32.mrb[27].mxu1 }
 0x75f   : > { %v2264_v1 = vsel %vm1443_vm0, %v5280_v63, 0 }
 0x7e5   : > { %v2069_v17 = vpop.xlane.xlu1 %2068 }
 0x7e6   : > { %v2075_v18 = vmul.f32 0.03125, %v2069_v17 }
 0x7e7   : > { %v2073_v20 = vpop.xlane.xlu0 %2072 }
 0x7e8   : > { %v2077_v21 = vsub.f32 %v2063_v12, %v2075_v18  ;;  %v2076_v23 = vmul.f32 0.03125, %v2073_v20  ;;  %v1368_v18 = vld [vmem:[#allocation3] sm:$0xff] }
 0x7ea   : > { %v2078_v24 = vsub.f32 %v2064_v14, %v2076_v23  ;;  %v2079_v25 = vmul.f32 %v2077_v21, %v2077_v21 }
 0x7ec   : > { %v2081_v22 = vsel %vm1394_vm15, %v2079_v25, 0.0  ;;  %v2080_v26 = vmul.f32 %v2078_v24, %v2078_v24 }
 0x7ed   : > { %2082 = vadd.xlane.f32.xlu0 %v2081_v22 }
 0x7ee   : > { %v2084_v27 = vsel %vm2070_vm12, %v2080_v26, 0.0 }
 0x7ef   : > { %2085 = vadd.xlane.f32.xlu1 %v2084_v27 }
 0x800   : > { %2118 = vperm.xlu1 %3972, %v1365_v28  }
 0x803   : > { %2113 = vperm.xlu0 %3971, %v1364_v29  }
 0x804   : > { %2389 = vrot.lane.b32.xlu1 %v5280_v63, %s4425_s5 }
 0x808   : > { %2526 = vrot.lane.b32.xlu1 %v5280_v63, %s4430_s4 }
 0x87a   : > { %v2083_v36 = vpop.xlane.xlu0 %2082 }
 0x87b   : > { %v2087_v37 = vmul.f32 0.03125, %v2083_v36 }
 0x87c   : > { %v2086_v38 = vpop.xlane.xlu1 %2085 }
 0x87d   : > { %v2089_v39 = vadd.f32 1e-05, %v2087_v37  ;;  %v2088_v40 = vmul.f32 0.03125, %v2086_v38 }
 0x87f   : > { %4021 = vrsqrt.f32 %v2089_v39  ;;  %v2090_v41 = vadd.f32 1e-05, %v2088_v40 }
 0x880   : > { %v5262_v52 = vpop.permute.xlu1 %2118 }
 0x881   : > { %4023 = vrsqrt.f32 %v2090_v41 }
 0x882   : > { %v5260_v51 = vpop.permute.xlu0 %2113 }
 0x884   : > { %v2390_v8 = vpop.permute.xlu1 %2389 }
 0x885   : > { %v2395_v10 = vsel %vm1443_vm0, %v2390_v8, 0 }
 0x888   : > { %v2527_v31 = vpop.permute.xlu1 %2526 }
 0x889   : > { %v4022_v42 = vpop.eup %4021  ;;  %v2532_v12 = vsel %vm1443_vm0, %v2527_v31, 0 }
 0x88a   : > { %v2093_v44 = vmul.f32 %v4022_v42, %v2077_v21 }
 0x88b   : > { %v4024_v45 = vpop.eup %4023 }
 0x88c   : > { %v2101_v47 = vmul.f32 %v3562_v43, %v2093_v44  ;;  %v2094_v48 = vmul.f32 %v4024_v45, %v2078_v24  ;;  %v1369_v24 = vld [vmem:[#allocation3 + $0x8] sm:$0x1] }
 0x88e   : > { %v2109_v49 = vadd.f32 %v3563_v46, %v2101_v47  ;;  %v2102_v50 = vmul.f32 %v3562_v43, %v2094_v48 }
 0x890   : > { %v2110_v53 = vadd.f32 %v3563_v46, %v2102_v50  ;;  %v5265_v54 = vmul.f32 %v5260_v51, %v2109_v49 }
 0x892   : > { %v5268_v55 = vmul.f32 %v5262_v52, %v2110_v53 }
 0x894   : > { %v2124_v56 = vpack.c.bf16 %v5268_v55, %v5265_v54 }
 0x896   : > { %3734 = vmatmul.mubr.msk.bf16.vlgmr.msra.gmra.mrb[16].mxu0 %vm1394_vm15, %v2124_v56 }
 0x897   : > { %3747 = vmatprep.mubr.msk.bf16.mxu0 %vm4424_vm14, %v4423_v19  ;;  %3746 = vmatpush3.bf16.xpose.msra.mxu0 %v2264_v1 }
 0x898   : > { %3757 = vmatprep.subr.bf16.mxu0 %v4423_v19 }
 0x969   : > { %v2185_v2 = vpop.f32.mrb[16].mxu0 }
 0x96a   : > { %v3735_v3 = vpop.f32.mrb[17].mxu0  ;;  %v2186_v5 = vadd.f32 %v3564_v61, %v2185_v2 }
 0x96b   : > { %v2188_v4 = vpop.f32.mrb[18].mxu0 }
 0x96c   : > { %v2189_v6 = vadd.f32 %v3564_v61, %v2188_v4  ;;  %v3736_v7 = vpop.f32.mrb[19].mxu0 }
 0x96e   : > { %v2258_v9 = vpack.c.bf16 %v2189_v6, %v2186_v5 }
 0x970   : > { %2387 = vrot.lane.b32.xlu1 %v2258_v9, %s4425_s5  ;;  %3748 = vmatmul.mubr.msk.bf16.vlgmr.msra.gmra.mrb[20].mxu0 %vm1443_vm0, %v2258_v9 }
 0x971   : > { %3758 = vmatpush3.bf16.xpose.msra.mxu0 %v2395_v10  ;;  %3759 = vmatprep.mubr.msk.bf16.mxu0 %vm4424_vm14, %v4423_v19 }
 0x972   : > { %3769 = vmatprep.subr.bf16.mxu0 %v4423_v19 }
 0x974   : > { %2524 = vrot.lane.b32.xlu1 %v2258_v9, %s4430_s4  ;;  %s5686_s4 = sld [smem:[#allocation59_spill]] }
 0x978   : > { %2663 = vrot.lane.b32.xlu1 %v5280_v63, %s4431_s28 }
 0x97c   : > { %2661 = vrot.lane.b32.xlu1 %v2258_v9, %s4431_s28  ;;  %s5687_s28 = scalar_lea.vmem %s5686_s4, %s4993_s24 }
 0x9e2   : > { %v2388_v11 = vpop.permute.xlu1 %2387 }
 0x9e3   : > { %3760 = vmatmul.mubr.msk.bf16.vlgmr.msra.gmra.mrb[24].mxu0 %vm1443_vm0, %v2388_v11 }
 0x9e4   : > { %3770 = vmatpush3.bf16.xpose.msra.mxu0 %v2532_v12  ;;  %3771 = vmatprep.mubr.msk.bf16.mxu0 %vm4424_vm14, %v4423_v19 }
 0x9e5   : > { %3781 = vmatprep.subr.bf16.mxu0 %v4423_v19 }
 0x9e6   : > { %v2525_v13 = vpop.permute.xlu1 %2524 }
 0x9ea   : > { %v2664_v14 = vpop.permute.xlu1 %2663 }
 0x9eb   : > { %v2669_v15 = vsel %vm1443_vm0, %v2664_v14, 0  ;;  %3772 = vmatmul.mubr.msk.bf16.vlgmr.msra.gmra.mrb[28].mxu0 %vm1443_vm0, %v2525_v13 }
 0x9ec   : > { %3782 = vmatpush3.bf16.xpose.msra.mxu0 %v2669_v15  ;;  %3783 = vmatprep.mubr.msk.bf16.mxu0 %vm4424_vm14, %v4423_v19 }
 0x9ed   : > { %3793 = vmatprep.subr.bf16.mxu0 %v4423_v19 }
 0x9ee   : > { %v2662_v16 = vpop.permute.xlu1 %2661 }
 0x9f3   : > { %3784 = vmatmul.mubr.msk.bf16.vlgmr.msra.gmra.mrb[32].mxu0 %vm1443_vm0, %v2662_v16 }
 0x9f4   : > { %3797 = vmatprep.mubr.msk.bf16.mxu0 %vm4424_vm14, %v4423_v19 }
 0xa43   : > { %v2300_v17 = vpop.f32.mrb[20].mxu0 }
 0xa44   : > { %v2307_v20 = vmul.f32 0.35355338, %v2300_v17  ;;  %v3749_v21 = vpop.f32.mrb[21].mxu0 }
 0xa45   : > { %v2303_v23 = vpop.f32.mrb[22].mxu0 }
 0xa46   : > { %v2308_v25 = vmul.f32 0.35355338, %v2303_v23  ;;  %v3750_v22 = vpop.f32.mrb[23].mxu0  ;;  %v2309_v26 = vadd.f32 %v2307_v20, %v1368_v18 }
 0xa48   : > { %v2311_v27 = vsel %vm1443_vm0, %v2309_v26, -inf  ;;  %v2310_v28 = vadd.f32 %v2308_v25, %v1369_v24 }
 0xa49   : > { %2312 = vmax.xlane.f32.xlu1 %v2311_v27 }
 0xa4a   : > { %v2314_v29 = vsel %vm1574_vm5, %v2310_v28, -inf }
 0xa4b   : > { %2315 = vmax.xlane.f32.xlu0 %v2314_v29 }
 0xab6   : > { %v2431_v30 = vpop.f32.mrb[24].mxu0 }
 0xab7   : > { %v2438_v32 = vmul.f32 0.35355338, %v2431_v30  ;;  %v3761_v33 = vpop.f32.mrb[25].mxu0 }
 0xab8   : > { %v2434_v34 = vpop.f32.mrb[26].mxu0 }
 0xab9   : > { %v2439_v35 = vmul.f32 0.35355338, %v2434_v34  ;;  %v3762_v36 = vpop.f32.mrb[27].mxu0  ;;  %v2440_v37 = vadd.f32 %v2438_v32, %v1368_v18 }
 0xabb   : > { %v2442_v38 = vsel %vm1443_vm0, %v2440_v37, -inf  ;;  %v2441_v39 = vadd.f32 %v2439_v35, %v1369_v24 }
 0xabc   : > { %2443 = vmax.xlane.f32.xlu0 %v2442_v38 }
 0xabd   : > { %v2445_v40 = vsel %vm1574_vm5, %v2441_v39, -inf }
 0xabe   : > { %2446 = vmax.xlane.f32.xlu1 %v2445_v40  ;;  %v2568_v41 = vpop.f32.mrb[28].mxu0 }
 0xabf   : > { %v2575_v42 = vmul.f32 0.35355338, %v2568_v41  ;;  %v3773_v43 = vpop.f32.mrb[29].mxu0 }
 0xac0   : > { %v2571_v44 = vpop.f32.mrb[30].mxu0 }
 0xac1   : > { %v2576_v45 = vmul.f32 0.35355338, %v2571_v44  ;;  %v3774_v46 = vpop.f32.mrb[31].mxu0  ;;  %v5318_v47 = vadd.f32 %v2575_v42, %v1368_v18 }
 0xac3   : > { %v2579_v48 = vsel %vm1443_vm0, %v5318_v47, -inf  ;;  %v2578_v49 = vadd.f32 %v2576_v45, %v1369_v24 }
 0xac4   : > { %2580 = vmax.xlane.f32.xlu0 %v2579_v48 }
 0xac5   : > { %v2582_v50 = vsel %vm1574_vm5, %v2578_v49, -inf }
 0xac6   : > { %2583 = vmax.xlane.f32.xlu1 %v2582_v50  ;;  %v2705_v53 = vpop.f32.mrb[32].mxu0 }
 0xac7   : > { %v2712_v56 = vmul.f32 0.35355338, %v2705_v53  ;;  %v3785_v57 = vpop.f32.mrb[33].mxu0 }
 0xac8   : > { %v2708_v58 = vpop.f32.mrb[34].mxu0 }
 0xac9   : > { %v2713_v59 = vmul.f32 0.35355338, %v2708_v58  ;;  %v3786_v60 = vpop.f32.mrb[35].mxu0  ;;  %v2714_v62 = vadd.f32 %v2712_v56, %v1368_v18 }
 0xacb   : > { %v2716_v0 = vsel %vm1443_vm0, %v2714_v62, -inf  ;;  %v2715_v1 = vadd.f32 %v2713_v59, %v1369_v24 }
 0xacc   : > { %2717 = vmax.xlane.f32.xlu0 %v2716_v0 }
 0xacd   : > { %v2719_v61 = vsel %vm1574_vm5, %v2715_v1, -inf }
 0xace   : > { %2720 = vmax.xlane.f32.xlu1 %v2719_v61 }
 0xad6   : > { %v2313_v2 = vpop.xlane.xlu1 %2312 }
 0xad7   : > { %v2317_v3 = vsub.f32 %v2309_v26, %v2313_v2 }
 0xad8   : > { %v2316_v4 = vpop.xlane.xlu0 %2315 }
 0xad9   : > { %v2319_v5 = vmul.f32 1.442695, %v2317_v3  ;;  %v2318_v6 = vsub.f32 %v2310_v28, %v2316_v4 }
 0xadb   : > { %4025 = vpow2.f32 %v2319_v5  ;;  %v2321_v7 = vmul.f32 1.442695, %v2318_v6 }
 0xadd   : > { %4027 = vpow2.f32 %v2321_v7 }
 0xae5   : > { %v5325_v8 = vpop.eup %4025 }
 0xae6   : > { %v2323_v9 = vsel %vm1443_vm0, %v5325_v8, 0.0 }
 0xae7   : > { %v4028_v10 = vpop.eup %4027  ;;  %2324 = vadd.xlane.f32.xlu0 %v2323_v9 }
 0xae8   : > { %v2326_v31 = vsel %vm1574_vm5, %v4028_v10, 0.0 }
 0xae9   : > { %2327 = vadd.xlane.f32.xlu1 %v2326_v31 }
 0xafa   : > { %2465 = vrot.lane.b32.xlu1 %v5280_v63, %s4428_s27 }
 0xb49   : > { %v2444_v11 = vpop.xlane.xlu0 %2443 }
 0xb4a   : > { %v2448_v12 = vsub.f32 %v2440_v37, %v2444_v11 }
 0xb4b   : > { %v2447_v13 = vpop.xlane.xlu1 %2446 }
 0xb4c   : > { %v2450_v14 = vmul.f32 1.442695, %v2448_v12  ;;  %v2449_v15 = vsub.f32 %v2441_v39, %v2447_v13 }
 0xb4e   : > { %4029 = vpow2.f32 %v2450_v14  ;;  %v2452_v16 = vmul.f32 1.442695, %v2449_v15 }
 0xb50   : > { %4031 = vpow2.f32 %v2452_v16 }
 0xb51   : > { %v2581_v33 = vpop.xlane.xlu0 %2580 }
 0xb52   : > { %v2585_v34 = vsub.f32 %v5318_v47, %v2581_v33 }
 0xb53   : > { %v2584_v17 = vpop.xlane.xlu1 %2583 }
 0xb54   : > { %v2586_v18 = vsub.f32 %v2578_v49, %v2584_v17  ;;  %v2587_v36 = vmul.f32 1.442695, %v2585_v34 }
 0xb56   : > { %v2589_v20 = vmul.f32 1.442695, %v2586_v18 }
 0xb58   : > { %v4030_v21 = vpop.eup %4029  ;;  %4033 = vpow2.f32 %v2589_v20 }
 0xb59   : > { %v2454_v23 = vsel %vm1443_vm0, %v4030_v21, 0.0  ;;  %v2718_v35 = vpop.xlane.xlu0 %2717 }
 0xb5a   : > { %v4032_v24 = vpop.eup %4031  ;;  %2455 = vadd.xlane.f32.xlu0 %v2454_v23  ;;  %v2722_v37 = vsub.f32 %v2714_v62, %v2718_v35 }
 0xb5b   : > { %v2721_v25 = vpop.xlane.xlu1 %2720  ;;  %v2457_v22 = vsel %vm1574_vm5, %v4032_v24, 0.0 }
 0xb5c   : > { %v2723_v26 = vsub.f32 %v2715_v1, %v2721_v25  ;;  %2458 = vadd.xlane.f32.xlu1 %v2457_v22  ;;  %v2724_v38 = vmul.f32 1.442695, %v2722_v37 }
 0xb5e   : > { %v2726_v27 = vmul.f32 1.442695, %v2723_v26 }
 0xb60   : > { %4035 = vpow2.f32 %v2726_v27  ;;  %v3981_v27 = vld [vmem:[%s5683_s30] sm:$0xff]  }
 0xb61   : > { %4037 = vpow2.f32 %v2587_v36  ;;  %3794 = vmatpush3.bf16.msra.mxu0 %v3981_v27 }
 0xb62   : > { %v5334_v28 = vpop.eup %4033  ;;  %4039 = vpow2.f32 %v2724_v38  ;;  %3795 = vmatprep.subr.bf16.mxu0 %v4423_v19 }
 0xb63   : > { %v2594_v29 = vsel %vm1574_vm5, %v5334_v28, 0.0 }
 0xb64   : > { %2595 = vadd.xlane.f32.xlu1 %v2594_v29  ;;  %v3982_v29 = vld [vmem:[%s5683_s30 + $0x8] sm:$0xff]  }
 0xb65   : > { %3796 = vmatpush3.bf16.msra.mxu0 %v3982_v29  ;;  %v3987_v29 = vld [vmem:[%s5062_s1 + $0x10] sm:$0xff]  }
 0xb66   : > { %3809 = vmatprep.subr.bf16.mxu0 %v4423_v19 }
 0xb6a   : > { %v5338_v30 = vpop.eup %4035 }
 0xb6b   : > { %v2731_v32 = vsel %vm1574_vm5, %v5338_v30, 0.0  ;;  %v4038_v39 = vpop.eup %4037 }
 0xb6c   : > { %2732 = vadd.xlane.f32.xlu1 %v2731_v32  ;;  %v2591_v40 = vsel %vm1443_vm0, %v4038_v39, 0.0  ;;  %v4040_v41 = vpop.eup %4039 }
 0xb6d   : > { %v2728_v42 = vsel %vm1443_vm0, %v4040_v41, 0.0 }
 0xb70   : > { %2335 = vrot.lane.b32.xlu0 %v5280_v63, %s4426_s0 }
 0xb74   : > { %v2325_v44 = vpop.xlane.xlu0 %2324 }
 0xb76   : > { %v2328_v43 = vpop.xlane.xlu1 %2327 }
 0xb77   : > { %4041 = vrcp.f32 %v2328_v43 }
 0xb78   : > { %4043 = vrcp.f32 %v2325_v44 }
 0xb7a   : > { %v2466_v45 = vpop.permute.xlu1 %2465 }
 0xb7d   : > { %2602 = vrot.lane.b32.xlu1 %v5280_v63, %s4427_s15  ;;  %s5684_s15 = sld [smem:[#allocation58_spill]] }
 0xb81   : > { %v4042_v46 = vpop.eup %4041 }
 0xb82   : > { %v4044_v48 = vpop.eup %4043  ;;  %v2332_v50 = vmul.f32 %v4042_v46, %v4028_v10 }
 0xb83   : > { %v2331_v56 = vmul.f32 %v4044_v48, %v5325_v8  ;;  %s5685_s27 = scalar_lea.vmem %s5684_s15, %s4993_s24 }
 0xb85   : > { %v2333_v58 = vpack.c.bf16 %v2332_v50, %v2331_v56 }
 0xb8f   : > { %2592 = vadd.xlane.f32.xlu0 %v2591_v40 }
 0xb93   : > { %2729 = vadd.xlane.f32.xlu0 %v2728_v42 }
 0xba9   : > { %2739 = vrot.lane.b32.xlu0 %v5280_v63, %s4429_s17  ;;  %v2471_v63 = vsel %vm1525_vm3, %v2466_v45, 0 }
 0xbe7   : > { %v2456_v47 = vpop.xlane.xlu0 %2455 }
 0xbe8   : > { %4045 = vrcp.f32 %v2456_v47  ;;  %v3580_v47 = vld [vmem:[%s5685_s27] ss:$0 sm:$0xff] }
 0xbe9   : > { %v2459_v49 = vpop.xlane.xlu1 %2458 }
 0xbea   : > { %4047 = vrcp.f32 %v2459_v49 }
 0xbeb   : > { %v2336_v53 = vpop.permute.xlu0 %2335 }
 0xbec   : > { %v2341_v57 = vsel %vm1525_vm3, %v2336_v53, 0 }
 0xbed   : > { %3752 = vmatpush3.bf16.msra.mxu1 %v2341_v57 }
 0xbee   : > { %3763 = vmatprep.subr.bf16.mxu1 %v4423_v19 }
 0xbf0   : > { %3754 = vmatmul.mubr.msk.bf16.vlgmr.msra.gmra.mrb[28].mxu1 %vm1443_vm0, %v2333_v58 }
 0xbf1   : > { %3764 = vmatpush3.bf16.msra.mxu1 %v2471_v63  ;;  %3765 = vmatprep.mubr.msk.bf16.mxu1 %vm4424_vm14, %v4423_v19  ;;  %v2596_v1 = vpop.xlane.xlu1 %2595 }
 0xbf2   : > { %v4046_v59 = vpop.eup %4045  ;;  %3775 = vmatprep.subr.bf16.mxu1 %v4423_v19  ;;  %4049 = vrcp.f32 %v2596_v1 }
 0xbf3   : > { %v2462_v62 = vmul.f32 %v4046_v59, %v4030_v21 }
 0xbf4   : > { %v4048_v60 = vpop.eup %4047 }
 0xbf5   : > { %v2463_v0 = vmul.f32 %v4048_v60, %v4032_v24 }
 0xbf7   : > { %v2464_v61 = vpack.c.bf16 %v2463_v0, %v2462_v62 }
 0xbf9   : > { %3766 = vmatmul.mubr.msk.bf16.vlgmr.msra.gmra.mrb[32].mxu1 %vm1443_vm0, %v2464_v61  ;;  %v2733_v2 = vpop.xlane.xlu1 %2732 }
 0xbfa   : > { %3777 = vmatprep.mubr.msk.bf16.mxu1 %vm4424_vm14, %v4423_v19 }
 0xbfc   : > { %v4050_v7 = vpop.eup %4049 }
 0xbfd   : > { %v2603_v3 = vpop.permute.xlu1 %2602  ;;  %v2600_v9 = vmul.f32 %v4050_v7, %v5334_v28  ;;  %v3984_v7 = vld [vmem:[%s5048_s16 + $0x8] sm:$0xff]  }
 0xbfe   : > { %v2608_v4 = vsel %vm1525_vm3, %v2603_v3, 0 }
 0xbff   : > { %3776 = vmatpush3.bf16.msra.mxu1 %v2608_v4 }
 0xc00   : > { %3787 = vmatprep.subr.bf16.mxu1 %v4423_v19 }
 0xc1c   : > { %v2593_v5 = vpop.xlane.xlu0 %2592 }
 0xc1d   : > { %4051 = vrcp.f32 %v2593_v5 }
 0xc20   : > { %v2730_v6 = vpop.xlane.xlu0 %2729 }
 0xc21   : > { %4053 = vrcp.f32 %v2730_v6  ;;  %v3983_v6 = vld [vmem:[%s5048_s16] sm:$0xff]  }
 0xc22   : > { %4055 = vrcp.f32 %v2733_v2 }
 0xc24   : > { %v2740_v31 = vpop.permute.xlu0 %2739 }
 0xc25   : > { %v2745_v13 = vsel %vm1525_vm3, %v2740_v31, 0 }
 0xc27   : > { %v4052_v8 = vpop.eup %4051 }
 0xc28   : > { %v2599_v10 = vmul.f32 %v4052_v8, %v4038_v39  ;;  %v3985_v8 = vld [vmem:[%s5062_s1] sm:$0xff]  }
 0xc2a   : > { %v2601_v11 = vpack.c.bf16 %v2600_v9, %v2599_v10  ;;  %v3986_v9 = vld [vmem:[%s5062_s1 + $0x8] sm:$0xff]  }
 0xc2b   : > { %v4054_v12 = vpop.eup %4053 }
 0xc2c   : > { %3778 = vmatmul.mubr.msk.bf16.vlgmr.msra.gmra.mrb[36].mxu1 %vm1443_vm0, %v2601_v11  ;;  %v4056_v14 = vpop.eup %4055  ;;  %v2736_v15 = vmul.f32 %v4054_v12, %v4040_v41 }
 0xc2d   : > { %3788 = vmatpush3.bf16.msra.mxu1 %v2745_v13  ;;  %3789 = vmatprep.mubr.msk.bf16.mxu1 %vm4424_vm14, %v4423_v19  ;;  %v2737_v16 = vmul.f32 %v4056_v14, %v5338_v30 }
 0xc2e   : > { %3801 = vmatprep.subr.bf16.mxu1 %v4423_v19 }
 0xc2f   : > { %v2738_v17 = vpack.c.bf16 %v2737_v16, %v2736_v15  ;;  %v3584_v16 = vld [vmem:[%s5687_s28] ss:$0 sm:$0xff] }
 0xc34   : > { %3790 = vmatmul.mubr.msk.bf16.vlgmr.msra.gmra.mrb[40].mxu1 %vm1443_vm0, %v2738_v17 }
 0xc35   : > { %3805 = vmatprep.mubr.msk.bf16.mxu1 %vm4424_vm14, %v4423_v19  ;;  %3802 = vmatpush3.bf16.msra.mxu1 %v3983_v6 }
 0xc36   : > { %3803 = vmatprep.subr.bf16.mxu1 %v4423_v19 }
 0xc39   : > { %3804 = vmatpush3.bf16.msra.mxu1 %v3984_v7  ;;  %v3596_v7 = vld [vmem:[%s1306_s22] ss:$0 sm:$0xff] }
 0xcc3   : > { %v2377_v18 = vpop.f32.mrb[28].mxu1 }
 0xcc4   : > { %2384 = vst.msk [vmem:[#allocation4] sm:$0xff] %vm1443_vm0, %v2377_v18  ;;  %v3755_v20 = vpop.f32.mrb[29].mxu1 }
 0xcc5   : > { %v2380_v21 = vpop.f32.mrb[30].mxu1 }
 0xcc6   : > { %2385 = vst.msk [vmem:[#allocation4 + $0x8] sm:$0x1] %vm1574_vm5, %v2380_v21  ;;  %v3756_v23 = vpop.f32.mrb[31].mxu1 }
 0xccc   : > { %v2507_v24 = vpop.f32.mrb[32].mxu1 }
 0xccd   : > { %2516 = vrot.lane.b32.xlu1 %v2507_v24, %s4437_s25  ;;  %v3767_v25 = vpop.f32.mrb[33].mxu1 }
 0xcce   : > { %v2510_v22 = vpop.f32.mrb[34].mxu1 }
 0xccf   : > { %2518 = vrot.lane.b32.xlu0 %v2510_v22, %s4437_s25  ;;  %v3768_v26 = vpop.f32.mrb[35].mxu1  ;;  %s5688_s25 = sld [smem:[#allocation60_spill]] }
 0xcff   : > { %v2644_v28 = vpop.f32.mrb[36].mxu1 }
 0xd00   : > { %2653 = vrot.lane.b32.xlu1 %v2644_v28, %s4438_s13  ;;  %v3779_v30 = vpop.f32.mrb[37].mxu1 }
 0xd01   : > { %v2647_v32 = vpop.f32.mrb[38].mxu1  ;;  %v3988_v30 = vld [vmem:[%s5062_s1 + $0x18] sm:$0xff]  }
 0xd02   : > { %2655 = vrot.lane.b32.xlu0 %v2647_v32, %s4438_s13  ;;  %v3780_v33 = vpop.f32.mrb[39].mxu1  ;;  %s5689_s13 = scalar_lea.vmem %s5688_s25, %s4993_s24  ;;  %v3586_v32 = vld [vmem:[%s5691_s21] ss:$0 sm:$0xff] }
 0xd03   : > { %v3585_v20 = vld [vmem:[%s5689_s13] ss:$0 sm:$0xff] }
 0xd07   : > { %v2781_v34 = vpop.f32.mrb[40].mxu1 }
 0xd08   : > { %2790 = vrot.lane.b32.xlu1 %v2781_v34, %s4439_s20  ;;  %v3791_v35 = vpop.f32.mrb[41].mxu1 }
 0xd09   : > { %v2784_v36 = vpop.f32.mrb[42].mxu1 }
 0xd0a   : > { %2792 = vrot.lane.b32.xlu0 %v2784_v36, %s4439_s20  ;;  %v3792_v37 = vpop.f32.mrb[43].mxu1 }
 0xd3f   : > { %v2517_v38 = vpop.permute.xlu1 %2516 }
 0xd40   : > { %2522 = vst.msk [vmem:[#allocation4] sm:$0xff] %vm1711_vm6, %v2517_v38 }
 0xd41   : > { %v2519_v39 = vpop.permute.xlu0 %2518 }
 0xd42   : > { %2523 = vst.msk [vmem:[#allocation4 + $0x8] sm:$0x1] %vm1713_vm7, %v2519_v39 }
 0xd72   : > { %v2654_v40 = vpop.permute.xlu1 %2653 }
 0xd73   : > { %2659 = vst.msk [vmem:[#allocation4] sm:$0xff] %vm1850_vm8, %v2654_v40 }
 0xd74   : > { %v2656_v41 = vpop.permute.xlu0 %2655 }
 0xd75   : > { %2660 = vst.msk [vmem:[#allocation4 + $0x8] sm:$0x1] %vm1852_vm9, %v2656_v41 }
 0xd7a   : > { %v2791_v42 = vpop.permute.xlu1 %2790 }
 0xd7b   : > { %2796 = vst.msk [vmem:[#allocation4] sm:$0xff] %vm1989_vm10, %v2791_v42 }
 0xd7c   : > { %v2793_v43 = vpop.permute.xlu0 %2792 }
 0xd7d   : > { %2797 = vst.msk [vmem:[#allocation4 + $0x8] sm:$0x1] %vm1991_vm11, %v2793_v43 }
 0xd82   : > { %v2798_v44 = vld [vmem:[#allocation4] sm:$0xff] }
 0xd84   : > { %v2799_v45 = vld [vmem:[#allocation4 + $0x8] sm:$0x1] }
 0xd85   : > { %v2800_v46 = vpack.c.bf16 %v2799_v45, %v2798_v44 }
 0xd87   : > { %3798 = vmatmul.mubr.msk.bf16.vlgmr.msra.gmra.mrb[36].mxu0 %vm1394_vm15, %v2800_v46 }
 0xd88   : > { %3817 = vmatprep.mubr.msk.bf16.mxu0 %vm4424_vm14, %v4423_v19  ;;  %3810 = vmatpush3.bf16.msra.mxu0 %v3985_v8 }
 0xd89   : > { %3811 = vmatprep.subr.bf16.mxu0 %v4423_v19 }
 0xd8c   : > { %3812 = vmatpush3.bf16.msra.mxu0 %v3986_v9 }
 0xd8d   : > { %3813 = vmatprep.subr.bf16.mxu0 %v4423_v19 }
 0xd90   : > { %3814 = vmatpush3.bf16.msra.mxu0 %v3987_v29 }
 0xd91   : > { %3815 = vmatprep.subr.bf16.mxu0 %v4423_v19  ;;  %v3590_v19 = vld [vmem:[%s1303_s14] ss:$0 sm:$0xff] }
 0xd94   : > { %3816 = vmatpush3.bf16.msra.mxu0 %v3988_v30 }
 0xe5a   : > { %v2861_v48 = vpop.f32.mrb[36].mxu0 }
 0xe5b   : > { %v2862_v49 = vadd.f32 %v3580_v47, %v2861_v48  ;;  %v3799_v50 = vpop.f32.mrb[37].mxu0 }
 0xe5c   : > { %v2864_v53 = vpop.f32.mrb[38].mxu0 }
 0xe5d   : > { %v2865_v56 = vadd.f32 %v3580_v47, %v2864_v53  ;;  %v3800_v57 = vpop.f32.mrb[39].mxu0  ;;  %v2868_v58 = vadd.f32 %v2862_v49, %v5265_v54 }
 0xe5f   : > { %v2872_v63 = vsel %vm1394_vm15, %v2868_v58, 0.0  ;;  %v2869_v59 = vadd.f32 %v2865_v56, %v5268_v55 }
 0xe60   : > { %2873 = vadd.xlane.f32.xlu1 %v2872_v63 }
 0xe61   : > { %v2875_v60 = vsel %vm2070_vm12, %v2869_v59, 0.0 }
 0xe62   : > { %2876 = vadd.xlane.f32.xlu0 %v2875_v60 }
 0xeed   : > { %v2874_v62 = vpop.xlane.xlu1 %2873 }
 0xeee   : > { %v2878_v0 = vmul.f32 0.03125, %v2874_v62 }
 0xeef   : > { %v2877_v1 = vpop.xlane.xlu0 %2876 }
 0xef0   : > { %v2880_v61 = vsub.f32 %v2868_v58, %v2878_v0  ;;  %v2879_v2 = vmul.f32 0.03125, %v2877_v1 }
 0xef2   : > { %v2881_v3 = vsub.f32 %v2869_v59, %v2879_v2  ;;  %v2882_v4 = vmul.f32 %v2880_v61, %v2880_v61 }
 0xef4   : > { %v2884_v54 = vsel %vm1394_vm15, %v2882_v4, 0.0  ;;  %v2883_v5 = vmul.f32 %v2881_v3, %v2881_v3 }
 0xef5   : > { %2885 = vadd.xlane.f32.xlu0 %v2884_v54 }
 0xef6   : > { %v2887_v55 = vsel %vm2070_vm12, %v2883_v5, 0.0 }
 0xef7   : > { %2888 = vadd.xlane.f32.xlu1 %v2887_v55 }
 0xf82   : > { %v2886_v10 = vpop.xlane.xlu0 %2885 }
 0xf83   : > { %v2890_v31 = vmul.f32 0.03125, %v2886_v10  ;;  %v3597_v10 = vld [vmem:[%s1309_s26] ss:$0 sm:$0xff] }
 0xf84   : > { %v2889_v11 = vpop.xlane.xlu1 %2888 }
 0xf85   : > { %v2892_v12 = vadd.f32 1e-05, %v2890_v31  ;;  %v2891_v13 = vmul.f32 0.03125, %v2889_v11 }
 0xf87   : > { %4057 = vrsqrt.f32 %v2892_v12  ;;  %v2893_v14 = vadd.f32 1e-05, %v2891_v13 }
 0xf89   : > { %4059 = vrsqrt.f32 %v2893_v14 }
 0xf91   : > { %v4058_v15 = vpop.eup %4057 }
 0xf92   : > { %v2896_v17 = vmul.f32 %v4058_v15, %v2880_v61 }
 0xf93   : > { %v4060_v18 = vpop.eup %4059 }
 0xf94   : > { %v2904_v21 = vmul.f32 %v3584_v16, %v2896_v17  ;;  %v2897_v23 = vmul.f32 %v4060_v18, %v2881_v3 }
 0xf96   : > { %v2905_v24 = vmul.f32 %v3584_v16, %v2897_v23  ;;  %v2912_v25 = vadd.f32 %v3585_v20, %v2904_v21 }
 0xf98   : > { %v2913_v22 = vadd.f32 %v3585_v20, %v2905_v24  ;;  %v2914_v26 = vmul.f32 %v2912_v25, %v5260_v51 }
 0xf9a   : > { %v2915_v27 = vmul.f32 %v2913_v22, %v5262_v52 }
 0xf9c   : > { %v2916_v28 = vpack.c.bf16 %v2915_v27, %v2914_v26 }
 0xf9e   : > { %3806 = vmatmul.mubr.msk.bf16.vlgmr.msra.gmra.mrb[44].mxu1 %vm1394_vm15, %v2916_v28 }
0x1071   : > { %v2977_v33 = vpop.f32.mrb[44].mxu1 }
0x1072   : > { %v2978_v34 = vadd.f32 %v3586_v32, %v2977_v33  ;;  %v3807_v35 = vpop.f32.mrb[45].mxu1 }
0x1073   : > { %v2980_v36 = vpop.f32.mrb[46].mxu1 }
0x1074   : > { %v2981_v37 = vadd.f32 %v3586_v32, %v2980_v36  ;;  %v3808_v38 = vpop.f32.mrb[47].mxu1  ;;  %v2984_v39 = vmax.f32 %v2978_v34, 0.0 }
0x1076   : > { %v2985_v40 = vmax.f32 %v2981_v37, 0.0 }
0x1078   : > { %v2986_v41 = vpack.c.bf16 %v2985_v40, %v2984_v39 }
0x107a   : > { %3818 = vmatmul.mubr.msk.bf16.vlgmr.msra.gmra.mrb[40].mxu0 %vm3026_vm13, %v2986_v41 }
0x114d   : > { %v3064_v42 = vpop.f32.mrb[40].mxu0 }
0x114e   : > { %v3065_v43 = vadd.f32 %v3590_v19, %v3064_v42  ;;  %v3819_v44 = vpop.f32.mrb[41].mxu0 }
0x114f   : > { %v3067_v45 = vpop.f32.mrb[42].mxu0 }
0x1150   : > { %v3068_v46 = vadd.f32 %v3590_v19, %v3067_v45  ;;  %v3820_v47 = vpop.f32.mrb[43].mxu0  ;;  %v3071_v48 = vadd.f32 %v3065_v43, %v2914_v26 }
0x1152   : > { %v3075_v49 = vsel %vm1394_vm15, %v3071_v48, 0.0  ;;  %v3072_v50 = vadd.f32 %v3068_v46, %v2915_v27 }
0x1153   : > { %3076 = vadd.xlane.f32.xlu0 %v3075_v49 }
0x1154   : > { %v3078_v53 = vsel %vm2070_vm12, %v3072_v50, 0.0 }
0x1155   : > { %3079 = vadd.xlane.f32.xlu1 %v3078_v53 }
0x11e0   : > { %v3077_v56 = vpop.xlane.xlu0 %3076 }
0x11e1   : > { %v3081_v57 = vmul.f32 0.03125, %v3077_v56 }
0x11e2   : > { %v3080_v58 = vpop.xlane.xlu1 %3079 }
0x11e3   : > { %v3083_v63 = vsub.f32 %v3071_v48, %v3081_v57  ;;  %v3082_v59 = vmul.f32 0.03125, %v3080_v58 }
0x11e5   : > { %v3084_v60 = vsub.f32 %v3072_v50, %v3082_v59  ;;  %v3085_v62 = vmul.f32 %v3083_v63, %v3083_v63 }
0x11e7   : > { %v3087_v0 = vsel %vm1394_vm15, %v3085_v62, 0.0  ;;  %v3086_v1 = vmul.f32 %v3084_v60, %v3084_v60 }
0x11e8   : > { %3088 = vadd.xlane.f32.xlu0 %v3087_v0 }
0x11e9   : > { %v3090_v61 = vsel %vm2070_vm12, %v3086_v1, 0.0 }
0x11ea   : > { %3091 = vadd.xlane.f32.xlu1 %v3090_v61 }
0x1275   : > { %v3089_v2 = vpop.xlane.xlu0 %3088 }
0x1276   : > { %v3093_v3 = vmul.f32 0.03125, %v3089_v2 }
0x1277   : > { %v3092_v4 = vpop.xlane.xlu1 %3091 }
0x1278   : > { %v3095_v54 = vadd.f32 1e-05, %v3093_v3  ;;  %v3094_v5 = vmul.f32 0.03125, %v3092_v4 }
0x127a   : > { %4061 = vrsqrt.f32 %v3095_v54  ;;  %v3096_v55 = vadd.f32 1e-05, %v3094_v5 }
0x127c   : > { %4063 = vrsqrt.f32 %v3096_v55 }
0x1284   : > { %v4062_v6 = vpop.eup %4061 }
0x1285   : > { %v3099_v8 = vmul.f32 %v4062_v6, %v3083_v63 }
0x1286   : > { %v4064_v9 = vpop.eup %4063 }
0x1287   : > { %v3107_v31 = vmul.f32 %v3596_v7, %v3099_v8  ;;  %v3100_v11 = vmul.f32 %v4064_v9, %v3084_v60 }
0x1289   : > { %v3115_v12 = vadd.f32 %v3597_v10, %v3107_v31  ;;  %v3108_v13 = vmul.f32 %v3596_v7, %v3100_v11 }
0x128b   : > { %v3117_v14 = vmul.f32 %v3115_v12, %v5260_v51  ;;  %v3116_v15 = vadd.f32 %v3597_v10, %v3108_v13 }
0x128d   : > { %3119 = vst.msk [vmem:[%s5075_s6] sm:$0xff] %vm1394_vm15, %v3117_v14  ;;  %v3118_v16 = vmul.f32 %v3116_v15, %v5262_v52 }
0x128f   : > { %3120 = vst.msk [vmem:[%s5075_s6 + $0x8] sm:$0x1] %vm2070_vm12, %v3118_v16 }
0x1290 PF: > { %s5695_s22 = sld [smem:[#allocation31_spill]]  ;;  %s5696_s29 = sld [smem:[#allocation23_spill]] }
0x1291   : > { %s5697_s2 = sld [smem:[#allocation24_spill]]  ;;  %s5699_s30 = sld [smem:[#allocation25_spill]] }
0x1292   : > { %s5698_s6 = sld [smem:[#allocation36_spill]]  ;;  %s5700_s7 = sld [smem:[#allocation26_spill]] }
0x1293   : > { %s5701_s3 = sld [smem:[#allocation37_spill]]  ;;  %s5702_s26 = sld [smem:[#allocation29_spill]] }
0x1294   : > { %s5703_s1 = sld [smem:[#allocation30_spill]]  ;;  %s5704_s8 = sld [smem:[#allocation34_spill]] }
0x1295   : > { %s5705_s27 = sld [smem:[#allocation35_spill]] }
0x1296   : > { %s50_s4 = sadd.s32 1, %s5695_s22  }
0x1297   : > { %p47_p5 = scmp.ge.s32.totalorder %s50_s4, 6  }
0x1299   :  { %49 = sbr.rel (!%p47_p5) target bundleno = 42 (0x2a), region = 300 }
0x12a0   :  { %3142 = vsyncpa [#allocation6], 1 }
0x12a1   :  { %3144 = vsyncpa [#allocation6 + $0x1], 1 }
0x12a2   :  { %3145 = vsyncpa [#allocation8], 1 }
0x12a3   :  { %3147 = vsyncpa [#allocation8 + $0x1], 1 }
0x12a4   :  { %3148 = vsyncpa [#allocation11], 1 }
0x12a5   :  { %3150 = vsyncpa [#allocation11 + $0x1], 1 }
0x12a6   :  { %3151 = vsyncpa [#allocation14], 1 }
0x12a7   :  { %3153 = vsyncpa [#allocation14 + $0x1], 1 }
0x12a8   :  { %3154 = vsyncpa [#allocation17], 1 }
0x12a9   :  { %3156 = vsyncpa [#allocation17 + $0x1], 1 }

</bundles_post_ra>
